<compile_context>
chip_gen: v6e
topology: v6e:2x2x1
jax: 0.10.0
libtpu: 0.0.40
codegen_flags: <defaults>
</compile_context>

<pallas_src>
import jax
import jax.numpy as jnp
from jax import lax
from jax.experimental import pallas as pl
from jax.experimental.pallas import tpu as pltpu

# ---- small, TPU-tile-friendly model dims ----
BATCH = 2
NUM_CHOICES = 4
N = BATCH * NUM_CHOICES        # batch_size * num_choices rows
T = 8                          # num_frames
DV = 128                       # video_embed_dim
DT = 256                       # text_embed_dim (SentenceTransformer output)
H = 128                        # hidden_dim (embed_dim of cross-attention)
MLP1 = 256
MLP2 = 128
EPS = 1e-5                     # nn.LayerNorm default eps
OUT_LANES = 128                # lane-dense logits buffer width


def _offsets(segs):
    offs, cur = {}, 0
    for name, size in segs:
        offs[name] = (cur, size)
        cur += size
    return offs, cur


# Weight slab A: every weight whose input dim is 128 (= H = DV), concatenated
# along the output (lane) axis.  All column offsets are multiples of 128.
A_OFF, A_COLS = _offsets((
    ("w_ih", 4 * H),    # LSTM input->gates    (DV, 4H)
    ("w_hh", 4 * H),    # LSTM hidden->gates   (H, 4H)
    ("w_vo", H),        # folded attention value+out projection (H, H)
    ("f1w", 4 * H),     # FFN first linear     (H, 4H)
    ("m1w", MLP1),      # MLP head linear 1    (H, 256)
))

# Weight slab B: every weight whose output dim is 128, concatenated along the
# input (sublane) axis.  All row offsets are multiples of 8.
B_OFF, B_ROWS = _offsets((
    ("w_tf", DT),       # text_fc              (DT, H)
    ("f2w", 4 * H),     # FFN second linear    (4H, H)
    ("m2w", MLP1),      # MLP head linear 2    (256, 128)
))

# Bias slab: one (1, BIAS_LANES) vector; every segment is lane-aligned (x128).
BIAS_OFF, BIAS_LANES = _offsets((
    ("b_tf", H),
    ("b_lstm", 4 * H),  # b_ih + b_hh pre-summed (PyTorch i,f,g,o gate order)
    ("b_vo", H),        # folded attention bias: b_v @ W_o + b_o
    ("ln_g", H),
    ("ln_b", H),
    ("f1b", 4 * H),
    ("f2b", H),
    ("m1b", MLP1),
    ("m2b", MLP2),
    ("m3w", MLP2),      # final Linear(128, 1) weight stored as a 128-lane row
    ("m3b", 128),       # final bias scalar in lane 0, zero-padded to a tile
))


def _cols(ref, name, offs):
    off, size = offs[name]
    return ref[:, off:off + size]


def _rows(ref, name, offs):
    off, size = offs[name]
    return ref[off:off + size, :]


def _layer_norm(x, g, b):
    mu = jnp.mean(x, axis=-1, keepdims=True)
    var = jnp.mean((x - mu) ** 2, axis=-1, keepdims=True)
    return (x - mu) * lax.rsqrt(var + EPS) * g + b


def videoqa_kernel(text_ref, vid_ref, wa_ref, wb_ref, bias_ref, out_ref):
    f32 = jnp.float32
    dot = lambda a, b: jnp.dot(a, b, preferred_element_type=f32)

    # --- text_fc: query path (N, DT) @ (DT, H) + b ---
    q = dot(text_ref[...], _rows(wb_ref, "w_tf", B_OFF)) + _cols(bias_ref, "b_tf", BIAS_OFF)

    # --- single-layer LSTM over T frames ---
    # Input-side gate matmul hoisted out of the recurrence: one (T*N, DV)
    # matmul with 64 active sublanes instead of T=8 serialized 8-row matmuls.
    # vid_ref is time-major (T, N, DV); collapsing the leading dims is a free
    # reinterpretation, so row t*N + n of x_all is frame t of example n.
    x_all = vid_ref[...].reshape(T * N, DV)
    gates_x = dot(x_all, _cols(wa_ref, "w_ih", A_OFF)) + _cols(bias_ref, "b_lstm", BIAS_OFF)

    w_hh = _cols(wa_ref, "w_hh", A_OFF)
    h = jnp.zeros((N, H), f32)
    c = jnp.zeros((N, H), f32)
    # Fully unrolled recurrence (T=8 static).  Each step reads a contiguous,
    # statically-offset 8-sublane slice of the precomputed gate tensor; the
    # scheduler overlaps step t's EUP work with step t+1's MXU push.
    for t in range(T):
        gates = gates_x[t * N:(t + 1) * N, :] + dot(h, w_hh)      # (N, 4H)
        i_g = jax.nn.sigmoid(gates[:, 0 * H:1 * H])
        f_g = jax.nn.sigmoid(gates[:, 1 * H:2 * H])
        g_g = jnp.tanh(gates[:, 2 * H:3 * H])
        o_g = jax.nn.sigmoid(gates[:, 3 * H:4 * H])
        c = f_g * c + i_g * g_g
        h = o_g * jnp.tanh(c)
    video_embeds = h                                              # h_T: (N, H)

    # --- cross attention with seq_q = seq_kv = 1 ---
    # softmax over a single key == 1 (every head), so multi-head attention
    # reduces exactly to out_proj(V_proj(value)); W_vo/b_vo are folded offline.
    attn = dot(video_embeds, _cols(wa_ref, "w_vo", A_OFF)) + _cols(bias_ref, "b_vo", BIAS_OFF)

    ln_g = _cols(bias_ref, "ln_g", BIAS_OFF)
    ln_b = _cols(bias_ref, "ln_b", BIAS_OFF)

    # residual + shared layer norm (nn.Dropout is identity in eval mode)
    x = _layer_norm(q + attn, ln_g, ln_b)

    # FFN: Linear(H, 4H) -> ReLU -> Linear(4H, H), residual, same LayerNorm
    ff = jnp.maximum(dot(x, _cols(wa_ref, "f1w", A_OFF)) + _cols(bias_ref, "f1b", BIAS_OFF), 0.0)
    ff = dot(ff, _rows(wb_ref, "f2w", B_OFF)) + _cols(bias_ref, "f2b", BIAS_OFF)
    x = _layer_norm(x + ff, ln_g, ln_b)

    # --- MLP head: H -> 256 -> ReLU -> 128 -> ReLU -> 1 ---
    h1 = jnp.maximum(dot(x, _cols(wa_ref, "m1w", A_OFF)) + _cols(bias_ref, "m1b", BIAS_OFF), 0.0)
    h2 = jnp.maximum(dot(h1, _rows(wb_ref, "m2w", B_OFF)) + _cols(bias_ref, "m2b", BIAS_OFF), 0.0)
    # Linear(128, 1): y = sum(h2 * w_row) + b   (w stored as a (1, 128) row)
    m3w = _cols(bias_ref, "m3w", BIAS_OFF)
    m3b_off = BIAS_OFF["m3b"][0]
    m3b = bias_ref[:, m3b_off:m3b_off + 1]                        # (1, 1)
    logits = jnp.sum(h2 * m3w, axis=-1, keepdims=True) + m3b      # (N, 1)
    # Lane-dense store; the wrapper slices column 0.
    out_ref[...] = jnp.broadcast_to(logits, (N, OUT_LANES))


@jax.jit
def videoqa_forward(video_feats, text_embeds, packed_params):
    """video_feats: (N, T, DV) batch_first (PyTorch layout); text_embeds: (N, DT)."""
    slab_a, slab_b, bias_slab = packed_params
    # Tiny (8 KiB) one-time layout change done by XLA outside the kernel: a
    # time-major video makes every per-step gate read inside the recurrence a
    # contiguous static 8-sublane slice.
    video_tm = jnp.swapaxes(video_feats, 0, 1)                    # (T, N, DV)
    vmem = pl.BlockSpec(memory_space=pltpu.MemorySpace.VMEM)
    out = pl.pallas_call(
        videoqa_kernel,
        out_shape=jax.ShapeDtypeStruct((N, OUT_LANES), jnp.float32),
        in_specs=[vmem] * 5,
        out_specs=vmem,
    )(text_embeds, video_tm, slab_a, slab_b, bias_slab)
    return out[:, 0].reshape(-1, NUM_CHOICES)                     # logits.view(-1, 4)


def init_params(key):
    """Deterministic synthetic parameters (weights stored (in, out))."""
    ks = jax.random.split(key, 32)
    it = iter(ks)

    def rnd(shape, scale=0.05):
        return jax.random.normal(next(it), shape, jnp.float32) * scale

    return dict(
        w_tf=rnd((DT, H)), b_tf=rnd((1, H)),
        w_ih=rnd((DV, 4 * H)), w_hh=rnd((H, 4 * H)),
        b_lstm=rnd((1, 4 * H)),                 # b_ih + b_hh pre-summed
        w_v=rnd((H, H)), b_v=rnd((1, H)),       # value rows of MHA in_proj
        w_o=rnd((H, H)), b_o=rnd((1, H)),       # MHA out_proj
        ln_g=jnp.ones((1, H), jnp.float32), ln_b=jnp.zeros((1, H), jnp.float32),
        f1w=rnd((H, 4 * H)), f1b=rnd((1, 4 * H)),
        f2w=rnd((4 * H, H)), f2b=rnd((1, H)),
        m1w=rnd((H, MLP1)), m1b=rnd((1, MLP1)),
        m2w=rnd((MLP1, MLP2)), m2b=rnd((1, MLP2)),
        m3w=rnd((1, MLP2)), m3b=rnd((1, 1)),
    )


def pack_params(p):
    """One-time offline fold + pack into 3 slabs (out of the per-call hot path)."""
    # Exact fold of the seq-1 attention: out_proj(V_proj(h)) = h @ W_vo + b_vo.
    w_vo = p["w_v"] @ p["w_o"]
    b_vo = p["b_v"] @ p["w_o"] + p["b_o"]

    slab_a = jnp.concatenate(
        [p["w_ih"], p["w_hh"], w_vo, p["f1w"], p["m1w"]], axis=1)        # (128, 1920)
    slab_b = jnp.concatenate([p["w_tf"], p["f2w"], p["m2w"]], axis=0)    # (1024, 128)
    m3b_pad = jnp.concatenate([p["m3b"], jnp.zeros((1, 127), jnp.float32)], axis=1)
    bias_slab = jnp.concatenate(
        [p["b_tf"], p["b_lstm"], b_vo, p["ln_g"], p["ln_b"],
         p["f1b"], p["f2b"], p["m1b"], p["m2b"], p["m3w"], m3b_pad], axis=1)  # (1, 2304)

    assert slab_a.shape == (H, A_COLS)
    assert slab_b.shape == (B_ROWS, H)
    assert bias_slab.shape == (1, BIAS_LANES)
    return slab_a, slab_b, bias_slab


if __name__ == "__main__":
    key = jax.random.PRNGKey(0)
    k_vid, k_txt, k_par = jax.random.split(key, 3)

    video_feats = jax.random.normal(k_vid, (N, T, DV), jnp.float32)
    # TODO(synk): the frozen SentenceTransformer text encoder has no Pallas
    # equivalent; its (N, DT) output embeddings are taken directly as input.
    text_embeds = jax.random.normal(k_txt, (N, DT), jnp.float32)
    packed = pack_params(init_params(k_par))

    logits = jax.block_until_ready(videoqa_forward(video_feats, text_embeds, packed))
    assert logits.shape == (BATCH, NUM_CHOICES), logits.shape
    assert bool(jnp.all(jnp.isfinite(logits)))
    print("KERNEL_OK")
</pallas_src>

<mosaic_0001>
module attributes {stable_mosaic.version = 11 : i64} {
  func.func @videoqa_kernel(%arg0: memref<8x256xf32, #tpu.memory_space<vmem>>, %arg1: memref<8x8x128xf32, #tpu.memory_space<vmem>>, %arg2: memref<128x1920xf32, #tpu.memory_space<vmem>>, %arg3: memref<1024x128xf32, #tpu.memory_space<vmem>>, %arg4: memref<1x2304xf32, #tpu.memory_space<vmem>>, %arg5: memref<8x128xf32, #tpu.memory_space<vmem>>) attributes {dimension_semantics = [], scalar_prefetch = 0 : i64, scratch_operands = 0 : i64, tpu.core_type = #tpu.core_type<tc>} {
    %c0 = arith.constant 0 : index
    %c0_0 = arith.constant 0 : index
    %0 = vector.load %arg0[%c0, %c0_0] : memref<8x256xf32, #tpu.memory_space<vmem>>, vector<8x256xf32>
    %c0_1 = arith.constant 0 : index
    %c0_2 = arith.constant 0 : index
    %1 = vector.load %arg3[%c0_1, %c0_2] : memref<1024x128xf32, #tpu.memory_space<vmem>>, vector<256x128xf32>
    %cst = arith.constant dense<0.000000e+00> : vector<8x128xf32>
    %2 = tpu.matmul %0, %1, %cst {dimension_numbers = #tpu.dot_dimension_numbers<[1], [0], [0], [1], [0, 0, 1, 1], [], []>} : vector<8x256xf32>, vector<256x128xf32>, vector<8x128xf32> -> vector<8x128xf32>
    %c0_3 = arith.constant 0 : index
    %c0_4 = arith.constant 0 : index
    %3 = vector.load %arg4[%c0_3, %c0_4] : memref<1x2304xf32, #tpu.memory_space<vmem>>, vector<1x128xf32>
    %4 = vector.broadcast %3 : vector<1x128xf32> to vector<8x128xf32>
    %5 = arith.addf %2, %4 : vector<8x128xf32>
    %c0_5 = arith.constant 0 : index
    %c0_6 = arith.constant 0 : index
    %c0_7 = arith.constant 0 : index
    %6 = vector.load %arg1[%c0_5, %c0_6, %c0_7] : memref<8x8x128xf32, #tpu.memory_space<vmem>>, vector<8x8x128xf32>
    %7 = vector.shape_cast %6 : vector<8x8x128xf32> to vector<64x128xf32>
    %c0_8 = arith.constant 0 : index
    %c0_9 = arith.constant 0 : index
    %8 = vector.load %arg2[%c0_8, %c0_9] : memref<128x1920xf32, #tpu.memory_space<vmem>>, vector<128x512xf32>
    %cst_10 = arith.constant dense<0.000000e+00> : vector<64x512xf32>
    %9 = tpu.matmul %7, %8, %cst_10 {dimension_numbers = #tpu.dot_dimension_numbers<[1], [0], [0], [1], [0, 0, 1, 1], [], []>} : vector<64x128xf32>, vector<128x512xf32>, vector<64x512xf32> -> vector<64x512xf32>
    %c0_11 = arith.constant 0 : index
    %c128 = arith.constant 128 : index
    %10 = vector.load %arg4[%c0_11, %c128] : memref<1x2304xf32, #tpu.memory_space<vmem>>, vector<1x512xf32>
    %11 = vector.broadcast %10 : vector<1x512xf32> to vector<64x512xf32>
    %12 = arith.addf %9, %11 : vector<64x512xf32>
    %c0_12 = arith.constant 0 : index
    %c512 = arith.constant 512 : index
    %13 = vector.load %arg2[%c0_12, %c512] : memref<128x1920xf32, #tpu.memory_space<vmem>>, vector<128x512xf32>
    %cst_13 = arith.constant 0.000000e+00 : f32
    %14 = vector.broadcast %cst_13 : f32 to vector<8x128xf32>
    %cst_14 = arith.constant 0.000000e+00 : f32
    %15 = vector.broadcast %cst_14 : f32 to vector<8x128xf32>
    %16 = vector.extract_strided_slice %12 {offsets = [0, 0], sizes = [8, 512], strides = [1, 1]} : vector<64x512xf32> to vector<8x512xf32>
    %cst_15 = arith.constant dense<0.000000e+00> : vector<8x512xf32>
    %17 = tpu.matmul %14, %13, %cst_15 {dimension_numbers = #tpu.dot_dimension_numbers<[1], [0], [0], [1], [0, 0, 1, 1], [], []>} : vector<8x128xf32>, vector<128x512xf32>, vector<8x512xf32> -> vector<8x512xf32>
    %18 = arith.addf %16, %17 : vector<8x512xf32>
    %19 = vector.extract_strided_slice %18 {offsets = [0, 0], sizes = [8, 128], strides = [1, 1]} : vector<8x512xf32> to vector<8x128xf32>
    %20 = arith.negf %19 : vector<8x128xf32>
    %21 = math.exp %20 : vector<8x128xf32>
    %cst_16 = arith.constant 1.000000e+00 : f32
    %22 = vector.broadcast %cst_16 : f32 to vector<8x128xf32>
    %23 = arith.addf %22, %21 : vector<8x128xf32>
    %24 = arith.divf %22, %23 : vector<8x128xf32>
    %25 = vector.extract_strided_slice %18 {offsets = [0, 128], sizes = [8, 128], strides = [1, 1]} : vector<8x512xf32> to vector<8x128xf32>
    %26 = arith.negf %25 : vector<8x128xf32>
    %27 = math.exp %26 : vector<8x128xf32>
    %cst_17 = arith.constant 1.000000e+00 : f32
    %28 = vector.broadcast %cst_17 : f32 to vector<8x128xf32>
    %29 = arith.addf %28, %27 : vector<8x128xf32>
    %30 = arith.divf %28, %29 : vector<8x128xf32>
    %31 = vector.extract_strided_slice %18 {offsets = [0, 256], sizes = [8, 128], strides = [1, 1]} : vector<8x512xf32> to vector<8x128xf32>
    %32 = math.tanh %31 : vector<8x128xf32>
    %33 = vector.extract_strided_slice %18 {offsets = [0, 384], sizes = [8, 128], strides = [1, 1]} : vector<8x512xf32> to vector<8x128xf32>
    %34 = arith.negf %33 : vector<8x128xf32>
    %35 = math.exp %34 : vector<8x128xf32>
    %cst_18 = arith.constant 1.000000e+00 : f32
    %36 = vector.broadcast %cst_18 : f32 to vector<8x128xf32>
    %37 = arith.addf %36, %35 : vector<8x128xf32>
    %38 = arith.divf %36, %37 : vector<8x128xf32>
    %39 = arith.mulf %30, %15 : vector<8x128xf32>
    %40 = arith.mulf %24, %32 : vector<8x128xf32>
    %41 = arith.addf %39, %40 : vector<8x128xf32>
    %42 = math.tanh %41 : vector<8x128xf32>
    %43 = arith.mulf %38, %42 : vector<8x128xf32>
    %44 = vector.extract_strided_slice %12 {offsets = [8, 0], sizes = [8, 512], strides = [1, 1]} : vector<64x512xf32> to vector<8x512xf32>
    %cst_19 = arith.constant dense<0.000000e+00> : vector<8x512xf32>
    %45 = tpu.matmul %43, %13, %cst_19 {dimension_numbers = #tpu.dot_dimension_numbers<[1], [0], [0], [1], [0, 0, 1, 1], [], []>} : vector<8x128xf32>, vector<128x512xf32>, vector<8x512xf32> -> vector<8x512xf32>
    %46 = arith.addf %44, %45 : vector<8x512xf32>
    %47 = vector.extract_strided_slice %46 {offsets = [0, 0], sizes = [8, 128], strides = [1, 1]} : vector<8x512xf32> to vector<8x128xf32>
    %48 = arith.negf %47 : vector<8x128xf32>
    %49 = math.exp %48 : vector<8x128xf32>
    %cst_20 = arith.constant 1.000000e+00 : f32
    %50 = vector.broadcast %cst_20 : f32 to vector<8x128xf32>
    %51 = arith.addf %50, %49 : vector<8x128xf32>
    %52 = arith.divf %50, %51 : vector<8x128xf32>
    %53 = vector.extract_strided_slice %46 {offsets = [0, 128], sizes = [8, 128], strides = [1, 1]} : vector<8x512xf32> to vector<8x128xf32>
    %54 = arith.negf %53 : vector<8x128xf32>
    %55 = math.exp %54 : vector<8x128xf32>
    %cst_21 = arith.constant 1.000000e+00 : f32
    %56 = vector.broadcast %cst_21 : f32 to vector<8x128xf32>
    %57 = arith.addf %56, %55 : vector<8x128xf32>
    %58 = arith.divf %56, %57 : vector<8x128xf32>
    %59 = vector.extract_strided_slice %46 {offsets = [0, 256], sizes = [8, 128], strides = [1, 1]} : vector<8x512xf32> to vector<8x128xf32>
    %60 = math.tanh %59 : vector<8x128xf32>
    %61 = vector.extract_strided_slice %46 {offsets = [0, 384], sizes = [8, 128], strides = [1, 1]} : vector<8x512xf32> to vector<8x128xf32>
    %62 = arith.negf %61 : vector<8x128xf32>
    %63 = math.exp %62 : vector<8x128xf32>
    %cst_22 = arith.constant 1.000000e+00 : f32
    %64 = vector.broadcast %cst_22 : f32 to vector<8x128xf32>
    %65 = arith.addf %64, %63 : vector<8x128xf32>
    %66 = arith.divf %64, %65 : vector<8x128xf32>
    %67 = arith.mulf %58, %41 : vector<8x128xf32>
    %68 = arith.mulf %52, %60 : vector<8x128xf32>
    %69 = arith.addf %67, %68 : vector<8x128xf32>
    %70 = math.tanh %69 : vector<8x128xf32>
    %71 = arith.mulf %66, %70 : vector<8x128xf32>
    %72 = vector.extract_strided_slice %12 {offsets = [16, 0], sizes = [8, 512], strides = [1, 1]} : vector<64x512xf32> to vector<8x512xf32>
    %cst_23 = arith.constant dense<0.000000e+00> : vector<8x512xf32>
    %73 = tpu.matmul %71, %13, %cst_23 {dimension_numbers = #tpu.dot_dimension_numbers<[1], [0], [0], [1], [0, 0, 1, 1], [], []>} : vector<8x128xf32>, vector<128x512xf32>, vector<8x512xf32> -> vector<8x512xf32>
    %74 = arith.addf %72, %73 : vector<8x512xf32>
    %75 = vector.extract_strided_slice %74 {offsets = [0, 0], sizes = [8, 128], strides = [1, 1]} : vector<8x512xf32> to vector<8x128xf32>
    %76 = arith.negf %75 : vector<8x128xf32>
    %77 = math.exp %76 : vector<8x128xf32>
    %cst_24 = arith.constant 1.000000e+00 : f32
    %78 = vector.broadcast %cst_24 : f32 to vector<8x128xf32>
    %79 = arith.addf %78, %77 : vector<8x128xf32>
    %80 = arith.divf %78, %79 : vector<8x128xf32>
    %81 = vector.extract_strided_slice %74 {offsets = [0, 128], sizes = [8, 128], strides = [1, 1]} : vector<8x512xf32> to vector<8x128xf32>
    %82 = arith.negf %81 : vector<8x128xf32>
    %83 = math.exp %82 : vector<8x128xf32>
    %cst_25 = arith.constant 1.000000e+00 : f32
    %84 = vector.broadcast %cst_25 : f32 to vector<8x128xf32>
    %85 = arith.addf %84, %83 : vector<8x128xf32>
    %86 = arith.divf %84, %85 : vector<8x128xf32>
    %87 = vector.extract_strided_slice %74 {offsets = [0, 256], sizes = [8, 128], strides = [1, 1]} : vector<8x512xf32> to vector<8x128xf32>
    %88 = math.tanh %87 : vector<8x128xf32>
    %89 = vector.extract_strided_slice %74 {offsets = [0, 384], sizes = [8, 128], strides = [1, 1]} : vector<8x512xf32> to vector<8x128xf32>
    %90 = arith.negf %89 : vector<8x128xf32>
    %91 = math.exp %90 : vector<8x128xf32>
    %cst_26 = arith.constant 1.000000e+00 : f32
    %92 = vector.broadcast %cst_26 : f32 to vector<8x128xf32>
    %93 = arith.addf %92, %91 : vector<8x128xf32>
    %94 = arith.divf %92, %93 : vector<8x128xf32>
    %95 = arith.mulf %86, %69 : vector<8x128xf32>
    %96 = arith.mulf %80, %88 : vector<8x128xf32>
    %97 = arith.addf %95, %96 : vector<8x128xf32>
    %98 = math.tanh %97 : vector<8x128xf32>
    %99 = arith.mulf %94, %98 : vector<8x128xf32>
    %100 = vector.extract_strided_slice %12 {offsets = [24, 0], sizes = [8, 512], strides = [1, 1]} : vector<64x512xf32> to vector<8x512xf32>
    %cst_27 = arith.constant dense<0.000000e+00> : vector<8x512xf32>
    %101 = tpu.matmul %99, %13, %cst_27 {dimension_numbers = #tpu.dot_dimension_numbers<[1], [0], [0], [1], [0, 0, 1, 1], [], []>} : vector<8x128xf32>, vector<128x512xf32>, vector<8x512xf32> -> vector<8x512xf32>
    %102 = arith.addf %100, %101 : vector<8x512xf32>
    %103 = vector.extract_strided_slice %102 {offsets = [0, 0], sizes = [8, 128], strides = [1, 1]} : vector<8x512xf32> to vector<8x128xf32>
    %104 = arith.negf %103 : vector<8x128xf32>
    %105 = math.exp %104 : vector<8x128xf32>
    %cst_28 = arith.constant 1.000000e+00 : f32
    %106 = vector.broadcast %cst_28 : f32 to vector<8x128xf32>
    %107 = arith.addf %106, %105 : vector<8x128xf32>
    %108 = arith.divf %106, %107 : vector<8x128xf32>
    %109 = vector.extract_strided_slice %102 {offsets = [0, 128], sizes = [8, 128], strides = [1, 1]} : vector<8x512xf32> to vector<8x128xf32>
    %110 = arith.negf %109 : vector<8x128xf32>
    %111 = math.exp %110 : vector<8x128xf32>
    %cst_29 = arith.constant 1.000000e+00 : f32
    %112 = vector.broadcast %cst_29 : f32 to vector<8x128xf32>
    %113 = arith.addf %112, %111 : vector<8x128xf32>
    %114 = arith.divf %112, %113 : vector<8x128xf32>
    %115 = vector.extract_strided_slice %102 {offsets = [0, 256], sizes = [8, 128], strides = [1, 1]} : vector<8x512xf32> to vector<8x128xf32>
    %116 = math.tanh %115 : vector<8x128xf32>
    %117 = vector.extract_strided_slice %102 {offsets = [0, 384], sizes = [8, 128], strides = [1, 1]} : vector<8x512xf32> to vector<8x128xf32>
    %118 = arith.negf %117 : vector<8x128xf32>
    %119 = math.exp %118 : vector<8x128xf32>
    %cst_30 = arith.constant 1.000000e+00 : f32
    %120 = vector.broadcast %cst_30 : f32 to vector<8x128xf32>
    %121 = arith.addf %120, %119 : vector<8x128xf32>
    %122 = arith.divf %120, %121 : vector<8x128xf32>
    %123 = arith.mulf %114, %97 : vector<8x128xf32>
    %124 = arith.mulf %108, %116 : vector<8x128xf32>
    %125 = arith.addf %123, %124 : vector<8x128xf32>
    %126 = math.tanh %125 : vector<8x128xf32>
    %127 = arith.mulf %122, %126 : vector<8x128xf32>
    %128 = vector.extract_strided_slice %12 {offsets = [32, 0], sizes = [8, 512], strides = [1, 1]} : vector<64x512xf32> to vector<8x512xf32>
    %cst_31 = arith.constant dense<0.000000e+00> : vector<8x512xf32>
    %129 = tpu.matmul %127, %13, %cst_31 {dimension_numbers = #tpu.dot_dimension_numbers<[1], [0], [0], [1], [0, 0, 1, 1], [], []>} : vector<8x128xf32>, vector<128x512xf32>, vector<8x512xf32> -> vector<8x512xf32>
    %130 = arith.addf %128, %129 : vector<8x512xf32>
    %131 = vector.extract_strided_slice %130 {offsets = [0, 0], sizes = [8, 128], strides = [1, 1]} : vector<8x512xf32> to vector<8x128xf32>
    %132 = arith.negf %131 : vector<8x128xf32>
    %133 = math.exp %132 : vector<8x128xf32>
    %cst_32 = arith.constant 1.000000e+00 : f32
    %134 = vector.broadcast %cst_32 : f32 to vector<8x128xf32>
    %135 = arith.addf %134, %133 : vector<8x128xf32>
    %136 = arith.divf %134, %135 : vector<8x128xf32>
    %137 = vector.extract_strided_slice %130 {offsets = [0, 128], sizes = [8, 128], strides = [1, 1]} : vector<8x512xf32> to vector<8x128xf32>
    %138 = arith.negf %137 : vector<8x128xf32>
    %139 = math.exp %138 : vector<8x128xf32>
    %cst_33 = arith.constant 1.000000e+00 : f32
    %140 = vector.broadcast %cst_33 : f32 to vector<8x128xf32>
    %141 = arith.addf %140, %139 : vector<8x128xf32>
    %142 = arith.divf %140, %141 : vector<8x128xf32>
    %143 = vector.extract_strided_slice %130 {offsets = [0, 256], sizes = [8, 128], strides = [1, 1]} : vector<8x512xf32> to vector<8x128xf32>
    %144 = math.tanh %143 : vector<8x128xf32>
    %145 = vector.extract_strided_slice %130 {offsets = [0, 384], sizes = [8, 128], strides = [1, 1]} : vector<8x512xf32> to vector<8x128xf32>
    %146 = arith.negf %145 : vector<8x128xf32>
    %147 = math.exp %146 : vector<8x128xf32>
    %cst_34 = arith.constant 1.000000e+00 : f32
    %148 = vector.broadcast %cst_34 : f32 to vector<8x128xf32>
    %149 = arith.addf %148, %147 : vector<8x128xf32>
    %150 = arith.divf %148, %149 : vector<8x128xf32>
    %151 = arith.mulf %142, %125 : vector<8x128xf32>
    %152 = arith.mulf %136, %144 : vector<8x128xf32>
    %153 = arith.addf %151, %152 : vector<8x128xf32>
    %154 = math.tanh %153 : vector<8x128xf32>
    %155 = arith.mulf %150, %154 : vector<8x128xf32>
    %156 = vector.extract_strided_slice %12 {offsets = [40, 0], sizes = [8, 512], strides = [1, 1]} : vector<64x512xf32> to vector<8x512xf32>
    %cst_35 = arith.constant dense<0.000000e+00> : vector<8x512xf32>
    %157 = tpu.matmul %155, %13, %cst_35 {dimension_numbers = #tpu.dot_dimension_numbers<[1], [0], [0], [1], [0, 0, 1, 1], [], []>} : vector<8x128xf32>, vector<128x512xf32>, vector<8x512xf32> -> vector<8x512xf32>
    %158 = arith.addf %156, %157 : vector<8x512xf32>
    %159 = vector.extract_strided_slice %158 {offsets = [0, 0], sizes = [8, 128], strides = [1, 1]} : vector<8x512xf32> to vector<8x128xf32>
    %160 = arith.negf %159 : vector<8x128xf32>
    %161 = math.exp %160 : vector<8x128xf32>
    %cst_36 = arith.constant 1.000000e+00 : f32
    %162 = vector.broadcast %cst_36 : f32 to vector<8x128xf32>
    %163 = arith.addf %162, %161 : vector<8x128xf32>
    %164 = arith.divf %162, %163 : vector<8x128xf32>
    %165 = vector.extract_strided_slice %158 {offsets = [0, 128], sizes = [8, 128], strides = [1, 1]} : vector<8x512xf32> to vector<8x128xf32>
    %166 = arith.negf %165 : vector<8x128xf32>
    %167 = math.exp %166 : vector<8x128xf32>
    %cst_37 = arith.constant 1.000000e+00 : f32
    %168 = vector.broadcast %cst_37 : f32 to vector<8x128xf32>
    %169 = arith.addf %168, %167 : vector<8x128xf32>
    %170 = arith.divf %168, %169 : vector<8x128xf32>
    %171 = vector.extract_strided_slice %158 {offsets = [0, 256], sizes = [8, 128], strides = [1, 1]} : vector<8x512xf32> to vector<8x128xf32>
    %172 = math.tanh %171 : vector<8x128xf32>
    %173 = vector.extract_strided_slice %158 {offsets = [0, 384], sizes = [8, 128], strides = [1, 1]} : vector<8x512xf32> to vector<8x128xf32>
    %174 = arith.negf %173 : vector<8x128xf32>
    %175 = math.exp %174 : vector<8x128xf32>
    %cst_38 = arith.constant 1.000000e+00 : f32
    %176 = vector.broadcast %cst_38 : f32 to vector<8x128xf32>
    %177 = arith.addf %176, %175 : vector<8x128xf32>
    %178 = arith.divf %176, %177 : vector<8x128xf32>
    %179 = arith.mulf %170, %153 : vector<8x128xf32>
    %180 = arith.mulf %164, %172 : vector<8x128xf32>
    %181 = arith.addf %179, %180 : vector<8x128xf32>
    %182 = math.tanh %181 : vector<8x128xf32>
    %183 = arith.mulf %178, %182 : vector<8x128xf32>
    %184 = vector.extract_strided_slice %12 {offsets = [48, 0], sizes = [8, 512], strides = [1, 1]} : vector<64x512xf32> to vector<8x512xf32>
    %cst_39 = arith.constant dense<0.000000e+00> : vector<8x512xf32>
    %185 = tpu.matmul %183, %13, %cst_39 {dimension_numbers = #tpu.dot_dimension_numbers<[1], [0], [0], [1], [0, 0, 1, 1], [], []>} : vector<8x128xf32>, vector<128x512xf32>, vector<8x512xf32> -> vector<8x512xf32>
    %186 = arith.addf %184, %185 : vector<8x512xf32>
    %187 = vector.extract_strided_slice %186 {offsets = [0, 0], sizes = [8, 128], strides = [1, 1]} : vector<8x512xf32> to vector<8x128xf32>
    %188 = arith.negf %187 : vector<8x128xf32>
    %189 = math.exp %188 : vector<8x128xf32>
    %cst_40 = arith.constant 1.000000e+00 : f32
    %190 = vector.broadcast %cst_40 : f32 to vector<8x128xf32>
    %191 = arith.addf %190, %189 : vector<8x128xf32>
    %192 = arith.divf %190, %191 : vector<8x128xf32>
    %193 = vector.extract_strided_slice %186 {offsets = [0, 128], sizes = [8, 128], strides = [1, 1]} : vector<8x512xf32> to vector<8x128xf32>
    %194 = arith.negf %193 : vector<8x128xf32>
    %195 = math.exp %194 : vector<8x128xf32>
    %cst_41 = arith.constant 1.000000e+00 : f32
    %196 = vector.broadcast %cst_41 : f32 to vector<8x128xf32>
    %197 = arith.addf %196, %195 : vector<8x128xf32>
    %198 = arith.divf %196, %197 : vector<8x128xf32>
    %199 = vector.extract_strided_slice %186 {offsets = [0, 256], sizes = [8, 128], strides = [1, 1]} : vector<8x512xf32> to vector<8x128xf32>
    %200 = math.tanh %199 : vector<8x128xf32>
    %201 = vector.extract_strided_slice %186 {offsets = [0, 384], sizes = [8, 128], strides = [1, 1]} : vector<8x512xf32> to vector<8x128xf32>
    %202 = arith.negf %201 : vector<8x128xf32>
    %203 = math.exp %202 : vector<8x128xf32>
    %cst_42 = arith.constant 1.000000e+00 : f32
    %204 = vector.broadcast %cst_42 : f32 to vector<8x128xf32>
    %205 = arith.addf %204, %203 : vector<8x128xf32>
    %206 = arith.divf %204, %205 : vector<8x128xf32>
    %207 = arith.mulf %198, %181 : vector<8x128xf32>
    %208 = arith.mulf %192, %200 : vector<8x128xf32>
    %209 = arith.addf %207, %208 : vector<8x128xf32>
    %210 = math.tanh %209 : vector<8x128xf32>
    %211 = arith.mulf %206, %210 : vector<8x128xf32>
    %212 = vector.extract_strided_slice %12 {offsets = [56, 0], sizes = [8, 512], strides = [1, 1]} : vector<64x512xf32> to vector<8x512xf32>
    %cst_43 = arith.constant dense<0.000000e+00> : vector<8x512xf32>
    %213 = tpu.matmul %211, %13, %cst_43 {dimension_numbers = #tpu.dot_dimension_numbers<[1], [0], [0], [1], [0, 0, 1, 1], [], []>} : vector<8x128xf32>, vector<128x512xf32>, vector<8x512xf32> -> vector<8x512xf32>
    %214 = arith.addf %212, %213 : vector<8x512xf32>
    %215 = vector.extract_strided_slice %214 {offsets = [0, 0], sizes = [8, 128], strides = [1, 1]} : vector<8x512xf32> to vector<8x128xf32>
    %216 = arith.negf %215 : vector<8x128xf32>
    %217 = math.exp %216 : vector<8x128xf32>
    %cst_44 = arith.constant 1.000000e+00 : f32
    %218 = vector.broadcast %cst_44 : f32 to vector<8x128xf32>
    %219 = arith.addf %218, %217 : vector<8x128xf32>
    %220 = arith.divf %218, %219 : vector<8x128xf32>
    %221 = vector.extract_strided_slice %214 {offsets = [0, 128], sizes = [8, 128], strides = [1, 1]} : vector<8x512xf32> to vector<8x128xf32>
    %222 = arith.negf %221 : vector<8x128xf32>
    %223 = math.exp %222 : vector<8x128xf32>
    %cst_45 = arith.constant 1.000000e+00 : f32
    %224 = vector.broadcast %cst_45 : f32 to vector<8x128xf32>
    %225 = arith.addf %224, %223 : vector<8x128xf32>
    %226 = arith.divf %224, %225 : vector<8x128xf32>
    %227 = vector.extract_strided_slice %214 {offsets = [0, 256], sizes = [8, 128], strides = [1, 1]} : vector<8x512xf32> to vector<8x128xf32>
    %228 = math.tanh %227 : vector<8x128xf32>
    %229 = vector.extract_strided_slice %214 {offsets = [0, 384], sizes = [8, 128], strides = [1, 1]} : vector<8x512xf32> to vector<8x128xf32>
    %230 = arith.negf %229 : vector<8x128xf32>
    %231 = math.exp %230 : vector<8x128xf32>
    %cst_46 = arith.constant 1.000000e+00 : f32
    %232 = vector.broadcast %cst_46 : f32 to vector<8x128xf32>
    %233 = arith.addf %232, %231 : vector<8x128xf32>
    %234 = arith.divf %232, %233 : vector<8x128xf32>
    %235 = arith.mulf %226, %209 : vector<8x128xf32>
    %236 = arith.mulf %220, %228 : vector<8x128xf32>
    %237 = arith.addf %235, %236 : vector<8x128xf32>
    %238 = math.tanh %237 : vector<8x128xf32>
    %239 = arith.mulf %234, %238 : vector<8x128xf32>
    %c0_47 = arith.constant 0 : index
    %c1024 = arith.constant 1024 : index
    %240 = vector.load %arg2[%c0_47, %c1024] : memref<128x1920xf32, #tpu.memory_space<vmem>>, vector<128x128xf32>
    %cst_48 = arith.constant dense<0.000000e+00> : vector<8x128xf32>
    %241 = tpu.matmul %239, %240, %cst_48 {dimension_numbers = #tpu.dot_dimension_numbers<[1], [0], [0], [1], [0, 0, 1, 1], [], []>} : vector<8x128xf32>, vector<128x128xf32>, vector<8x128xf32> -> vector<8x128xf32>
    %c0_49 = arith.constant 0 : index
    %c640 = arith.constant 640 : index
    %242 = vector.load %arg4[%c0_49, %c640] : memref<1x2304xf32, #tpu.memory_space<vmem>>, vector<1x128xf32>
    %243 = vector.broadcast %242 : vector<1x128xf32> to vector<8x128xf32>
    %244 = arith.addf %241, %243 : vector<8x128xf32>
    %c0_50 = arith.constant 0 : index
    %c768 = arith.constant 768 : index
    %245 = vector.load %arg4[%c0_50, %c768] : memref<1x2304xf32, #tpu.memory_space<vmem>>, vector<1x128xf32>
    %c0_51 = arith.constant 0 : index
    %c896 = arith.constant 896 : index
    %246 = vector.load %arg4[%c0_51, %c896] : memref<1x2304xf32, #tpu.memory_space<vmem>>, vector<1x128xf32>
    %247 = arith.addf %5, %244 : vector<8x128xf32>
    %cst_52 = arith.constant dense<0.000000e+00> : vector<8xf32>
    %248 = vector.multi_reduction <add>, %247, %cst_52 [1] : vector<8x128xf32> to vector<8xf32>
    %249 = vector.shape_cast %248 : vector<8xf32> to vector<8x1xf32>
    %cst_53 = arith.constant 1.280000e+02 : f32
    %250 = vector.broadcast %cst_53 : f32 to vector<8x1xf32>
    %251 = arith.divf %249, %250 : vector<8x1xf32>
    %252 = vector.broadcast %251 : vector<8x1xf32> to vector<8x128xf32>
    %253 = arith.subf %247, %252 : vector<8x128xf32>
    %254 = arith.mulf %253, %253 : vector<8x128xf32>
    %cst_54 = arith.constant dense<0.000000e+00> : vector<8xf32>
    %255 = vector.multi_reduction <add>, %254, %cst_54 [1] : vector<8x128xf32> to vector<8xf32>
    %256 = vector.shape_cast %255 : vector<8xf32> to vector<8x1xf32>
    %cst_55 = arith.constant 1.280000e+02 : f32
    %257 = vector.broadcast %cst_55 : f32 to vector<8x1xf32>
    %258 = arith.divf %256, %257 : vector<8x1xf32>
    %259 = vector.broadcast %251 : vector<8x1xf32> to vector<8x128xf32>
    %260 = arith.subf %247, %259 : vector<8x128xf32>
    %cst_56 = arith.constant 9.99999974E-6 : f32
    %261 = vector.broadcast %cst_56 : f32 to vector<8x1xf32>
    %262 = arith.addf %258, %261 : vector<8x1xf32>
    %263 = math.rsqrt %262 : vector<8x1xf32>
    %264 = vector.broadcast %263 : vector<8x1xf32> to vector<8x128xf32>
    %265 = arith.mulf %260, %264 : vector<8x128xf32>
    %266 = vector.broadcast %245 : vector<1x128xf32> to vector<8x128xf32>
    %267 = arith.mulf %265, %266 : vector<8x128xf32>
    %268 = vector.broadcast %246 : vector<1x128xf32> to vector<8x128xf32>
    %269 = arith.addf %267, %268 : vector<8x128xf32>
    %c0_57 = arith.constant 0 : index
    %c1152 = arith.constant 1152 : index
    %270 = vector.load %arg2[%c0_57, %c1152] : memref<128x1920xf32, #tpu.memory_space<vmem>>, vector<128x512xf32>
    %cst_58 = arith.constant dense<0.000000e+00> : vector<8x512xf32>
    %271 = tpu.matmul %269, %270, %cst_58 {dimension_numbers = #tpu.dot_dimension_numbers<[1], [0], [0], [1], [0, 0, 1, 1], [], []>} : vector<8x128xf32>, vector<128x512xf32>, vector<8x512xf32> -> vector<8x512xf32>
    %c0_59 = arith.constant 0 : index
    %c1024_60 = arith.constant 1024 : index
    %272 = vector.load %arg4[%c0_59, %c1024_60] : memref<1x2304xf32, #tpu.memory_space<vmem>>, vector<1x512xf32>
    %273 = vector.broadcast %272 : vector<1x512xf32> to vector<8x512xf32>
    %274 = arith.addf %271, %273 : vector<8x512xf32>
    %cst_61 = arith.constant 0.000000e+00 : f32
    %275 = vector.broadcast %cst_61 : f32 to vector<8x512xf32>
    %276 = arith.maximumf %274, %275 : vector<8x512xf32>
    %c256 = arith.constant 256 : index
    %c0_62 = arith.constant 0 : index
    %277 = vector.load %arg3[%c256, %c0_62] : memref<1024x128xf32, #tpu.memory_space<vmem>>, vector<512x128xf32>
    %cst_63 = arith.constant dense<0.000000e+00> : vector<8x128xf32>
    %278 = tpu.matmul %276, %277, %cst_63 {dimension_numbers = #tpu.dot_dimension_numbers<[1], [0], [0], [1], [0, 0, 1, 1], [], []>} : vector<8x512xf32>, vector<512x128xf32>, vector<8x128xf32> -> vector<8x128xf32>
    %c0_64 = arith.constant 0 : index
    %c1536 = arith.constant 1536 : index
    %279 = vector.load %arg4[%c0_64, %c1536] : memref<1x2304xf32, #tpu.memory_space<vmem>>, vector<1x128xf32>
    %280 = vector.broadcast %279 : vector<1x128xf32> to vector<8x128xf32>
    %281 = arith.addf %278, %280 : vector<8x128xf32>
    %282 = arith.addf %269, %281 : vector<8x128xf32>
    %cst_65 = arith.constant dense<0.000000e+00> : vector<8xf32>
    %283 = vector.multi_reduction <add>, %282, %cst_65 [1] : vector<8x128xf32> to vector<8xf32>
    %284 = vector.shape_cast %283 : vector<8xf32> to vector<8x1xf32>
    %cst_66 = arith.constant 1.280000e+02 : f32
    %285 = vector.broadcast %cst_66 : f32 to vector<8x1xf32>
    %286 = arith.divf %284, %285 : vector<8x1xf32>
    %287 = vector.broadcast %286 : vector<8x1xf32> to vector<8x128xf32>
    %288 = arith.subf %282, %287 : vector<8x128xf32>
    %289 = arith.mulf %288, %288 : vector<8x128xf32>
    %cst_67 = arith.constant dense<0.000000e+00> : vector<8xf32>
    %290 = vector.multi_reduction <add>, %289, %cst_67 [1] : vector<8x128xf32> to vector<8xf32>
    %291 = vector.shape_cast %290 : vector<8xf32> to vector<8x1xf32>
    %cst_68 = arith.constant 1.280000e+02 : f32
    %292 = vector.broadcast %cst_68 : f32 to vector<8x1xf32>
    %293 = arith.divf %291, %292 : vector<8x1xf32>
    %294 = vector.broadcast %286 : vector<8x1xf32> to vector<8x128xf32>
    %295 = arith.subf %282, %294 : vector<8x128xf32>
    %cst_69 = arith.constant 9.99999974E-6 : f32
    %296 = vector.broadcast %cst_69 : f32 to vector<8x1xf32>
    %297 = arith.addf %293, %296 : vector<8x1xf32>
    %298 = math.rsqrt %297 : vector<8x1xf32>
    %299 = vector.broadcast %298 : vector<8x1xf32> to vector<8x128xf32>
    %300 = arith.mulf %295, %299 : vector<8x128xf32>
    %301 = vector.broadcast %245 : vector<1x128xf32> to vector<8x128xf32>
    %302 = arith.mulf %300, %301 : vector<8x128xf32>
    %303 = vector.broadcast %246 : vector<1x128xf32> to vector<8x128xf32>
    %304 = arith.addf %302, %303 : vector<8x128xf32>
    %c0_70 = arith.constant 0 : index
    %c1664 = arith.constant 1664 : index
    %305 = vector.load %arg2[%c0_70, %c1664] : memref<128x1920xf32, #tpu.memory_space<vmem>>, vector<128x256xf32>
    %cst_71 = arith.constant dense<0.000000e+00> : vector<8x256xf32>
    %306 = tpu.matmul %304, %305, %cst_71 {dimension_numbers = #tpu.dot_dimension_numbers<[1], [0], [0], [1], [0, 0, 1, 1], [], []>} : vector<8x128xf32>, vector<128x256xf32>, vector<8x256xf32> -> vector<8x256xf32>
    %c0_72 = arith.constant 0 : index
    %c1664_73 = arith.constant 1664 : index
    %307 = vector.load %arg4[%c0_72, %c1664_73] : memref<1x2304xf32, #tpu.memory_space<vmem>>, vector<1x256xf32>
    %308 = vector.broadcast %307 : vector<1x256xf32> to vector<8x256xf32>
    %309 = arith.addf %306, %308 : vector<8x256xf32>
    %cst_74 = arith.constant 0.000000e+00 : f32
    %310 = vector.broadcast %cst_74 : f32 to vector<8x256xf32>
    %311 = arith.maximumf %309, %310 : vector<8x256xf32>
    %c768_75 = arith.constant 768 : index
    %c0_76 = arith.constant 0 : index
    %312 = vector.load %arg3[%c768_75, %c0_76] : memref<1024x128xf32, #tpu.memory_space<vmem>>, vector<256x128xf32>
    %cst_77 = arith.constant dense<0.000000e+00> : vector<8x128xf32>
    %313 = tpu.matmul %311, %312, %cst_77 {dimension_numbers = #tpu.dot_dimension_numbers<[1], [0], [0], [1], [0, 0, 1, 1], [], []>} : vector<8x256xf32>, vector<256x128xf32>, vector<8x128xf32> -> vector<8x128xf32>
    %c0_78 = arith.constant 0 : index
    %c1920 = arith.constant 1920 : index
    %314 = vector.load %arg4[%c0_78, %c1920] : memref<1x2304xf32, #tpu.memory_space<vmem>>, vector<1x128xf32>
    %315 = vector.broadcast %314 : vector<1x128xf32> to vector<8x128xf32>
    %316 = arith.addf %313, %315 : vector<8x128xf32>
    %cst_79 = arith.constant 0.000000e+00 : f32
    %317 = vector.broadcast %cst_79 : f32 to vector<8x128xf32>
    %318 = arith.maximumf %316, %317 : vector<8x128xf32>
    %c0_80 = arith.constant 0 : index
    %c2048 = arith.constant 2048 : index
    %319 = vector.load %arg4[%c0_80, %c2048] : memref<1x2304xf32, #tpu.memory_space<vmem>>, vector<1x128xf32>
    %c0_81 = arith.constant 0 : index
    %c2176 = arith.constant 2176 : index
    %320 = vector.load %arg4[%c0_81, %c2176] : memref<1x2304xf32, #tpu.memory_space<vmem>>, vector<1x1xf32>
    %321 = vector.broadcast %319 : vector<1x128xf32> to vector<8x128xf32>
    %322 = arith.mulf %318, %321 : vector<8x128xf32>
    %cst_82 = arith.constant dense<0.000000e+00> : vector<8xf32>
    %323 = vector.multi_reduction <add>, %322, %cst_82 [1] : vector<8x128xf32> to vector<8xf32>
    %324 = vector.shape_cast %323 : vector<8xf32> to vector<8x1xf32>
    %325 = vector.broadcast %320 : vector<1x1xf32> to vector<8x1xf32>
    %326 = arith.addf %324, %325 : vector<8x1xf32>
    %327 = vector.shape_cast %326 : vector<8x1xf32> to vector<8x1xf32>
    %328 = vector.broadcast %327 : vector<8x1xf32> to vector<8x128xf32>
    %c0_83 = arith.constant 0 : index
    %c0_84 = arith.constant 0 : index
    %329 = vector.load %arg5[%c0_83, %c0_84] : memref<8x128xf32, #tpu.memory_space<vmem>>, vector<8x128xf32>
    tpu.vector_store %arg5[%c0_83, %c0_84], %328 {strides = array<i32>} : memref<8x128xf32, #tpu.memory_space<vmem>>, vector<8x128xf32>,
    return
  }
}

</mosaic_0001>

<bundles_post_ra>
// kernel: squeeze.1
= control target key start
LH: loop header
LB: loop body
LE: loop exit
PB: predicated region body
PF: predicated region fallthrough
CT: control target
= control target key end

     0   :  { %s77_s0 = inlined_call_operand.vmem [shape: f32[8], index: 0, kind: input, shape index: {}]   ;;  %s78_s1 = inlined_call_operand.hbm [shape: f32[2,4], index: 1, kind: output, shape index: {}]  }
   0x1   :  { %v6_v0 = vld [vmem:[%s77_s0] sm:$0x1] }
   0x2   :  { %2 = vsyncpa [#allocation1], 0  ;;  %7 = vst [vmem:[#allocation3] sm:$0x1] %v6_v0  ;;  %vm9_vm0 = vcmask 31744   ;;  %s59_s0 = smov 124  }
   0x3   :  { %s60_s8 = smov [#allocation0]  }
   0x4   :  { %s29_s9 = sshll.u32 %s60_s8, 4  ;;  %s30_s9 = int_to_ptr.vmem [resolvable:$true] %s29_s9 }
   0x5   :  { %s37_s10 = scalar_lea.vmem %s30_s9, 32  ;;  %p42_p1 = scmp.lt.s32.totalorder %s30_s9, %s30_s9 }
   0x6   :  { %p38_p0 = scmp.ne.s32.totalorder %s30_s9, %s37_s10  ;;  %p43_p2 = scmp.lt.s32.totalorder %s37_s10, %s37_s10 }
   0x8   :  { %p44_p3 = por %p43_p2, %p42_p1 }
   0x9   :  { %v11_v1 = vld [vmem:[#allocation3] sm:$0x1]  }
   0xa   :  { %v8_v2 = vld [vmem:[#allocation3] sm:$0x1]   ;;  %12 = vrot.lane.b32.xlu0 %v11_v1, %s59_s0  ;;  %p45_p4 = pnand %p44_p3, %p38_p0 }
   0xb   :  { %10 = vst.msk [vmem:[#allocation2] sm:$0x1] %vm9_vm0, %v8_v2  }
  0x7c   :  { %v13_v3 = vpop.permute.xlu0 %12  }
  0x7d   :  { %16 = vst.msk [vmem:[#allocation2 + $0x1] sm:$0x1] %vm9_vm0, %v13_v3  }
  0x84   :  { %v21_v4 = vld [vmem:[#allocation2] sm:$0x3] }
  0x85   :  { %24 = vst [vmem:[#allocation0] sm:$0x3] %v21_v4 }
  0x86   :  { %48 = shalt.err (!%p45_p4)
}
  0x87   :  { %32 = dma.vmem_to_hbm [thread:$0]  %s30_s9, 32, %s78_s1, [#allocation1]  }
  0x88   :  { %57 = dma.done.wait [#allocation1], 32  }
  0x89   :  { %58 = vsyncadd [#allocation1], 4294967264 }
  0x8a   :  { %34 = vsyncpa [#allocation1], 1 }

// kernel: videoqa_forward.1
= control target key start
LH: loop header
LB: loop body
LE: loop exit
PB: predicated region body
PF: predicated region fallthrough
CT: control target
= control target key end

     0   :  { %10 = vsyncpa [#allocation3], 0  ;;  %s4341_s0 = inlined_call_operand.vmem [shape: f32[8,256], index: 0, kind: input, shape index: {}]   ;;  %s4342_s1 = inlined_call_operand.vmem [shape: f32[8,8,128], index: 1, kind: input, shape index: {}]   ;;  %s4343_s2 = inlined_call_operand.hbm [shape: f32[128,1920], index: 2, kind: input, shape index: {}]   ;;  %s4344_s3 = inlined_call_operand.hbm [shape: f32[1024,128], index: 3, kind: input, shape index: {}]   ;;  %s4345_s4 = inlined_call_operand.vmem [shape: f32[1,2304], index: 4, kind: input, shape index: {}]   ;;  %s4346_s5 = inlined_call_operand.vmem [shape: f32[8,128], index: 5, kind: output, shape index: {}]  }
   0x1   :  { %11 = vsyncpa [#allocation5], 0  ;;  %s3214_s18 = smov [#allocation2]  }
   0x2   :  { %s21_s19 = sshll.u32 %s3214_s18, 4  ;;  %s22_s19 = int_to_ptr.vmem [resolvable:$true] %s21_s19 }
   0x3   :  { %s3178_s20 = scalar_lea.vmem %s22_s19, 30720  ;;  %p3183_p1 = scmp.lt.s32.totalorder %s22_s19, %s22_s19 }
   0x4   :  { %p3179_p0 = scmp.ne.s32.totalorder %s22_s19, %s3178_s20  ;;  %p3184_p2 = scmp.lt.s32.totalorder %s3178_s20, %s3178_s20 }
   0x6   :  { %p3185_p3 = por %p3184_p2, %p3183_p1 }
   0x8   :  { %p3186_p4 = pnand %p3185_p3, %p3179_p0 }
   0xa   :  { %3189 = shalt.err (!%p3186_p4)
}
   0xb   :  { %s3215_s21 = smov 1920   ;;  %s3216_s22 = smov 120  }
   0xc   :  { %27 = dma.hbm_to_vmem [thread:$0]  %s4343_s2, 30720, %s22_s19, [#allocation3], %s3215_s21, %s3215_s21, %s3216_s22  }
   0xd   :  { %s3217_s25 = smov [#allocation4]  }
   0xe   :  { %s33_s26 = sshll.u32 %s3217_s25, 4  ;;  %s34_s26 = int_to_ptr.vmem [resolvable:$true] %s33_s26 }
   0xf   :  { %s3198_s27 = scalar_lea.vmem %s34_s26, 16384  ;;  %p3203_p6 = scmp.lt.s32.totalorder %s34_s26, %s34_s26 }
  0x10   :  { %p3199_p5 = scmp.ne.s32.totalorder %s34_s26, %s3198_s27  ;;  %p3204_p7 = scmp.lt.s32.totalorder %s3198_s27, %s3198_s27 }
  0x12   :  { %p3205_p8 = por %p3204_p7, %p3203_p6 }
  0x14   :  { %p3206_p9 = pnand %p3205_p8, %p3199_p5 }
  0x16   :  { %3209 = shalt.err (!%p3206_p9)
}
  0x17   :  { %s3218_s28 = smov 128   ;;  %s3219_s29 = smov 8  }
  0x18   :  { %39 = dma.hbm_to_vmem [thread:$0]  %s4344_s3, 16384, %s34_s26, [#allocation5], %s3218_s28, %s3218_s28, %s3219_s29  }
  0x19   :  { %3210 = dma.done.wait [#allocation3], 30720  }
  0x1a   :  { %3211 = vsyncadd [#allocation3], 4294936576 }
  0x1b   :  { %3212 = dma.done.wait [#allocation5], 16384  }
  0x1c   :  { %3213 = vsyncadd [#allocation5], 4294950912  ;;  %v4351_v0 = vmov 0.0   ;;  %v81_v1 = vld [vmem:[#allocation4 + $0xf8] sm:$0xff]  ;;  %v228_v2 = vld [vmem:[#allocation2 + $0x710] sm:$0xff]  ;;  %vm3221_vm0 = vmmov 0  }
  0x1d   :  { %317 = vmatprep.mubr.f32.mxu1 %v4351_v0  ;;  %v65_v3 = vld [vmem:[#allocation4 + $0x78] sm:$0xff]  ;;  %2771 = vmatprep.subr.mxu0 %v81_v1  ;;  %v227_v4 = vld [vmem:[#allocation2 + $0x708] sm:$0xff]  ;;  %v80_v5 = vld [vmem:[#allocation4 + $0xf0] sm:$0xff] }
  0x1e   :  { %253 = vmatprep.subr.mxu1 %v228_v2  ;;  %v224_v6 = vld [vmem:[#allocation2 + $0x698] sm:$0xff]  ;;  %2772 = vmatpush3.msra.mxu0 %v65_v3  ;;  %v64_v7 = vld [vmem:[#allocation4 + $0x70] sm:$0xff]  ;;  %v79_v9 = vld [vmem:[#allocation4 + $0xe8] sm:$0xff] }
  0x1f   :  { %254 = vmatpush1.msra.mxu1 %v227_v4  ;;  %v223_v8 = vld [vmem:[#allocation2 + $0x690] sm:$0xff]  ;;  %2773 = vmatprep.subr.mxu0 %v80_v5  ;;  %v220_v10 = vld [vmem:[#allocation2 + $0x620] sm:$0xff]  ;;  %v63_v11 = vld [vmem:[#allocation4 + $0x68] sm:$0xff] }
  0x20   :  { %255 = vmatprep.subr.mxu1 %v224_v6  ;;  %v219_v12 = vld [vmem:[#allocation2 + $0x618] sm:$0xff]  ;;  %2774 = vmatpush3.msra.mxu0 %v64_v7  ;;  %v78_v13 = vld [vmem:[#allocation4 + $0xe0] sm:$0xff]  ;;  %v216_v14 = vld [vmem:[#allocation2 + $0x5a8] sm:$0xff] }
  0x21   :  { %256 = vmatpush1.msra.mxu1 %v223_v8  ;;  %2775 = vmatprep.subr.mxu0 %v79_v9  ;;  %v62_v15 = vld [vmem:[#allocation4 + $0x60] sm:$0xff]  ;;  %v77_v17 = vld [vmem:[#allocation4 + $0xd8] sm:$0xff]  ;;  %v212_v18 = vld [vmem:[#allocation2 + $0x530] sm:$0xff] }
  0x22   :  { %257 = vmatprep.subr.mxu1 %v220_v10  ;;  %v215_v16 = vld [vmem:[#allocation2 + $0x5a0] sm:$0xff]  ;;  %2776 = vmatpush3.msra.mxu0 %v63_v11  ;;  %v61_v19 = vld [vmem:[#allocation4 + $0x58] sm:$0xff]  ;;  %v211_v20 = vld [vmem:[#allocation2 + $0x528] sm:$0xff] }
  0x23   :  { %258 = vmatpush1.msra.mxu1 %v219_v12  ;;  %2777 = vmatprep.subr.mxu0 %v78_v13  ;;  %v76_v21 = vld [vmem:[#allocation4 + $0xd0] sm:$0xff]  ;;  %v208_v22 = vld [vmem:[#allocation2 + $0x4b8] sm:$0xff]  ;;  %v75_v25 = vld [vmem:[#allocation4 + $0xc8] sm:$0xff] }
  0x24   :  { %259 = vmatprep.subr.mxu1 %v216_v14  ;;  %2778 = vmatpush3.msra.mxu0 %v62_v15  ;;  %v60_v23 = vld [vmem:[#allocation4 + $0x50] sm:$0xff]  ;;  %v204_v26 = vld [vmem:[#allocation2 + $0x440] sm:$0xff]  ;;  %v59_v27 = vld [vmem:[#allocation4 + $0x48] sm:$0xff] }
  0x25   :  { %260 = vmatpush1.msra.mxu1 %v215_v16  ;;  %2779 = vmatprep.subr.mxu0 %v77_v17  ;;  %v207_v24 = vld [vmem:[#allocation2 + $0x4b0] sm:$0xff]  ;;  %v203_v28 = vld [vmem:[#allocation2 + $0x438] sm:$0xff]  ;;  %v74_v29 = vld [vmem:[#allocation4 + $0xc0] sm:$0xff] }
  0x26   :  { %261 = vmatprep.subr.mxu1 %v212_v18  ;;  %2780 = vmatpush3.msra.mxu0 %v61_v19  ;;  %v200_v30 = vld [vmem:[#allocation2 + $0x3c8] sm:$0xff]  ;;  %v58_v31 = vld [vmem:[#allocation4 + $0x40] sm:$0xff]  ;;  %v73_v33 = vld [vmem:[#allocation4 + $0xb8] sm:$0xff] }
  0x27   :  { %262 = vmatpush1.msra.mxu1 %v211_v20  ;;  %2781 = vmatprep.subr.mxu0 %v76_v21  ;;  %v199_v32 = vld [vmem:[#allocation2 + $0x3c0] sm:$0xff]  ;;  %v196_v34 = vld [vmem:[#allocation2 + $0x350] sm:$0xff]  ;;  %v57_v35 = vld [vmem:[#allocation4 + $0x38] sm:$0xff] }
  0x28   :  { %263 = vmatprep.subr.mxu1 %v208_v22  ;;  %2782 = vmatpush3.msra.mxu0 %v60_v23  ;;  %v195_v36 = vld [vmem:[#allocation2 + $0x348] sm:$0xff]  ;;  %v72_v37 = vld [vmem:[#allocation4 + $0xb0] sm:$0xff]  ;;  %v192_v38 = vld [vmem:[#allocation2 + $0x2d8] sm:$0xff] }
  0x29   :  { %264 = vmatpush1.msra.mxu1 %v207_v24  ;;  %2783 = vmatprep.subr.mxu0 %v75_v25  ;;  %v56_v39 = vld [vmem:[#allocation4 + $0x30] sm:$0xff]  ;;  %v71_v41 = vld [vmem:[#allocation4 + $0xa8] sm:$0xff]  ;;  %v188_v42 = vld [vmem:[#allocation2 + $0x260] sm:$0xff] }
  0x2a   :  { %265 = vmatprep.subr.mxu1 %v204_v26  ;;  %2784 = vmatpush3.msra.mxu0 %v59_v27  ;;  %v191_v40 = vld [vmem:[#allocation2 + $0x2d0] sm:$0xff]  ;;  %v55_v43 = vld [vmem:[#allocation4 + $0x28] sm:$0xff]  ;;  %v187_v44 = vld [vmem:[#allocation2 + $0x258] sm:$0xff] }
  0x2b   :  { %266 = vmatpush1.msra.mxu1 %v203_v28  ;;  %2785 = vmatprep.subr.mxu0 %v74_v29  ;;  %v70_v45 = vld [vmem:[#allocation4 + $0xa0] sm:$0xff]  ;;  %v184_v46 = vld [vmem:[#allocation2 + $0x1e8] sm:$0xff]  ;;  %v69_v49 = vld [vmem:[#allocation4 + $0x98] sm:$0xff] }
  0x2c   :  { %267 = vmatprep.subr.mxu1 %v200_v30  ;;  %2786 = vmatpush3.msra.mxu0 %v58_v31  ;;  %v54_v47 = vld [vmem:[#allocation4 + $0x20] sm:$0xff]  ;;  %v180_v50 = vld [vmem:[#allocation2 + $0x170] sm:$0xff]  ;;  %v53_v51 = vld [vmem:[#allocation4 + $0x18] sm:$0xff] }
  0x2d   :  { %268 = vmatpush1.msra.mxu1 %v199_v32  ;;  %2787 = vmatprep.subr.mxu0 %v73_v33  ;;  %v183_v48 = vld [vmem:[#allocation2 + $0x1e0] sm:$0xff]  ;;  %v179_v52 = vld [vmem:[#allocation2 + $0x168] sm:$0xff]  ;;  %v68_v53 = vld [vmem:[#allocation4 + $0x90] sm:$0xff] }
  0x2e   :  { %269 = vmatprep.subr.mxu1 %v196_v34  ;;  %2788 = vmatpush3.msra.mxu0 %v57_v35  ;;  %v176_v54 = vld [vmem:[#allocation2 + $0xf8] sm:$0xff]  ;;  %v52_v55 = vld [vmem:[#allocation4 + $0x10] sm:$0xff]  ;;  %v67_v57 = vld [vmem:[#allocation4 + $0x88] sm:$0xff] }
  0x2f   :  { %270 = vmatpush1.msra.mxu1 %v195_v36  ;;  %2789 = vmatprep.subr.mxu0 %v72_v37  ;;  %v175_v56 = vld [vmem:[#allocation2 + $0xf0] sm:$0xff]  ;;  %v172_v58 = vld [vmem:[#allocation2 + $0x80] sm:$0xff]  ;;  %v51_v59 = vld [vmem:[#allocation4 + $0x8] sm:$0xff] }
  0x30   :  { %271 = vmatprep.subr.mxu1 %v192_v38  ;;  %2790 = vmatpush3.msra.mxu0 %v56_v39  ;;  %v171_v60 = vld [vmem:[#allocation2 + $0x78] sm:$0xff]  ;;  %v66_v61 = vld [vmem:[#allocation4 + $0x80] sm:$0xff]  ;;  %v168_v62 = vld [vmem:[#allocation2 + $0x8] sm:$0xff] }
  0x31   :  { %272 = vmatpush1.msra.mxu1 %v191_v40  ;;  %2791 = vmatprep.subr.mxu0 %v71_v41  ;;  %v50_v63 = vld [vmem:[#allocation4] sm:$0xff]  ;;  %v49_v1 = vld [vmem:[%s4341_s0 + $0x8] sm:$0xff]  ;;  %v3271_v6 = vld [vmem:[#allocation2 + $0x730] sm:$0xff] }
  0x32   :  { %273 = vmatprep.subr.mxu1 %v188_v42  ;;  %2792 = vmatpush3.msra.mxu0 %v55_v43  ;;  %v167_v2 = vld [vmem:[#allocation2] sm:$0xff]  ;;  %4447 = vst [vmem:[#allocation8_spill] sm:$0xff] %v3271_v6  ;;  %v229_v7 = vld [vmem:[#allocation2 + $0x718] sm:$0xff]  ;;  %v3273_v8 = vld [vmem:[#allocation2 + $0x728] sm:$0xff] }
  0x33   :  { %274 = vmatpush1.msra.mxu1 %v187_v44  ;;  %2793 = vmatprep.subr.mxu0 %v70_v45  ;;  %v48_v3 = vld [vmem:[%s4341_s0] sm:$0xff]  ;;  %v226_v9 = vld [vmem:[#allocation2 + $0x6a8] sm:$0xff]  ;;  %v3276_v10 = vld [vmem:[#allocation2 + $0x6b8] sm:$0xff] }
  0x34   :  { %275 = vmatprep.subr.mxu1 %v184_v46  ;;  %2794 = vmatpush3.msra.mxu0 %v54_v47  ;;  %v3269_v4 = vld [vmem:[%s4342_s1] sm:$0xff]  ;;  %v3279_v12 = vld [vmem:[#allocation2 + $0x6b0] sm:$0xff]  ;;  %v3285_v13 = vld [vmem:[%s4342_s1 + $0x8] sm:$0xff] }
  0x35   :  { %276 = vmatpush1.msra.mxu1 %v183_v48  ;;  %2795 = vmatprep.subr.mxu0 %v69_v49  ;;  %v230_v5 = vld [vmem:[#allocation2 + $0x720] sm:$0xff]  ;;  %v222_v14 = vld [vmem:[#allocation2 + $0x630] sm:$0xff]  ;;  %v221_v16 = vld [vmem:[#allocation2 + $0x628] sm:$0xff] }
  0x36   :  { %277 = vmatprep.subr.mxu1 %v180_v50  ;;  %2796 = vmatpush3.msra.mxu0 %v53_v51  ;;  %v225_v11 = vld [vmem:[#allocation2 + $0x6a0] sm:$0xff]  ;;  %v3292_v17 = vld [vmem:[#allocation2 + $0x638] sm:$0xff]  ;;  %v3295_v19 = vld [vmem:[#allocation2 + $0x5c8] sm:$0xff] }
  0x37   :  { %278 = vmatpush1.msra.mxu1 %v179_v52  ;;  %2797 = vmatprep.subr.mxu0 %v68_v53  ;;  %v3289_v15 = vld [vmem:[#allocation2 + $0x640] sm:$0xff]  ;;  %v218_v18 = vld [vmem:[#allocation2 + $0x5b8] sm:$0xff]  ;;  %v217_v20 = vld [vmem:[#allocation2 + $0x5b0] sm:$0xff] }
  0x38   :  { %279 = vmatprep.subr.mxu1 %v176_v54  ;;  %2798 = vmatpush3.msra.mxu0 %v52_v55  ;;  %v3298_v21 = vld [vmem:[#allocation2 + $0x5c0] sm:$0xff]  ;;  %v3304_v22 = vld [vmem:[%s4342_s1 + $0x10] sm:$0xff]  ;;  %v213_v25 = vld [vmem:[#allocation2 + $0x538] sm:$0xff] }
  0x39   :  { %280 = vmatpush1.msra.mxu1 %v175_v56  ;;  %2799 = vmatprep.subr.mxu0 %v67_v57  ;;  %v214_v23 = vld [vmem:[#allocation2 + $0x540] sm:$0xff]  ;;  %v3308_v24 = vld [vmem:[#allocation2 + $0x550] sm:$0xff]  ;;  %v3311_v26 = vld [vmem:[#allocation2 + $0x548] sm:$0xff] }
  0x3a   :  { %281 = vmatprep.subr.mxu1 %v172_v58  ;;  %2800 = vmatpush3.msra.mxu0 %v51_v59  ;;  %v210_v27 = vld [vmem:[#allocation2 + $0x4c8] sm:$0xff]  ;;  %v3314_v28 = vld [vmem:[#allocation2 + $0x4d8] sm:$0xff]  ;;  %v209_v29 = vld [vmem:[#allocation2 + $0x4c0] sm:$0xff] }
  0x3b   :  { %282 = vmatpush1.msra.mxu1 %v171_v60  ;;  %2801 = vmatprep.subr.mxu0 %v66_v61  ;;  %4448 = vst [vmem:[#allocation9_spill] sm:$0xff] %v3314_v28  ;;  %v3317_v30 = vld [vmem:[#allocation2 + $0x4d0] sm:$0xff]  ;;  %v3323_v31 = vld [vmem:[%s4342_s1 + $0x18] sm:$0xff]  ;;  %v3327_v33 = vld [vmem:[#allocation2 + $0x460] sm:$0xff] }
  0x3c   :  { %283 = vmatprep.subr.mxu1 %v168_v62  ;;  %2802 = vmatpush3.msra.mxu0 %v50_v63  ;;  %4449 = vst [vmem:[#allocation10_spill] sm:$0xff] %v3317_v30  ;;  %v206_v32 = vld [vmem:[#allocation2 + $0x450] sm:$0xff]  ;;  %v205_v34 = vld [vmem:[#allocation2 + $0x448] sm:$0xff]  ;;  %v3330_v35 = vld [vmem:[#allocation2 + $0x458] sm:$0xff] }
  0x3d   :  { %153 = vmatprep.mubr.f32.mxu0 %v49_v1  ;;  %284 = vmatpush1.msra.mxu1 %v167_v2  ;;  %v202_v36 = vld [vmem:[#allocation2 + $0x3d8] sm:$0xff]  ;;  %v3333_v37 = vld [vmem:[#allocation2 + $0x3e8] sm:$0xff]  ;;  %v201_v38 = vld [vmem:[#allocation2 + $0x3d0] sm:$0xff] }
  0x3e   :  { %154 = vmatmul.mubr.f32.vlgmr.msra.gmra.mxu0 %v48_v3  ;;  %318 = vmatmul.mubr.f32.vlgmr.msra.gmra.mxu1 %v3269_v4  ;;  %v3336_v39 = vld [vmem:[#allocation2 + $0x3e0] sm:$0xff]  ;;  %v3346_v42 = vld [vmem:[#allocation2 + $0x370] sm:$0xff]  ;;  %v197_v43 = vld [vmem:[#allocation2 + $0x358] sm:$0xff] }
  0x3f   :  { %366 = vmatprep.subr.mxu0 %v230_v5  ;;  %543 = vmatprep.subr.mxu1 %v3271_v6  ;;  %v3342_v40 = vld [vmem:[%s4342_s1 + $0x20] sm:$0xff]  ;;  %v3349_v44 = vld [vmem:[#allocation2 + $0x368] sm:$0xff]  ;;  %v3352_v46 = vld [vmem:[#allocation2 + $0x2f8] sm:$0xff] }
  0x40   :  { %367 = vmatpush1.msra.mxu0 %v229_v7  ;;  %544 = vmatpush1.msra.mxu1 %v3273_v8  ;;  %v198_v41 = vld [vmem:[#allocation2 + $0x360] sm:$0xff]  ;;  %v194_v45 = vld [vmem:[#allocation2 + $0x2e8] sm:$0xff]  ;;  %v3355_v48 = vld [vmem:[#allocation2 + $0x2f0] sm:$0xff] }
  0x41   :  { %368 = vmatprep.subr.mxu0 %v226_v9  ;;  %545 = vmatprep.subr.mxu1 %v3276_v10  ;;  %v193_v47 = vld [vmem:[#allocation2 + $0x2e0] sm:$0xff]  ;;  %v3361_v49 = vld [vmem:[%s4342_s1 + $0x28] sm:$0xff]  ;;  %v190_v50 = vld [vmem:[#allocation2 + $0x270] sm:$0xff] }
  0x42   :  { %323 = vmatprep.mubr.f32.mxu1 %v4351_v0  ;;  %369 = vmatpush1.msra.mxu0 %v225_v11  ;;  %v3365_v51 = vld [vmem:[#allocation2 + $0x280] sm:$0xff]  ;;  %v189_v52 = vld [vmem:[#allocation2 + $0x268] sm:$0xff]  ;;  %v3368_v53 = vld [vmem:[#allocation2 + $0x278] sm:$0xff] }
  0x43   :  { %546 = vmatpush1.msra.mxu1 %v3279_v12  ;;  %370 = vmatprep.subr.mxu0 %v222_v14  ;;  %4450 = vst [vmem:[#allocation11_spill] sm:$0xff] %v3368_v53  ;;  %v186_v54 = vld [vmem:[#allocation2 + $0x1f8] sm:$0xff]  ;;  %v3371_v55 = vld [vmem:[#allocation2 + $0x208] sm:$0xff]  ;;  %v185_v56 = vld [vmem:[#allocation2 + $0x1f0] sm:$0xff] }
  0x44   :  { %324 = vmatmul.mubr.f32.gmra.mxu1 %v3285_v13  ;;  %547 = vmatprep.subr.mxu1 %v3289_v15  ;;  %4451 = vst [vmem:[#allocation12_spill] sm:$0xff] %v3371_v55  ;;  %v3374_v57 = vld [vmem:[#allocation2 + $0x200] sm:$0xff]  ;;  %v3380_v58 = vld [vmem:[%s4342_s1 + $0x30] sm:$0xff]  ;;  %v181_v61 = vld [vmem:[#allocation2 + $0x178] sm:$0xff] }
  0x45   :  { %371 = vmatpush1.msra.mxu0 %v221_v16  ;;  %548 = vmatpush1.msra.mxu1 %v3292_v17  ;;  %4452 = vst [vmem:[#allocation13_spill] sm:$0xff] %v3374_v57  ;;  %v182_v59 = vld [vmem:[#allocation2 + $0x180] sm:$0xff]  ;;  %v3384_v60 = vld [vmem:[#allocation2 + $0x190] sm:$0xff]  ;;  %v3387_v62 = vld [vmem:[#allocation2 + $0x188] sm:$0xff] }
  0x46   :  { %372 = vmatprep.subr.mxu0 %v218_v18  ;;  %549 = vmatprep.subr.mxu1 %v3295_v19  ;;  %4453 = vst [vmem:[#allocation14_spill] sm:$0xff] %v3384_v60  ;;  %4454 = vst [vmem:[#allocation15_spill] sm:$0xff] %v3387_v62  ;;  %v178_v63 = vld [vmem:[#allocation2 + $0x108] sm:$0xff]  ;;  %v3390_v1 = vld [vmem:[#allocation2 + $0x118] sm:$0xff] }
  0x47   :  { %329 = vmatprep.mubr.f32.mxu1 %v4351_v0  ;;  %373 = vmatpush1.msra.mxu0 %v217_v20  ;;  %4455 = vst [vmem:[#allocation16_spill] sm:$0xff] %v3390_v1  ;;  %v177_v2 = vld [vmem:[#allocation2 + $0x100] sm:$0xff]  ;;  %v3393_v3 = vld [vmem:[#allocation2 + $0x110] sm:$0xff]  ;;  %v3399_v5 = vld [vmem:[%s4342_s1 + $0x38] sm:$0xff] }
  0x48   :  { %550 = vmatpush1.msra.mxu1 %v3298_v21  ;;  %374 = vmatprep.subr.mxu0 %v214_v23  ;;  %4456 = vst [vmem:[#allocation17_spill] sm:$0xff] %v3393_v3  ;;  %v174_v7 = vld [vmem:[#allocation2 + $0x90] sm:$0xff]  ;;  %v3403_v9 = vld [vmem:[#allocation2 + $0xa0] sm:$0xff]  ;;  %v173_v11 = vld [vmem:[#allocation2 + $0x88] sm:$0xff] }
  0x49   :  { %330 = vmatmul.mubr.f32.gmra.mxu1 %v3304_v22  ;;  %551 = vmatprep.subr.mxu1 %v3308_v24  ;;  %4457 = vst [vmem:[#allocation18_spill] sm:$0xff] %v3403_v9  ;;  %v3406_v14 = vld [vmem:[#allocation2 + $0x98] sm:$0xff]  ;;  %v3409_v18 = vld [vmem:[#allocation2 + $0x28] sm:$0xff]  ;;  %v169_v20 = vld [vmem:[#allocation2 + $0x10] sm:$0xff] }
  0x4a   :  { %375 = vmatpush1.msra.mxu0 %v213_v25  ;;  %552 = vmatpush1.msra.mxu1 %v3311_v26  ;;  %4458 = vst [vmem:[#allocation19_spill] sm:$0xff] %v3406_v14  ;;  %v170_v16 = vld [vmem:[#allocation2 + $0x18] sm:$0xff]  ;;  %4459 = vst [vmem:[#allocation20_spill] sm:$0xff] %v3409_v18  ;;  %v3412_v23 = vld [vmem:[#allocation2 + $0x20] sm:$0xff] }
  0x4b   :  { %376 = vmatprep.subr.mxu0 %v210_v27  ;;  %553 = vmatprep.subr.mxu1 %v3314_v28  ;;  %4460 = vst [vmem:[#allocation21_spill] sm:$0xff] %v3412_v23  ;;  %v3416_v25 = vld [vmem:[#allocation2 + $0x740] sm:$0xff]  ;;  %v3420_v27 = vld [vmem:[#allocation2 + $0x738] sm:$0xff] }
  0x4c   :  { %335 = vmatprep.mubr.f32.mxu1 %v4351_v0  ;;  %377 = vmatpush1.msra.mxu0 %v209_v29  ;;  %4461 = vst [vmem:[#allocation22_spill] sm:$0xff] %v3416_v25  ;;  %v3424_v29 = vld [vmem:[#allocation2 + $0x6c8] sm:$0xff] }
  0x4d   :  { %554 = vmatpush1.msra.mxu1 %v3317_v30  ;;  %378 = vmatprep.subr.mxu0 %v206_v32  ;;  %v3428_v32 = vld [vmem:[#allocation2 + $0x6c0] sm:$0xff] }
  0x4e   :  { %336 = vmatmul.mubr.f32.gmra.mxu1 %v3323_v31  ;;  %555 = vmatprep.subr.mxu1 %v3327_v33 }
  0x4f   :  { %379 = vmatpush1.msra.mxu0 %v205_v34  ;;  %556 = vmatpush1.msra.mxu1 %v3330_v35  ;;  %v3432_v34 = vld [vmem:[#allocation2 + $0x650] sm:$0xff] }
  0x50   :  { %380 = vmatprep.subr.mxu0 %v202_v36  ;;  %557 = vmatprep.subr.mxu1 %v3333_v37  ;;  %v3435_v36 = vld [vmem:[#allocation2 + $0x648] sm:$0xff] }
  0x51   :  { %341 = vmatprep.mubr.f32.mxu1 %v4351_v0  ;;  %381 = vmatpush1.msra.mxu0 %v201_v38  ;;  %v3444_v38 = vld [vmem:[#allocation2 + $0x5d0] sm:$0xff] }
  0x52   :  { %558 = vmatpush1.msra.mxu1 %v3336_v39  ;;  %382 = vmatprep.subr.mxu0 %v198_v41  ;;  %v3448_v41 = vld [vmem:[#allocation2 + $0x560] sm:$0xff] }
  0x53   :  { %342 = vmatmul.mubr.f32.gmra.mxu1 %v3342_v40  ;;  %559 = vmatprep.subr.mxu1 %v3346_v42 }
  0x54   :  { %383 = vmatpush1.msra.mxu0 %v197_v43  ;;  %560 = vmatpush1.msra.mxu1 %v3349_v44  ;;  %v3451_v43 = vld [vmem:[#allocation2 + $0x558] sm:$0xff] }
  0x55   :  { %384 = vmatprep.subr.mxu0 %v194_v45  ;;  %561 = vmatprep.subr.mxu1 %v3352_v46  ;;  %v3455_v45 = vld [vmem:[#allocation2 + $0x4e8] sm:$0xff] }
  0x56   :  { %347 = vmatprep.mubr.f32.mxu1 %v4351_v0  ;;  %385 = vmatpush1.msra.mxu0 %v193_v47  ;;  %v3464_v47 = vld [vmem:[#allocation2 + $0x470] sm:$0xff] }
  0x57   :  { %562 = vmatpush1.msra.mxu1 %v3355_v48  ;;  %386 = vmatprep.subr.mxu0 %v190_v50  ;;  %v3467_v50 = vld [vmem:[#allocation2 + $0x468] sm:$0xff] }
  0x58   :  { %348 = vmatmul.mubr.f32.gmra.mxu1 %v3361_v49  ;;  %563 = vmatprep.subr.mxu1 %v3365_v51 }
  0x59   :  { %387 = vmatpush1.msra.mxu0 %v189_v52  ;;  %564 = vmatpush1.msra.mxu1 %v3368_v53  ;;  %v3471_v52 = vld [vmem:[#allocation2 + $0x3f8] sm:$0xff] }
  0x5a   :  { %388 = vmatprep.subr.mxu0 %v186_v54  ;;  %565 = vmatprep.subr.mxu1 %v3371_v55  ;;  %v3480_v54 = vld [vmem:[#allocation2 + $0x380] sm:$0xff] }
  0x5b   :  { %353 = vmatprep.mubr.f32.mxu1 %v4351_v0  ;;  %389 = vmatpush1.msra.mxu0 %v185_v56  ;;  %v3483_v56 = vld [vmem:[#allocation2 + $0x378] sm:$0xff] }
  0x5c   :  { %566 = vmatpush1.msra.mxu1 %v3374_v57  ;;  %390 = vmatprep.subr.mxu0 %v182_v59  ;;  %v3487_v59 = vld [vmem:[#allocation2 + $0x308] sm:$0xff] }
  0x5d   :  { %354 = vmatmul.mubr.f32.gmra.mxu1 %v3380_v58  ;;  %567 = vmatprep.subr.mxu1 %v3384_v60 }
  0x5e   :  { %391 = vmatpush1.msra.mxu0 %v181_v61  ;;  %568 = vmatpush1.msra.mxu1 %v3387_v62  ;;  %v3496_v61 = vld [vmem:[#allocation2 + $0x290] sm:$0xff] }
  0x5f   :  { %392 = vmatprep.subr.mxu0 %v178_v63  ;;  %569 = vmatprep.subr.mxu1 %v3390_v1  ;;  %v3499_v63 = vld [vmem:[#allocation2 + $0x288] sm:$0xff] }
  0x60   :  { %359 = vmatprep.mubr.f32.mxu1 %v4351_v0  ;;  %393 = vmatpush1.msra.mxu0 %v177_v2  ;;  %4462 = vst [vmem:[#allocation23_spill] sm:$0xff] %v3499_v63  ;;  %v3503_v2 = vld [vmem:[#allocation2 + $0x218] sm:$0xff] }
  0x61   :  { %570 = vmatpush1.msra.mxu1 %v3393_v3  ;;  %394 = vmatprep.subr.mxu0 %v174_v7  ;;  %4463 = vst [vmem:[#allocation24_spill] sm:$0xff] %v3503_v2  ;;  %v3512_v7 = vld [vmem:[#allocation2 + $0x1a0] sm:$0xff] }
  0x62   :  { %360 = vmatmul.mubr.f32.gmra.mxu1 %v3399_v5  ;;  %571 = vmatprep.subr.mxu1 %v3403_v9  ;;  %4465 = vst [vmem:[#allocation26_spill] sm:$0xff] %v3512_v7 }
  0x63   :  { %395 = vmatpush1.msra.mxu0 %v173_v11  ;;  %572 = vmatpush1.msra.mxu1 %v3406_v14  ;;  %v3515_v11 = vld [vmem:[#allocation2 + $0x198] sm:$0xff] }
  0x64   :  { %396 = vmatprep.subr.mxu0 %v170_v16  ;;  %573 = vmatprep.subr.mxu1 %v3409_v18  ;;  %4466 = vst [vmem:[#allocation27_spill] sm:$0xff] %v3515_v11  ;;  %v3519_v16 = vld [vmem:[#allocation2 + $0x128] sm:$0xff] }
  0x65   :  { %397 = vmatpush1.msra.mxu0 %v169_v20  ;;  %430 = vmatprep.mubr.f32.mxu0 %v4351_v0  ;;  %4467 = vst [vmem:[#allocation28_spill] sm:$0xff] %v3519_v16  ;;  %v3528_v20 = vld [vmem:[#allocation2 + $0xb0] sm:$0xff] }
  0x66   :  { %574 = vmatpush1.msra.mxu1 %v3412_v23  ;;  %607 = vmatprep.mubr.f32.mxu1 %v4351_v0  ;;  %4469 = vst [vmem:[#allocation30_spill] sm:$0xff] %v3528_v20 }
  0x67   :  { %431 = vmatmul.mubr.f32.vlgmr.msra.gmra.mxu0 %v3269_v4  ;;  %608 = vmatmul.mubr.f32.vlgmr.msra.gmra.mxu1 %v4351_v0  ;;  %v3439_v4 = vld [vmem:[#allocation2 + $0x5d8] sm:$0xff] }
  0x68   :  { %614 = vmatprep.subr.mxu0 %v3416_v25  ;;  %436 = vmatprep.mubr.f32.mxu0 %v4351_v0 }
  0x69   :  { %615 = vmatpush1.msra.mxu0 %v3420_v27  ;;  %713 = vmatprep.subr.mxu1 %v3271_v6 }
  0x6a   :  { %616 = vmatprep.subr.mxu0 %v3424_v29  ;;  %714 = vmatpush1.msra.mxu1 %v3273_v8 }
  0x6b   :  { %617 = vmatpush1.msra.mxu0 %v3428_v32  ;;  %715 = vmatprep.subr.mxu1 %v3276_v10 }
  0x6c   :  { %437 = vmatmul.mubr.f32.gmra.mxu0 %v3285_v13  ;;  %618 = vmatprep.subr.mxu0 %v3432_v34  ;;  %v3460_v13 = vld [vmem:[#allocation2 + $0x4e0] sm:$0xff] }
  0x6d   :  { %619 = vmatpush1.msra.mxu0 %v3435_v36  ;;  %442 = vmatprep.mubr.f32.mxu0 %v4351_v0 }
  0x6e   :  { %620 = vmatprep.subr.mxu0 %v3439_v4  ;;  %716 = vmatpush1.msra.mxu1 %v3279_v12 }
  0x6f   :  { %621 = vmatpush1.msra.mxu0 %v3444_v38  ;;  %717 = vmatprep.subr.mxu1 %v3289_v15 }
  0x70   :  { %443 = vmatmul.mubr.f32.gmra.mxu0 %v3304_v22  ;;  %622 = vmatprep.subr.mxu0 %v3448_v41  ;;  %v3476_v22 = vld [vmem:[#allocation2 + $0x3f0] sm:$0xff] }
  0x71   :  { %623 = vmatpush1.msra.mxu0 %v3451_v43  ;;  %448 = vmatprep.mubr.f32.mxu0 %v4351_v0 }
  0x72   :  { %624 = vmatprep.subr.mxu0 %v3455_v45  ;;  %718 = vmatpush1.msra.mxu1 %v3292_v17 }
  0x73   :  { %625 = vmatpush1.msra.mxu0 %v3460_v13  ;;  %719 = vmatprep.subr.mxu1 %v3295_v19 }
  0x74   :  { %449 = vmatmul.mubr.f32.gmra.mxu0 %v3323_v31  ;;  %626 = vmatprep.subr.mxu0 %v3464_v47  ;;  %v3492_v31 = vld [vmem:[#allocation2 + $0x300] sm:$0xff] }
  0x75   :  { %627 = vmatpush1.msra.mxu0 %v3467_v50  ;;  %454 = vmatprep.mubr.f32.mxu0 %v4351_v0 }
  0x76   :  { %628 = vmatprep.subr.mxu0 %v3471_v52  ;;  %720 = vmatpush1.msra.mxu1 %v3298_v21 }
  0x77   :  { %629 = vmatpush1.msra.mxu0 %v3476_v22  ;;  %721 = vmatprep.subr.mxu1 %v3308_v24 }
  0x78   :  { %455 = vmatmul.mubr.f32.gmra.mxu0 %v3342_v40  ;;  %630 = vmatprep.subr.mxu0 %v3480_v54  ;;  %v3508_v40 = vld [vmem:[#allocation2 + $0x210] sm:$0xff] }
  0x79   :  { %631 = vmatpush1.msra.mxu0 %v3483_v56  ;;  %460 = vmatprep.mubr.f32.mxu0 %v4351_v0  ;;  %4464 = vst [vmem:[#allocation25_spill] sm:$0xff] %v3508_v40 }
  0x7a   :  { %632 = vmatprep.subr.mxu0 %v3487_v59  ;;  %722 = vmatpush1.msra.mxu1 %v3311_v26 }
  0x7b   :  { %633 = vmatpush1.msra.mxu0 %v3492_v31  ;;  %723 = vmatprep.subr.mxu1 %v3314_v28  ;;  %v3531_v28 = vld [vmem:[#allocation2 + $0xa8] sm:$0xff] }
  0x7c   :  { %461 = vmatmul.mubr.f32.gmra.mxu0 %v3361_v49  ;;  %634 = vmatprep.subr.mxu0 %v3496_v61  ;;  %v3524_v49 = vld [vmem:[#allocation2 + $0x120] sm:$0xff]  ;;  %4470 = vst [vmem:[#allocation31_spill] sm:$0xff] %v3531_v28 }
  0x7d   :  { %635 = vmatpush1.msra.mxu0 %v3499_v63  ;;  %466 = vmatprep.mubr.f32.mxu0 %v4351_v0  ;;  %4468 = vst [vmem:[#allocation29_spill] sm:$0xff] %v3524_v49 }
  0x7e   :  { %636 = vmatprep.subr.mxu0 %v3503_v2  ;;  %724 = vmatpush1.msra.mxu1 %v3317_v30  ;;  %v3535_v30 = vld [vmem:[#allocation2 + $0x38] sm:$0xff] }
  0x7f   :  { %637 = vmatpush1.msra.mxu0 %v3508_v40  ;;  %725 = vmatprep.subr.mxu1 %v3327_v33  ;;  %4471 = vst [vmem:[#allocation32_spill] sm:$0xff] %v3535_v30 }
  0x80   :  { %467 = vmatmul.mubr.f32.gmra.mxu0 %v3380_v58  ;;  %638 = vmatprep.subr.mxu0 %v3512_v7  ;;  %v3540_v58 = vld [vmem:[#allocation2 + $0x30] sm:$0xff] }
  0x81   :  { %639 = vmatpush1.msra.mxu0 %v3515_v11  ;;  %472 = vmatprep.mubr.f32.mxu0 %v4351_v0  ;;  %4472 = vst [vmem:[#allocation33_spill] sm:$0xff] %v3540_v58 }
  0x82   :  { %640 = vmatprep.subr.mxu0 %v3519_v16  ;;  %726 = vmatpush1.msra.mxu1 %v3330_v35 }
  0x83   :  { %641 = vmatpush1.msra.mxu0 %v3524_v49  ;;  %727 = vmatprep.subr.mxu1 %v3333_v37 }
  0x84   :  { %473 = vmatmul.mubr.f32.gmra.mxu0 %v3399_v5  ;;  %642 = vmatprep.subr.mxu0 %v3528_v20  ;;  %v233_v5 = vlaneseq }
  0x85   :  { %643 = vmatpush1.msra.mxu0 %v3531_v28  ;;  %678 = vmatprep.mubr.f32.mxu0 %v4351_v0 }
  0x86   :  { %644 = vmatprep.subr.mxu0 %v3535_v30  ;;  %728 = vmatpush1.msra.mxu1 %v3336_v39 }
  0x87   :  { %645 = vmatpush1.msra.mxu0 %v3540_v58  ;;  %729 = vmatprep.subr.mxu1 %v3346_v42 }
  0x88   :  { %679 = vmatmul.mubr.f32.vlgmr.msra.gmra.mxu0 %v4351_v0  ;;  %784 = vmatprep.subr.mxu0 %v3416_v25 }
  0x89   :  { %785 = vmatpush1.msra.mxu0 %v3420_v27  ;;  %730 = vmatpush1.msra.mxu1 %v3349_v44 }
  0x8a   :  { %786 = vmatprep.subr.mxu0 %v3424_v29  ;;  %731 = vmatprep.subr.mxu1 %v3352_v46 }
  0x8b   :  { %787 = vmatpush1.msra.mxu0 %v3428_v32  ;;  %732 = vmatpush1.msra.mxu1 %v3355_v48 }
  0x8c   :  { %788 = vmatprep.subr.mxu0 %v3432_v34  ;;  %733 = vmatprep.subr.mxu1 %v3365_v51 }
  0x8d   :  { %789 = vmatpush1.msra.mxu0 %v3435_v36  ;;  %734 = vmatpush1.msra.mxu1 %v3368_v53 }
  0x8e   :  { %790 = vmatprep.subr.mxu0 %v3439_v4  ;;  %735 = vmatprep.subr.mxu1 %v3371_v55 }
  0x8f   :  { %791 = vmatpush1.msra.mxu0 %v3444_v38  ;;  %736 = vmatpush1.msra.mxu1 %v3374_v57 }
  0x90   :  { %792 = vmatprep.subr.mxu0 %v3448_v41  ;;  %737 = vmatprep.subr.mxu1 %v3384_v60 }
  0x91   :  { %793 = vmatpush1.msra.mxu0 %v3451_v43  ;;  %738 = vmatpush1.msra.mxu1 %v3387_v62 }
  0x92   :  { %794 = vmatprep.subr.mxu0 %v3455_v45  ;;  %739 = vmatprep.subr.mxu1 %v3390_v1 }
  0x93   :  { %795 = vmatpush1.msra.mxu0 %v3460_v13  ;;  %740 = vmatpush1.msra.mxu1 %v3393_v3 }
  0x94   :  { %796 = vmatprep.subr.mxu0 %v3464_v47  ;;  %741 = vmatprep.subr.mxu1 %v3403_v9 }
  0x95   :  { %797 = vmatpush1.msra.mxu0 %v3467_v50  ;;  %742 = vmatpush1.msra.mxu1 %v3406_v14  ;;  %v231_v14 = vld [vmem:[%s4345_s4 + $0x1] sm:$0xf] }
  0x96   :  { %798 = vmatprep.subr.mxu0 %v3471_v52  ;;  %743 = vmatprep.subr.mxu1 %v3409_v18 }
  0x97   :  { %799 = vmatpush1.msra.mxu0 %v3476_v22  ;;  %744 = vmatpush1.msra.mxu1 %v3412_v23 }
  0x98   :  { %800 = vmatprep.subr.mxu0 %v3480_v54  ;;  %777 = vmatprep.mubr.f32.mxu1 %v4351_v0 }
  0x99   :  { %801 = vmatpush1.msra.mxu0 %v3483_v56  ;;  %848 = vmatprep.mubr.f32.mxu0 %v4351_v0  ;;  %v3601_v0 = vshrl.u32 %v233_v5, 7 }
  0x9a   :  { %802 = vmatprep.subr.mxu0 %v3487_v59  ;;  %883 = vmatprep.subr.mxu1 %v3271_v6 }
  0x9b   :  { %803 = vmatpush1.msra.mxu0 %v3492_v31  ;;  %4473 = vst [vmem:[#allocation34_spill] sm:$0xff] %v3601_v0  ;;  %v3604_v23 = vsub.s32 0, %v3601_v0 }
  0x9c   :  { %804 = vmatprep.subr.mxu0 %v3496_v61 }
  0x9d   :  { %805 = vmatpush1.msra.mxu0 %v3499_v63  ;;  %4474 = vst [vmem:[#allocation35_spill] sm:$0xff] %v3604_v23 }
  0x9e   :  { %806 = vmatprep.subr.mxu0 %v3503_v2 }
  0x9f   :  { %807 = vmatpush1.msra.mxu0 %v3508_v40 }
  0xa0   :  { %808 = vmatprep.subr.mxu0 %v3512_v7 }
  0xa1   :  { %809 = vmatpush1.msra.mxu0 %v3515_v11 }
  0xa2   :  { %810 = vmatprep.subr.mxu0 %v3519_v16 }
  0xa3   :  { %811 = vmatpush1.msra.mxu0 %v3524_v49 }
  0xa4   :  { %812 = vmatprep.subr.mxu0 %v3528_v20 }
  0xa5   :  { %813 = vmatpush1.msra.mxu0 %v3531_v28 }
  0xa6   :  { %814 = vmatprep.subr.mxu0 %v3535_v30  ;;  %v3612_v30 = vsub.s32 1, %v3601_v0 }
  0xa7   :  { %815 = vmatpush1.msra.mxu0 %v3540_v58 }
  0xa8   :  { %954 = vmatprep.subr.mxu0 %v3416_v25  ;;  %4476 = vst [vmem:[#allocation37_spill] sm:$0xff] %v3612_v30  ;;  %v236_v25 = vrot.slane %v231_v14, %v3604_v23  ;;  %v240_v9 = vrot.slane %v231_v14, %v3612_v30 }
  0xfe   :  { %v2803_v6 = vpop.f32.mrf.mxu0  ;;  %v319_v18 = vpop.f32.mrf.mxu1 }
 0x100   :  { %v2804_v20 = vpop.f32.mrf.mxu0  ;;  %v321_v58 = vpop.f32.mrf.mxu1 }
 0x101   :  { %v3609_v28 = vadd.f32 %v2804_v20, %v2803_v6 }
 0x103   :  { %4475 = vst [vmem:[#allocation36_spill] sm:$0xff] %v3609_v28 }
 0x104   :  { %v325_v5 = vpop.f32.mrf.mxu1 }
 0x105   :  { %v3616_v49 = vadd.f32 %v325_v5, %v236_v25 }
 0x106   :  { %v327_v3 = vpop.f32.mrf.mxu1 }
 0x107   :  { %4477 = vst [vmem:[#allocation38_spill] sm:$0xff] %v3616_v49  ;;  %v3618_v16 = vadd.f32 %v327_v3, %v240_v9  ;;  %v322_v49 = vadd.f32 %v321_v58, %v240_v9 }
 0x109   :  { %4478 = vst [vmem:[#allocation39_spill] sm:$0xff] %v3618_v16  ;;  %v331_v1 = vpop.f32.mrf.mxu1 }
 0x10a   :  { %v3620_v11 = vadd.f32 %v331_v1, %v236_v25 }
 0x10b   :  { %v333_v62 = vpop.f32.mrf.mxu1 }
 0x10c   :  { %4479 = vst [vmem:[#allocation40_spill] sm:$0xff] %v3620_v11  ;;  %v3622_v6 = vadd.f32 %v333_v62, %v240_v9 }
 0x10e   :  { %4480 = vst [vmem:[#allocation41_spill] sm:$0xff] %v3622_v6  ;;  %v337_v20 = vpop.f32.mrf.mxu1 }
 0x10f   :  { %v3624_v28 = vadd.f32 %v337_v20, %v236_v25 }
 0x110   :  { %v339_v7 = vpop.f32.mrf.mxu1 }
 0x111   :  { %4481 = vst [vmem:[#allocation42_spill] sm:$0xff] %v3624_v28  ;;  %v3626_v60 = vadd.f32 %v339_v7, %v240_v9 }
 0x113   :  { %4482 = vst [vmem:[#allocation43_spill] sm:$0xff] %v3626_v60  ;;  %v343_v23 = vpop.f32.mrf.mxu1 }
 0x114   :  { %v3628_v40 = vadd.f32 %v343_v23, %v236_v25 }
 0x115   :  { %v345_v5 = vpop.f32.mrf.mxu1 }
 0x116   :  { %4483 = vst [vmem:[#allocation44_spill] sm:$0xff] %v3628_v40  ;;  %v3630_v30 = vadd.f32 %v345_v5, %v240_v9  ;;  %v4405_v5 = vsub.s32 2, %v3601_v0 }
 0x118   :  { %4484 = vst [vmem:[#allocation45_spill] sm:$0xff] %v3630_v30  ;;  %v349_v3 = vpop.f32.mrf.mxu1 }
 0x119   :  { %v3632_v16 = vadd.f32 %v349_v3, %v236_v25 }
 0x11a   :  { %v351_v1 = vpop.f32.mrf.mxu1 }
 0x11b   :  { %4485 = vst [vmem:[#allocation46_spill] sm:$0xff] %v3632_v16  ;;  %v3634_v11 = vadd.f32 %v351_v1, %v240_v9  ;;  %v4404_v16 = vsub.s32 3, %v3601_v0 }
 0x11d   :  { %4486 = vst [vmem:[#allocation47_spill] sm:$0xff] %v3634_v11  ;;  %v355_v62 = vpop.f32.mrf.mxu1 }
 0x11e   :  { %v3636_v6 = vadd.f32 %v355_v62, %v236_v25  ;;  %v244_v62 = vrot.slane %v231_v14, %v4405_v5 }
 0x11f   :  { %v357_v20 = vpop.f32.mrf.mxu1 }
 0x120   :  { %4487 = vst [vmem:[#allocation48_spill] sm:$0xff] %v3636_v6  ;;  %v3638_v28 = vadd.f32 %v357_v20, %v240_v9  ;;  %v320_v20 = vadd.f32 %v319_v18, %v236_v25 }
 0x122   :  { %4488 = vst [vmem:[#allocation49_spill] sm:$0xff] %v3638_v28  ;;  %v361_v7 = vpop.f32.mrf.mxu1 }
 0x123   :  { %v3640_v60 = vadd.f32 %v361_v7, %v236_v25  ;;  %v248_v7 = vrot.slane %v231_v14, %v4404_v16 }
 0x124   :  { %v363_v23 = vpop.f32.mrf.mxu1 }
 0x125   :  { %4489 = vst [vmem:[#allocation50_spill] sm:$0xff] %v3640_v60  ;;  %v3642_v40 = vadd.f32 %v363_v23, %v240_v9 }
 0x127   :  { %4490 = vst [vmem:[#allocation51_spill] sm:$0xff] %v3642_v40  ;;  %v432_v30 = vpop.f32.mrf.mxu0  ;;  %v609_v3 = vpop.f32.mrf.mxu1 }
 0x128   :  { %v685_v40 = vadd.f32 %v609_v3, %v320_v20 }
 0x129   :  { %v434_v1 = vpop.f32.mrf.mxu0  ;;  %v611_v11 = vpop.f32.mrf.mxu1 }
 0x12a   :  { %v686_v60 = vadd.f32 %v611_v11, %v322_v49  ;;  %v2740_v9 = vmul.f32 -1.442695, %v685_v40 }
 0x12c   :  { %v438_v28 = vpop.f32.mrf.mxu0  ;;  %v2741_v55 = vmul.f32 -1.442695, %v686_v60 }
 0x12d   :  { %v3650_v23 = vadd.f32 %v438_v28, %v244_v62 }
 0x12e   :  { %v440_v6 = vpop.f32.mrf.mxu0  ;;  %2974 = vpow2.f32 %v2741_v55 }
 0x12f   :  { %v3652_v57 = vadd.f32 %v440_v6, %v248_v7  ;;  %2976 = vpow2.f32 %v2740_v9 }
 0x130   :  { %v444_v2 = vpop.f32.mrf.mxu0 }
 0x131   :  { %v3654_v63 = vadd.f32 %v444_v2, %v244_v62 }
 0x132   :  { %v446_v58 = vpop.f32.mrf.mxu0 }
 0x133   :  { %4491 = vst [vmem:[#allocation52_spill] sm:$0xff] %v3654_v63  ;;  %v3656_v53 = vadd.f32 %v446_v58, %v248_v7  ;;  %v4526_v63 = vmov 0.0  }
 0x134   :  { %v450_v18 = vpop.f32.mrf.mxu0 }
 0x135   :  { %4492 = vst [vmem:[#allocation53_spill] sm:$0xff] %v3656_v53  ;;  %v3658_v25 = vadd.f32 %v450_v18, %v244_v62  ;;  %v4527_v53 = vld [vmem:[#allocation33_spill] sm:$0xff] }
 0x136   :  { %v452_v14 = vpop.f32.mrf.mxu0 }
 0x137   :  { %4493 = vst [vmem:[#allocation54_spill] sm:$0xff] %v3658_v25  ;;  %v3660_v28 = vadd.f32 %v452_v14, %v248_v7 }
 0x138   :  { %v456_v11 = vpop.f32.mrf.mxu0 }
 0x139   :  { %4494 = vst [vmem:[#allocation55_spill] sm:$0xff] %v3660_v28  ;;  %v3662_v49 = vadd.f32 %v456_v11, %v244_v62  ;;  %v4525_v28 = vld [vmem:[#allocation21_spill] sm:$0xff] }
 0x13a   :  { %v458_v6 = vpop.f32.mrf.mxu0 }
 0x13b   :  { %4495 = vst [vmem:[#allocation56_spill] sm:$0xff] %v3662_v49  ;;  %v3664_v3 = vadd.f32 %v458_v6, %v248_v7  ;;  %v2975_v18 = vpop.eup %2974 }
 0x13c   :  { %v462_v60 = vpop.f32.mrf.mxu0  ;;  %v2977_v16 = vpop.eup %2976  ;;  %v698_v11 = vadd.f32 1.0, %v2975_v18 }
 0x13d   :  { %4496 = vst [vmem:[#allocation57_spill] sm:$0xff] %v3664_v3  ;;  %v3666_v2 = vadd.f32 %v462_v60, %v244_v62  ;;  %v692_v6 = vadd.f32 1.0, %v2977_v16  ;;  %v433_v3 = vadd.f32 %v432_v30, %v244_v62 }
 0x13e   :  { %v464_v40 = vpop.f32.mrf.mxu0  ;;  %2978 = vrcp.f32 %v698_v11  ;;  %v4512_v11 = vld [vmem:[#allocation26_spill] sm:$0xff] }
 0x13f   :  { %4497 = vst [vmem:[#allocation58_spill] sm:$0xff] %v3666_v2  ;;  %v3668_v20 = vadd.f32 %v464_v40, %v248_v7  ;;  %v435_v40 = vadd.f32 %v434_v1, %v248_v7  ;;  %2980 = vrcp.f32 %v692_v6  ;;  %v4513_v6 = vld [vmem:[#allocation15_spill] sm:$0xff] }
 0x140   :  { %v468_v58 = vpop.f32.mrf.mxu0 }
 0x141   :  { %4498 = vst [vmem:[#allocation59_spill] sm:$0xff] %v3668_v20  ;;  %v3670_v55 = vadd.f32 %v468_v58, %v244_v62 }
 0x142   :  { %v470_v9 = vpop.f32.mrf.mxu0 }
 0x143   :  { %4499 = vst [vmem:[#allocation60_spill] sm:$0xff] %v3670_v55  ;;  %v3672_v14 = vadd.f32 %v470_v9, %v248_v7 }
 0x144   :  { %v474_v5 = vpop.f32.mrf.mxu0 }
 0x145   :  { %4500 = vst [vmem:[#allocation61_spill] sm:$0xff] %v3672_v14  ;;  %v3674_v0 = vadd.f32 %v474_v5, %v244_v62 }
 0x146   :  { %v476_v49 = vpop.f32.mrf.mxu0 }
 0x147   :  { %4501 = vst [vmem:[#allocation62_spill] sm:$0xff] %v3674_v0  ;;  %v3676_v60 = vadd.f32 %v476_v49, %v248_v7 }
 0x148   :  { %v680_v2 = vpop.f32.mrf.mxu0 }
 0x149   :  { %4502 = vst [vmem:[#allocation63_spill] sm:$0xff] %v3676_v60  ;;  %v687_v20 = vadd.f32 %v680_v2, %v433_v3  ;;  %v4507_v3 = vld [vmem:[#allocation12_spill] sm:$0xff] }
 0x14a   :  { %v682_v58 = vpop.f32.mrf.mxu0  ;;  %v4508_v2 = vld [vmem:[#allocation24_spill] sm:$0xff] }
 0x14b   :  { %2982 = vtanh.f32 %v687_v20  ;;  %v688_v55 = vadd.f32 %v682_v58, %v435_v40  ;;  %v2979_v9 = vpop.eup %2978  ;;  %v4509_v20 = vld [vmem:[#allocation13_spill] sm:$0xff]  ;;  %v4514_v40 = vld [vmem:[#allocation27_spill] sm:$0xff]  ;;  %v4515_v58 = vld [vmem:[#allocation16_spill] sm:$0xff] }
 0x14c   :  { %v2981_v14 = vpop.eup %2980  ;;  %v708_v5 = vmul.f32 0.0, %v2979_v9  ;;  %v4516_v9 = vld [vmem:[#allocation28_spill] sm:$0xff] }
 0x14d   :  { %v2742_v25 = vmul.f32 -1.442695, %v688_v55  ;;  %v4510_v55 = vld [vmem:[#allocation25_spill] sm:$0xff]  ;;  %v4524_v60 = vld [vmem:[#allocation32_spill] sm:$0xff] }
 0x14f   :  { %2984 = vpow2.f32 %v2742_v25  ;;  %v4506_v25 = vld [vmem:[#allocation23_spill] sm:$0xff] }
 0x158   :  { %v2983_v18 = vpop.eup %2982 }
 0x159   :  { %v709_v0 = vmul.f32 %v2983_v18, %v2981_v14  ;;  %v4511_v14 = vld [vmem:[#allocation14_spill] sm:$0xff]  ;;  %v4517_v18 = vld [vmem:[#allocation17_spill] sm:$0xff] }
 0x15b   :  { %v3678_v16 = vadd.f32 %v709_v0, %v708_v5  ;;  %v4503_v0 = vld [vmem:[#allocation9_spill] sm:$0xff] }
 0x15c   :  { %v2985_v30 = vpop.eup %2984  ;;  %v4518_v5 = vld [vmem:[#allocation29_spill] sm:$0xff] }
 0x15d   :  { %v705_v62 = vadd.f32 1.0, %v2985_v30  ;;  %2986 = vtanh.f32 %v3678_v16  ;;  %v4519_v30 = vld [vmem:[#allocation18_spill] sm:$0xff] }
 0x15f   :  { %2988 = vrcp.f32 %v705_v62  ;;  %v4520_v62 = vld [vmem:[#allocation30_spill] sm:$0xff] }
 0x16a   :  { %v2987_v1 = vpop.eup %2986 }
 0x16c   :  { %v2989_v7 = vpop.eup %2988 }
 0x16d   :  { %v712_v49 = vmul.f32 %v2989_v7, %v2987_v1  ;;  %v4521_v1 = vld [vmem:[#allocation19_spill] sm:$0xff] }
 0x16e   :  { %v4522_v7 = vld [vmem:[#allocation31_spill] sm:$0xff] }
 0x16f   :  { %778 = vmatmul.mubr.f32.vlgmr.msra.gmra.mxu1 %v712_v49  ;;  %849 = vmatmul.mubr.f32.vlgmr.msra.gmra.mxu0 %v712_v49  ;;  %v4523_v49 = vld [vmem:[#allocation20_spill] sm:$0xff] }
 0x170   :  { %884 = vmatpush1.msra.mxu1 %v3273_v8  ;;  %955 = vmatpush1.msra.mxu0 %v3420_v27  ;;  %v4504_v8 = vld [vmem:[#allocation10_spill] sm:$0xff] }
 0x171   :  { %885 = vmatprep.subr.mxu1 %v3276_v10  ;;  %956 = vmatprep.subr.mxu0 %v3424_v29  ;;  %v4505_v10 = vld [vmem:[#allocation11_spill] sm:$0xff] }
 0x172   :  { %886 = vmatpush1.msra.mxu1 %v3279_v12  ;;  %957 = vmatpush1.msra.mxu0 %v3428_v32 }
 0x173   :  { %887 = vmatprep.subr.mxu1 %v3289_v15  ;;  %958 = vmatprep.subr.mxu0 %v3432_v34 }
 0x174   :  { %888 = vmatpush1.msra.mxu1 %v3292_v17  ;;  %959 = vmatpush1.msra.mxu0 %v3435_v36 }
 0x175   :  { %889 = vmatprep.subr.mxu1 %v3295_v19  ;;  %960 = vmatprep.subr.mxu0 %v3439_v4 }
 0x176   :  { %890 = vmatpush1.msra.mxu1 %v3298_v21  ;;  %961 = vmatpush1.msra.mxu0 %v3444_v38 }
 0x177   :  { %891 = vmatprep.subr.mxu1 %v3308_v24  ;;  %962 = vmatprep.subr.mxu0 %v3448_v41 }
 0x178   :  { %892 = vmatpush1.msra.mxu1 %v3311_v26  ;;  %963 = vmatpush1.msra.mxu0 %v3451_v43 }
 0x179   :  { %893 = vmatprep.subr.mxu1 %v4503_v0  ;;  %964 = vmatprep.subr.mxu0 %v3455_v45 }
 0x17a   :  { %894 = vmatpush1.msra.mxu1 %v4504_v8  ;;  %965 = vmatpush1.msra.mxu0 %v3460_v13 }
 0x17b   :  { %895 = vmatprep.subr.mxu1 %v3327_v33  ;;  %966 = vmatprep.subr.mxu0 %v3464_v47 }
 0x17c   :  { %896 = vmatpush1.msra.mxu1 %v3330_v35  ;;  %967 = vmatpush1.msra.mxu0 %v3467_v50 }
 0x17d   :  { %897 = vmatprep.subr.mxu1 %v3333_v37  ;;  %968 = vmatprep.subr.mxu0 %v3471_v52 }
 0x17e   :  { %898 = vmatpush1.msra.mxu1 %v3336_v39  ;;  %969 = vmatpush1.msra.mxu0 %v3476_v22 }
 0x17f   :  { %899 = vmatprep.subr.mxu1 %v3346_v42  ;;  %970 = vmatprep.subr.mxu0 %v3480_v54 }
 0x180   :  { %900 = vmatpush1.msra.mxu1 %v3349_v44  ;;  %971 = vmatpush1.msra.mxu0 %v3483_v56 }
 0x181   :  { %901 = vmatprep.subr.mxu1 %v3352_v46  ;;  %972 = vmatprep.subr.mxu0 %v3487_v59 }
 0x182   :  { %902 = vmatpush1.msra.mxu1 %v3355_v48  ;;  %973 = vmatpush1.msra.mxu0 %v3492_v31 }
 0x183   :  { %903 = vmatprep.subr.mxu1 %v3365_v51  ;;  %974 = vmatprep.subr.mxu0 %v3496_v61 }
 0x184   :  { %904 = vmatpush1.msra.mxu1 %v4505_v10  ;;  %975 = vmatpush1.msra.mxu0 %v4506_v25 }
 0x185   :  { %905 = vmatprep.subr.mxu1 %v4507_v3  ;;  %976 = vmatprep.subr.mxu0 %v4508_v2 }
 0x186   :  { %906 = vmatpush1.msra.mxu1 %v4509_v20  ;;  %977 = vmatpush1.msra.mxu0 %v4510_v55 }
 0x187   :  { %907 = vmatprep.subr.mxu1 %v4511_v14  ;;  %978 = vmatprep.subr.mxu0 %v4512_v11 }
 0x188   :  { %908 = vmatpush1.msra.mxu1 %v4513_v6  ;;  %979 = vmatpush1.msra.mxu0 %v4514_v40 }
 0x189   :  { %909 = vmatprep.subr.mxu1 %v4515_v58  ;;  %980 = vmatprep.subr.mxu0 %v4516_v9 }
 0x18a   :  { %910 = vmatpush1.msra.mxu1 %v4517_v18  ;;  %981 = vmatpush1.msra.mxu0 %v4518_v5  ;;  %v4528_v5 = vld [vmem:[#allocation8_spill] sm:$0xff] }
 0x18b   :  { %911 = vmatprep.subr.mxu1 %v4519_v30  ;;  %982 = vmatprep.subr.mxu0 %v4520_v62  ;;  %v4529_v30 = vld [vmem:[#allocation22_spill] sm:$0xff] }
 0x18c   :  { %912 = vmatpush1.msra.mxu1 %v4521_v1  ;;  %983 = vmatpush1.msra.mxu0 %v4522_v7  ;;  %v4530_v1 = vld [vmem:[#allocation38_spill] sm:$0xff] }
 0x18d   :  { %913 = vmatprep.subr.mxu1 %v4523_v49  ;;  %984 = vmatprep.subr.mxu0 %v4524_v60  ;;  %v4531_v49 = vld [vmem:[#allocation39_spill] sm:$0xff] }
 0x18e   :  { %914 = vmatpush1.msra.mxu1 %v4525_v28  ;;  %947 = vmatprep.mubr.f32.mxu1 %v4526_v63 }
 0x18f   :  { %985 = vmatpush1.msra.mxu0 %v4527_v53  ;;  %1018 = vmatprep.mubr.f32.mxu0 %v4526_v63 }
 0x190   :  { %1053 = vmatprep.subr.mxu1 %v4528_v5  ;;  %1124 = vmatprep.subr.mxu0 %v4529_v30 }
 0x22f   :  { %v779_v62 = vpop.f32.mrf.mxu1  ;;  %v850_v60 = vpop.f32.mrf.mxu0 }
 0x230   :  { %v855_v18 = vadd.f32 %v779_v62, %v4530_v1  ;;  %v857_v63 = vadd.f32 %v850_v60, %v3650_v23  ;;  %v3755_v60 = vld [vmem:[#allocation2 + $0x728] sm:$0xff] }
 0x231   :  { %v781_v7 = vpop.f32.mrf.mxu1  ;;  %v852_v40 = vpop.f32.mrf.mxu0 }
 0x232   :  { %v2743_v9 = vmul.f32 -1.442695, %v855_v18  ;;  %v856_v58 = vadd.f32 %v781_v7, %v4531_v49  ;;  %v858_v53 = vadd.f32 %v852_v40, %v3652_v57 }
 0x234   :  { %2990 = vpow2.f32 %v2743_v9  ;;  %v2744_v28 = vmul.f32 -1.442695, %v856_v58  ;;  %v2745_v6 = vmul.f32 -1.442695, %v858_v53 }
 0x236   :  { %2992 = vpow2.f32 %v2744_v28 }
 0x237   :  { %2994 = vtanh.f32 %v857_v63 }
 0x238   :  { %2996 = vpow2.f32 %v2745_v6  ;;  %v4551_v6 = vld [vmem:[#allocation41_spill] sm:$0xff] }
 0x241   :  { %v2991_v5 = vpop.eup %2990 }
 0x242   :  { %v862_v11 = vadd.f32 1.0, %v2991_v5 }
 0x243   :  { %v2993_v30 = vpop.eup %2992 }
 0x244   :  { %2998 = vrcp.f32 %v862_v11  ;;  %v868_v62 = vadd.f32 1.0, %v2993_v30  ;;  %v2995_v18 = vpop.eup %2994  ;;  %v3759_v11 = vld [vmem:[#allocation2 + $0x6b8] sm:$0xff] }
 0x245   :  { %v2997_v1 = vpop.eup %2996 }
 0x246   :  { %3000 = vrcp.f32 %v868_v62  ;;  %v875_v28 = vadd.f32 1.0, %v2997_v1 }
 0x248   :  { %3002 = vrcp.f32 %v875_v28 }
 0x251   :  { %v2999_v9 = vpop.eup %2998 }
 0x252   :  { %v879_v7 = vmul.f32 %v2999_v9, %v2995_v18  ;;  %v4552_v18 = vld [vmem:[#allocation53_spill] sm:$0xff]  ;;  %v4553_v9 = vld [vmem:[#allocation52_spill] sm:$0xff] }
 0x253   :  { %v3001_v58 = vpop.eup %3000 }
 0x254   :  { %v878_v49 = vmul.f32 %v3001_v58, %v3678_v16  ;;  %v3823_v16 = vld [vmem:[#allocation2 + $0x730] sm:$0xff] }
 0x255   :  { %v3003_v53 = vpop.eup %3002  ;;  %4548 = vst [vmem:[#allocation9_spill] sm:$0xff] %v3823_v16 }
 0x256   :  { %v3752_v57 = vadd.f32 %v879_v7, %v878_v49 }
 0x258   :  { %3004 = vtanh.f32 %v3752_v57 }
 0x265   :  { %v3005_v63 = vpop.eup %3004 }
 0x266   :  { %v882_v23 = vmul.f32 %v3005_v63, %v3003_v53 }
 0x268   :  { %948 = vmatmul.mubr.f32.vlgmr.msra.gmra.mxu1 %v882_v23  ;;  %1019 = vmatmul.mubr.f32.vlgmr.msra.gmra.mxu0 %v882_v23 }
 0x269   :  { %1054 = vmatpush1.msra.mxu1 %v3755_v60  ;;  %1125 = vmatpush1.msra.mxu0 %v3420_v27 }
 0x26a   :  { %1055 = vmatprep.subr.mxu1 %v3759_v11  ;;  %1126 = vmatprep.subr.mxu0 %v3424_v29 }
 0x26b   :  { %1056 = vmatpush1.msra.mxu1 %v3279_v12  ;;  %1127 = vmatpush1.msra.mxu0 %v3428_v32  ;;  %v4532_v12 = vld [vmem:[#allocation26_spill] sm:$0xff] }
 0x26c   :  { %1057 = vmatprep.subr.mxu1 %v3289_v15  ;;  %1128 = vmatprep.subr.mxu0 %v3432_v34  ;;  %v4533_v15 = vld [vmem:[#allocation15_spill] sm:$0xff] }
 0x26d   :  { %1058 = vmatpush1.msra.mxu1 %v3292_v17  ;;  %1129 = vmatpush1.msra.mxu0 %v3435_v36  ;;  %v4534_v17 = vld [vmem:[#allocation27_spill] sm:$0xff] }
 0x26e   :  { %1059 = vmatprep.subr.mxu1 %v3295_v19  ;;  %1130 = vmatprep.subr.mxu0 %v3439_v4  ;;  %v4535_v19 = vld [vmem:[#allocation16_spill] sm:$0xff] }
 0x26f   :  { %1060 = vmatpush1.msra.mxu1 %v3298_v21  ;;  %1131 = vmatpush1.msra.mxu0 %v3444_v38  ;;  %v4536_v21 = vld [vmem:[#allocation28_spill] sm:$0xff] }
 0x270   :  { %1061 = vmatprep.subr.mxu1 %v3308_v24  ;;  %1132 = vmatprep.subr.mxu0 %v3448_v41  ;;  %v4537_v24 = vld [vmem:[#allocation17_spill] sm:$0xff] }
 0x271   :  { %1062 = vmatpush1.msra.mxu1 %v3311_v26  ;;  %1133 = vmatpush1.msra.mxu0 %v3451_v43  ;;  %v4538_v26 = vld [vmem:[#allocation29_spill] sm:$0xff] }
 0x272   :  { %1063 = vmatprep.subr.mxu1 %v4503_v0  ;;  %1134 = vmatprep.subr.mxu0 %v3455_v45  ;;  %v4549_v0 = vld [vmem:[#allocation22_spill] sm:$0xff] }
 0x273   :  { %1064 = vmatpush1.msra.mxu1 %v4504_v8  ;;  %1135 = vmatpush1.msra.mxu0 %v3460_v13 }
 0x274   :  { %1065 = vmatprep.subr.mxu1 %v3327_v33  ;;  %1136 = vmatprep.subr.mxu0 %v3464_v47  ;;  %v4539_v33 = vld [vmem:[#allocation18_spill] sm:$0xff] }
 0x275   :  { %1066 = vmatpush1.msra.mxu1 %v3330_v35  ;;  %1137 = vmatpush1.msra.mxu0 %v3467_v50  ;;  %v4540_v35 = vld [vmem:[#allocation30_spill] sm:$0xff] }
 0x276   :  { %1067 = vmatprep.subr.mxu1 %v3333_v37  ;;  %1138 = vmatprep.subr.mxu0 %v3471_v52  ;;  %v4541_v37 = vld [vmem:[#allocation19_spill] sm:$0xff] }
 0x277   :  { %1068 = vmatpush1.msra.mxu1 %v3336_v39  ;;  %1139 = vmatpush1.msra.mxu0 %v3476_v22  ;;  %v4542_v39 = vld [vmem:[#allocation31_spill] sm:$0xff] }
 0x278   :  { %1069 = vmatprep.subr.mxu1 %v3346_v42  ;;  %1140 = vmatprep.subr.mxu0 %v3480_v54  ;;  %v4543_v42 = vld [vmem:[#allocation20_spill] sm:$0xff] }
 0x279   :  { %1070 = vmatpush1.msra.mxu1 %v3349_v44  ;;  %1141 = vmatpush1.msra.mxu0 %v3483_v56  ;;  %v4544_v44 = vld [vmem:[#allocation32_spill] sm:$0xff] }
 0x27a   :  { %1071 = vmatprep.subr.mxu1 %v3352_v46  ;;  %1142 = vmatprep.subr.mxu0 %v3487_v59  ;;  %v4545_v46 = vld [vmem:[#allocation21_spill] sm:$0xff] }
 0x27b   :  { %1072 = vmatpush1.msra.mxu1 %v3355_v48  ;;  %1143 = vmatpush1.msra.mxu0 %v3492_v31  ;;  %v4546_v48 = vmov 0.0  }
 0x27c   :  { %1073 = vmatprep.subr.mxu1 %v3365_v51  ;;  %1144 = vmatprep.subr.mxu0 %v3496_v61  ;;  %v4547_v51 = vld [vmem:[#allocation33_spill] sm:$0xff] }
 0x27d   :  { %1074 = vmatpush1.msra.mxu1 %v4505_v10  ;;  %1145 = vmatpush1.msra.mxu0 %v4506_v25  ;;  %v4550_v10 = vld [vmem:[#allocation40_spill] sm:$0xff] }
 0x27e   :  { %1075 = vmatprep.subr.mxu1 %v4507_v3  ;;  %1146 = vmatprep.subr.mxu0 %v4508_v2 }
 0x27f   :  { %1076 = vmatpush1.msra.mxu1 %v4509_v20  ;;  %1147 = vmatpush1.msra.mxu0 %v4510_v55 }
 0x280   :  { %1077 = vmatprep.subr.mxu1 %v4511_v14  ;;  %1148 = vmatprep.subr.mxu0 %v4532_v12 }
 0x281   :  { %1078 = vmatpush1.msra.mxu1 %v4533_v15  ;;  %1149 = vmatpush1.msra.mxu0 %v4534_v17 }
 0x282   :  { %1079 = vmatprep.subr.mxu1 %v4535_v19  ;;  %1150 = vmatprep.subr.mxu0 %v4536_v21 }
 0x283   :  { %1080 = vmatpush1.msra.mxu1 %v4537_v24  ;;  %1151 = vmatpush1.msra.mxu0 %v4538_v26 }
 0x284   :  { %1081 = vmatprep.subr.mxu1 %v4539_v33  ;;  %1152 = vmatprep.subr.mxu0 %v4540_v35 }
 0x285   :  { %1082 = vmatpush1.msra.mxu1 %v4541_v37  ;;  %1153 = vmatpush1.msra.mxu0 %v4542_v39 }
 0x286   :  { %1083 = vmatprep.subr.mxu1 %v4543_v42  ;;  %1154 = vmatprep.subr.mxu0 %v4544_v44 }
 0x287   :  { %1084 = vmatpush1.msra.mxu1 %v4545_v46  ;;  %1117 = vmatprep.mubr.f32.mxu1 %v4546_v48 }
 0x288   :  { %1155 = vmatpush1.msra.mxu0 %v4547_v51  ;;  %1188 = vmatprep.mubr.f32.mxu0 %v4546_v48 }
 0x289   :  { %1223 = vmatprep.subr.mxu1 %v3823_v16  ;;  %1294 = vmatprep.subr.mxu0 %v4549_v0 }
 0x328   :  { %v949_v8 = vpop.f32.mrf.mxu1  ;;  %v1020_v30 = vpop.f32.mrf.mxu0 }
 0x329   :  { %v1025_v3 = vadd.f32 %v949_v8, %v4550_v10  ;;  %v1027_v7 = vadd.f32 %v1020_v30, %v4553_v9  ;;  %v4566_v9 = vld [vmem:[#allocation54_spill] sm:$0xff] }
 0x32a   :  { %v951_v20 = vpop.f32.mrf.mxu1  ;;  %v1022_v62 = vpop.f32.mrf.mxu0 }
 0x32b   :  { %v2746_v14 = vmul.f32 -1.442695, %v1025_v3  ;;  %v1026_v40 = vadd.f32 %v951_v20, %v4551_v6  ;;  %v1028_v1 = vadd.f32 %v1022_v62, %v4552_v18  ;;  %v3839_v3 = vld [vmem:[#allocation2 + $0x6b0] sm:$0xff]  ;;  %v3847_v20 = vld [vmem:[#allocation2 + $0x638] sm:$0xff] }
 0x32c   :  { %v4565_v18 = vld [vmem:[#allocation55_spill] sm:$0xff] }
 0x32d   :  { %3006 = vpow2.f32 %v2746_v14  ;;  %v2747_v5 = vmul.f32 -1.442695, %v1026_v40  ;;  %v2748_v58 = vmul.f32 -1.442695, %v1028_v1  ;;  %v4564_v40 = vld [vmem:[#allocation43_spill] sm:$0xff] }
 0x32f   :  { %3008 = vpow2.f32 %v2747_v5 }
 0x330   :  { %3010 = vtanh.f32 %v1027_v7 }
 0x331   :  { %3012 = vpow2.f32 %v2748_v58 }
 0x33a   :  { %v3007_v28 = vpop.eup %3006 }
 0x33b   :  { %v1032_v49 = vadd.f32 1.0, %v3007_v28 }
 0x33c   :  { %v3009_v53 = vpop.eup %3008 }
 0x33d   :  { %3014 = vrcp.f32 %v1032_v49  ;;  %v1038_v63 = vadd.f32 1.0, %v3009_v53  ;;  %v3011_v23 = vpop.eup %3010 }
 0x33e   :  { %v3013_v15 = vpop.eup %3012 }
 0x33f   :  { %3016 = vrcp.f32 %v1038_v63  ;;  %v1045_v37 = vadd.f32 1.0, %v3013_v15 }
 0x341   :  { %3018 = vrcp.f32 %v1045_v37 }
 0x34a   :  { %v3015_v19 = vpop.eup %3014 }
 0x34b   :  { %v1049_v24 = vmul.f32 %v3015_v19, %v3011_v23 }
 0x34c   :  { %v3017_v33 = vpop.eup %3016 }
 0x34d   :  { %v1048_v42 = vmul.f32 %v3017_v33, %v3752_v57  ;;  %v3843_v57 = vld [vmem:[#allocation2 + $0x640] sm:$0xff] }
 0x34e   :  { %v3019_v0 = vpop.eup %3018 }
 0x34f   :  { %v3832_v46 = vadd.f32 %v1049_v24, %v1048_v42 }
 0x351   :  { %3020 = vtanh.f32 %v3832_v46 }
 0x35e   :  { %v3021_v8 = vpop.eup %3020 }
 0x35f   :  { %v1052_v10 = vmul.f32 %v3021_v8, %v3019_v0 }
 0x361   :  { %1118 = vmatmul.mubr.f32.vlgmr.msra.gmra.mxu1 %v1052_v10  ;;  %1189 = vmatmul.mubr.f32.vlgmr.msra.gmra.mxu0 %v1052_v10 }
 0x362   :  { %1224 = vmatpush1.msra.mxu1 %v3755_v60  ;;  %1295 = vmatpush1.msra.mxu0 %v3420_v27  ;;  %v3851_v27 = vld [vmem:[#allocation2 + $0x5c8] sm:$0xff] }
 0x363   :  { %1225 = vmatprep.subr.mxu1 %v3759_v11  ;;  %1296 = vmatprep.subr.mxu0 %v3424_v29  ;;  %v3855_v29 = vld [vmem:[#allocation2 + $0x5c0] sm:$0xff] }
 0x364   :  { %1226 = vmatpush1.msra.mxu1 %v3839_v3  ;;  %1297 = vmatpush1.msra.mxu0 %v3428_v32  ;;  %v3859_v32 = vld [vmem:[#allocation2 + $0x550] sm:$0xff] }
 0x365   :  { %1227 = vmatprep.subr.mxu1 %v3843_v57  ;;  %1298 = vmatprep.subr.mxu0 %v3432_v34  ;;  %v3863_v34 = vld [vmem:[#allocation2 + $0x548] sm:$0xff] }
 0x366   :  { %1228 = vmatpush1.msra.mxu1 %v3847_v20  ;;  %1299 = vmatpush1.msra.mxu0 %v3435_v36  ;;  %v3867_v36 = vld [vmem:[#allocation2 + $0x4d8] sm:$0xff] }
 0x367   :  { %1229 = vmatprep.subr.mxu1 %v3851_v27  ;;  %1300 = vmatprep.subr.mxu0 %v3439_v4  ;;  %v3871_v4 = vld [vmem:[#allocation2 + $0x4d0] sm:$0xff] }
 0x368   :  { %1230 = vmatpush1.msra.mxu1 %v3855_v29  ;;  %1301 = vmatpush1.msra.mxu0 %v3444_v38  ;;  %v3875_v38 = vld [vmem:[#allocation2 + $0x460] sm:$0xff] }
 0x369   :  { %1231 = vmatprep.subr.mxu1 %v3859_v32  ;;  %1302 = vmatprep.subr.mxu0 %v3448_v41  ;;  %v3879_v41 = vld [vmem:[#allocation2 + $0x458] sm:$0xff] }
 0x36a   :  { %1232 = vmatpush1.msra.mxu1 %v3863_v34  ;;  %1303 = vmatpush1.msra.mxu0 %v3451_v43  ;;  %v3883_v43 = vld [vmem:[#allocation2 + $0x3e8] sm:$0xff] }
 0x36b   :  { %1233 = vmatprep.subr.mxu1 %v3867_v36  ;;  %1304 = vmatprep.subr.mxu0 %v3455_v45  ;;  %v3887_v45 = vld [vmem:[#allocation2 + $0x3e0] sm:$0xff] }
 0x36c   :  { %1234 = vmatpush1.msra.mxu1 %v3871_v4  ;;  %1305 = vmatpush1.msra.mxu0 %v3460_v13  ;;  %v3891_v13 = vld [vmem:[#allocation2 + $0x370] sm:$0xff] }
 0x36d   :  { %1235 = vmatprep.subr.mxu1 %v3875_v38  ;;  %1306 = vmatprep.subr.mxu0 %v3464_v47  ;;  %v3895_v47 = vld [vmem:[#allocation2 + $0x368] sm:$0xff] }
 0x36e   :  { %1236 = vmatpush1.msra.mxu1 %v3879_v41  ;;  %1307 = vmatpush1.msra.mxu0 %v3467_v50  ;;  %v3899_v50 = vld [vmem:[#allocation2 + $0x2f8] sm:$0xff] }
 0x36f   :  { %1237 = vmatprep.subr.mxu1 %v3883_v43  ;;  %1308 = vmatprep.subr.mxu0 %v3471_v52  ;;  %v3903_v52 = vld [vmem:[#allocation2 + $0x2f0] sm:$0xff] }
 0x370   :  { %1238 = vmatpush1.msra.mxu1 %v3887_v45  ;;  %1309 = vmatpush1.msra.mxu0 %v3476_v22  ;;  %v3907_v22 = vld [vmem:[#allocation2 + $0x280] sm:$0xff] }
 0x371   :  { %1239 = vmatprep.subr.mxu1 %v3891_v13  ;;  %1310 = vmatprep.subr.mxu0 %v3480_v54  ;;  %v3911_v54 = vld [vmem:[#allocation2 + $0x278] sm:$0xff] }
 0x372   :  { %1240 = vmatpush1.msra.mxu1 %v3895_v47  ;;  %1311 = vmatpush1.msra.mxu0 %v3483_v56  ;;  %v3915_v56 = vld [vmem:[#allocation2 + $0x208] sm:$0xff] }
 0x373   :  { %1241 = vmatprep.subr.mxu1 %v3899_v50  ;;  %1312 = vmatprep.subr.mxu0 %v3487_v59  ;;  %v3919_v59 = vld [vmem:[#allocation2 + $0x200] sm:$0xff] }
 0x374   :  { %1242 = vmatpush1.msra.mxu1 %v3903_v52  ;;  %1313 = vmatpush1.msra.mxu0 %v3492_v31  ;;  %v3923_v31 = vld [vmem:[#allocation2 + $0x190] sm:$0xff] }
 0x375   :  { %1243 = vmatprep.subr.mxu1 %v3907_v22  ;;  %1314 = vmatprep.subr.mxu0 %v3496_v61  ;;  %4554 = vst [vmem:[#allocation10_spill] sm:$0xff] %v3923_v31  ;;  %v3927_v61 = vld [vmem:[#allocation2 + $0x188] sm:$0xff] }
 0x376   :  { %1244 = vmatpush1.msra.mxu1 %v3911_v54  ;;  %1315 = vmatpush1.msra.mxu0 %v4506_v25  ;;  %4555 = vst [vmem:[#allocation11_spill] sm:$0xff] %v3927_v61  ;;  %v3931_v25 = vld [vmem:[#allocation2 + $0x118] sm:$0xff] }
 0x377   :  { %1245 = vmatprep.subr.mxu1 %v3915_v56  ;;  %1316 = vmatprep.subr.mxu0 %v4508_v2  ;;  %4556 = vst [vmem:[#allocation23_spill] sm:$0xff] %v3931_v25  ;;  %v3935_v2 = vld [vmem:[#allocation2 + $0x110] sm:$0xff] }
 0x378   :  { %1246 = vmatpush1.msra.mxu1 %v3919_v59  ;;  %1317 = vmatpush1.msra.mxu0 %v4510_v55  ;;  %4557 = vst [vmem:[#allocation12_spill] sm:$0xff] %v3935_v2  ;;  %v3939_v55 = vld [vmem:[#allocation2 + $0xa0] sm:$0xff] }
 0x379   :  { %1247 = vmatprep.subr.mxu1 %v3923_v31  ;;  %1318 = vmatprep.subr.mxu0 %v4532_v12  ;;  %4558 = vst [vmem:[#allocation24_spill] sm:$0xff] %v3939_v55  ;;  %v3943_v12 = vld [vmem:[#allocation2 + $0x98] sm:$0xff] }
 0x37a   :  { %1248 = vmatpush1.msra.mxu1 %v3927_v61  ;;  %1319 = vmatpush1.msra.mxu0 %v4534_v17  ;;  %4559 = vst [vmem:[#allocation13_spill] sm:$0xff] %v3943_v12  ;;  %v3947_v17 = vld [vmem:[#allocation2 + $0x28] sm:$0xff] }
 0x37b   :  { %1249 = vmatprep.subr.mxu1 %v3931_v25  ;;  %1320 = vmatprep.subr.mxu0 %v4536_v21  ;;  %4560 = vst [vmem:[#allocation25_spill] sm:$0xff] %v3947_v17  ;;  %v3951_v21 = vld [vmem:[#allocation2 + $0x20] sm:$0xff] }
 0x37c   :  { %1250 = vmatpush1.msra.mxu1 %v3935_v2  ;;  %1321 = vmatpush1.msra.mxu0 %v4538_v26  ;;  %4561 = vst [vmem:[#allocation14_spill] sm:$0xff] %v3951_v21  ;;  %v3958_v26 = vld [vmem:[#allocation2 + $0x740] sm:$0xff] }
 0x37d   :  { %1251 = vmatprep.subr.mxu1 %v3939_v55  ;;  %1322 = vmatprep.subr.mxu0 %v4540_v35  ;;  %4562 = vst [vmem:[#allocation8_spill] sm:$0xff] %v3958_v26 }
 0x37e   :  { %1252 = vmatpush1.msra.mxu1 %v3943_v12  ;;  %1323 = vmatpush1.msra.mxu0 %v4542_v39  ;;  %v4563_v39 = vld [vmem:[#allocation42_spill] sm:$0xff] }
 0x37f   :  { %1253 = vmatprep.subr.mxu1 %v3947_v17  ;;  %1324 = vmatprep.subr.mxu0 %v4544_v44 }
 0x380   :  { %1254 = vmatpush1.msra.mxu1 %v3951_v21  ;;  %1287 = vmatprep.mubr.f32.mxu1 %v4546_v48 }
 0x381   :  { %1325 = vmatpush1.msra.mxu0 %v4547_v51  ;;  %1358 = vmatprep.mubr.f32.mxu0 %v4546_v48 }
 0x382   :  { %1393 = vmatprep.subr.mxu1 %v3823_v16  ;;  %1464 = vmatprep.subr.mxu0 %v3958_v26 }
 0x421   :  { %v1119_v35 = vpop.f32.mrf.mxu1  ;;  %v1190_v5 = vpop.f32.mrf.mxu0 }
 0x422   :  { %v1195_v14 = vadd.f32 %v1119_v35, %v4563_v39  ;;  %v1197_v7 = vadd.f32 %v1190_v5, %v4566_v9  ;;  %v3970_v39 = vld [vmem:[#allocation2 + $0x738] sm:$0xff]  ;;  %v3998_v5 = vld [vmem:[#allocation2 + $0x560] sm:$0xff]  ;;  %v4018_v9 = vld [vmem:[#allocation2 + $0x468] sm:$0xff] }
 0x423   :  { %v1121_v44 = vpop.f32.mrf.mxu1  ;;  %v1192_v51 = vpop.f32.mrf.mxu0 }
 0x424   :  { %v2749_v6 = vmul.f32 -1.442695, %v1195_v14  ;;  %v1196_v30 = vadd.f32 %v1121_v44, %v4564_v40  ;;  %v1198_v1 = vadd.f32 %v1192_v51, %v4565_v18  ;;  %v3974_v14 = vld [vmem:[#allocation2 + $0x6c8] sm:$0xff]  ;;  %v3982_v44 = vld [vmem:[#allocation2 + $0x650] sm:$0xff]  ;;  %v3990_v40 = vld [vmem:[#allocation2 + $0x5d8] sm:$0xff] }
 0x425   :  { %v4006_v51 = vld [vmem:[#allocation2 + $0x4e8] sm:$0xff]  ;;  %v4010_v18 = vld [vmem:[#allocation2 + $0x4e0] sm:$0xff] }
 0x426   :  { %3022 = vpow2.f32 %v2749_v6  ;;  %v2750_v62 = vmul.f32 -1.442695, %v1196_v30  ;;  %v2751_v58 = vmul.f32 -1.442695, %v1198_v1  ;;  %v3986_v6 = vld [vmem:[#allocation2 + $0x648] sm:$0xff]  ;;  %v3994_v30 = vld [vmem:[#allocation2 + $0x5d0] sm:$0xff] }
 0x427   :  { %v4014_v1 = vld [vmem:[#allocation2 + $0x470] sm:$0xff] }
 0x428   :  { %3024 = vpow2.f32 %v2750_v62  ;;  %v4002_v62 = vld [vmem:[#allocation2 + $0x558] sm:$0xff] }
 0x429   :  { %3026 = vtanh.f32 %v1197_v7  ;;  %v4022_v7 = vld [vmem:[#allocation2 + $0x3f8] sm:$0xff] }
 0x42a   :  { %3028 = vpow2.f32 %v2751_v58  ;;  %v4026_v58 = vld [vmem:[#allocation2 + $0x3f0] sm:$0xff] }
 0x433   :  { %v3023_v28 = vpop.eup %3022 }
 0x434   :  { %v1202_v49 = vadd.f32 1.0, %v3023_v28  ;;  %v4030_v28 = vld [vmem:[#allocation2 + $0x380] sm:$0xff] }
 0x435   :  { %v3025_v53 = vpop.eup %3024 }
 0x436   :  { %3030 = vrcp.f32 %v1202_v49  ;;  %v1208_v63 = vadd.f32 1.0, %v3025_v53  ;;  %v3027_v23 = vpop.eup %3026  ;;  %v4034_v49 = vld [vmem:[#allocation2 + $0x378] sm:$0xff]  ;;  %v4038_v53 = vld [vmem:[#allocation2 + $0x308] sm:$0xff] }
 0x437   :  { %v3029_v15 = vpop.eup %3028 }
 0x438   :  { %3032 = vrcp.f32 %v1208_v63  ;;  %v1215_v37 = vadd.f32 1.0, %v3029_v15  ;;  %v4042_v63 = vld [vmem:[#allocation2 + $0x300] sm:$0xff]  ;;  %v4050_v15 = vld [vmem:[#allocation2 + $0x288] sm:$0xff] }
 0x43a   :  { %3034 = vrcp.f32 %v1215_v37  ;;  %v4066_v37 = vld [vmem:[#allocation2 + $0x198] sm:$0xff] }
 0x43b   :  { %4569 = vst [vmem:[#allocation26_spill] sm:$0xff] %v4066_v37 }
 0x443   :  { %v3031_v19 = vpop.eup %3030 }
 0x444   :  { %v1219_v24 = vmul.f32 %v3031_v19, %v3027_v23  ;;  %v4046_v23 = vld [vmem:[#allocation2 + $0x290] sm:$0xff]  ;;  %v4054_v19 = vld [vmem:[#allocation2 + $0x218] sm:$0xff] }
 0x445   :  { %v3033_v33 = vpop.eup %3032 }
 0x446   :  { %v1218_v42 = vmul.f32 %v3033_v33, %v3832_v46  ;;  %v3978_v46 = vld [vmem:[#allocation2 + $0x6c0] sm:$0xff] }
 0x447   :  { %v3035_v8 = vpop.eup %3034  ;;  %v4062_v33 = vld [vmem:[#allocation2 + $0x1a0] sm:$0xff] }
 0x448   :  { %v3966_v0 = vadd.f32 %v1219_v24, %v1218_v42  ;;  %v4058_v24 = vld [vmem:[#allocation2 + $0x210] sm:$0xff]  ;;  %4568 = vst [vmem:[#allocation39_spill] sm:$0xff] %v4062_v33  ;;  %v4070_v42 = vld [vmem:[#allocation2 + $0x128] sm:$0xff] }
 0x449   :  { %4567 = vst [vmem:[#allocation38_spill] sm:$0xff] %v4058_v24  ;;  %4570 = vst [vmem:[#allocation15_spill] sm:$0xff] %v4070_v42 }
 0x44a   :  { %3036 = vtanh.f32 %v3966_v0 }
 0x457   :  { %v3037_v10 = vpop.eup %3036 }
 0x458   :  { %v1222_v35 = vmul.f32 %v3037_v10, %v3035_v8  ;;  %v4074_v8 = vld [vmem:[#allocation2 + $0x120] sm:$0xff]  ;;  %v4078_v10 = vld [vmem:[#allocation2 + $0xb0] sm:$0xff] }
 0x459   :  { %4571 = vst [vmem:[#allocation27_spill] sm:$0xff] %v4074_v8  ;;  %4572 = vst [vmem:[#allocation16_spill] sm:$0xff] %v4078_v10 }
 0x45a   :  { %1288 = vmatmul.mubr.f32.vlgmr.msra.gmra.mxu1 %v1222_v35  ;;  %1359 = vmatmul.mubr.f32.vlgmr.msra.gmra.mxu0 %v1222_v35  ;;  %v4082_v35 = vld [vmem:[#allocation2 + $0xa8] sm:$0xff] }
 0x45b   :  { %1394 = vmatpush1.msra.mxu1 %v3755_v60  ;;  %1465 = vmatpush1.msra.mxu0 %v3970_v39  ;;  %4573 = vst [vmem:[#allocation28_spill] sm:$0xff] %v4082_v35 }
 0x45c   :  { %1395 = vmatprep.subr.mxu1 %v3759_v11  ;;  %1466 = vmatprep.subr.mxu0 %v3974_v14 }
 0x45d   :  { %1396 = vmatpush1.msra.mxu1 %v3839_v3  ;;  %1467 = vmatpush1.msra.mxu0 %v3978_v46 }
 0x45e   :  { %1397 = vmatprep.subr.mxu1 %v3843_v57  ;;  %1468 = vmatprep.subr.mxu0 %v3982_v44 }
 0x45f   :  { %1398 = vmatpush1.msra.mxu1 %v3847_v20  ;;  %1469 = vmatpush1.msra.mxu0 %v3986_v6 }
 0x460   :  { %1399 = vmatprep.subr.mxu1 %v3851_v27  ;;  %1470 = vmatprep.subr.mxu0 %v3990_v40 }
 0x461   :  { %1400 = vmatpush1.msra.mxu1 %v3855_v29  ;;  %1471 = vmatpush1.msra.mxu0 %v3994_v30 }
 0x462   :  { %1401 = vmatprep.subr.mxu1 %v3859_v32  ;;  %1472 = vmatprep.subr.mxu0 %v3998_v5 }
 0x463   :  { %1402 = vmatpush1.msra.mxu1 %v3863_v34  ;;  %1473 = vmatpush1.msra.mxu0 %v4002_v62 }
 0x464   :  { %1403 = vmatprep.subr.mxu1 %v3867_v36  ;;  %1474 = vmatprep.subr.mxu0 %v4006_v51 }
 0x465   :  { %1404 = vmatpush1.msra.mxu1 %v3871_v4  ;;  %1475 = vmatpush1.msra.mxu0 %v4010_v18 }
 0x466   :  { %1405 = vmatprep.subr.mxu1 %v3875_v38  ;;  %1476 = vmatprep.subr.mxu0 %v4014_v1 }
 0x467   :  { %1406 = vmatpush1.msra.mxu1 %v3879_v41  ;;  %1477 = vmatpush1.msra.mxu0 %v4018_v9 }
 0x468   :  { %1407 = vmatprep.subr.mxu1 %v3883_v43  ;;  %1478 = vmatprep.subr.mxu0 %v4022_v7 }
 0x469   :  { %1408 = vmatpush1.msra.mxu1 %v3887_v45  ;;  %1479 = vmatpush1.msra.mxu0 %v4026_v58 }
 0x46a   :  { %1409 = vmatprep.subr.mxu1 %v3891_v13  ;;  %1480 = vmatprep.subr.mxu0 %v4030_v28 }
 0x46b   :  { %1410 = vmatpush1.msra.mxu1 %v3895_v47  ;;  %1481 = vmatpush1.msra.mxu0 %v4034_v49 }
 0x46c   :  { %1411 = vmatprep.subr.mxu1 %v3899_v50  ;;  %1482 = vmatprep.subr.mxu0 %v4038_v53 }
 0x46d   :  { %1412 = vmatpush1.msra.mxu1 %v3903_v52  ;;  %1483 = vmatpush1.msra.mxu0 %v4042_v63 }
 0x46e   :  { %1413 = vmatprep.subr.mxu1 %v3907_v22  ;;  %1484 = vmatprep.subr.mxu0 %v4046_v23 }
 0x46f   :  { %1414 = vmatpush1.msra.mxu1 %v3911_v54  ;;  %1485 = vmatpush1.msra.mxu0 %v4050_v15 }
 0x470   :  { %1415 = vmatprep.subr.mxu1 %v3915_v56  ;;  %1486 = vmatprep.subr.mxu0 %v4054_v19 }
 0x471   :  { %1416 = vmatpush1.msra.mxu1 %v3919_v59  ;;  %1487 = vmatpush1.msra.mxu0 %v4058_v24 }
 0x472   :  { %1417 = vmatprep.subr.mxu1 %v3923_v31  ;;  %1488 = vmatprep.subr.mxu0 %v4062_v33  ;;  %v4579_v33 = vld [vmem:[#allocation56_spill] sm:$0xff] }
 0x473   :  { %1418 = vmatpush1.msra.mxu1 %v3927_v61  ;;  %1489 = vmatpush1.msra.mxu0 %v4066_v37  ;;  %v4578_v61 = vld [vmem:[#allocation57_spill] sm:$0xff] }
 0x474   :  { %1419 = vmatprep.subr.mxu1 %v3931_v25  ;;  %1490 = vmatprep.subr.mxu0 %v4070_v42  ;;  %v4086_v42 = vld [vmem:[#allocation2 + $0x38] sm:$0xff] }
 0x475   :  { %1420 = vmatpush1.msra.mxu1 %v3935_v2  ;;  %1491 = vmatpush1.msra.mxu0 %v4074_v8  ;;  %4574 = vst [vmem:[#allocation17_spill] sm:$0xff] %v4086_v42 }
 0x476   :  { %1421 = vmatprep.subr.mxu1 %v3939_v55  ;;  %1492 = vmatprep.subr.mxu0 %v4078_v10  ;;  %v4091_v55 = vld [vmem:[#allocation2 + $0x30] sm:$0xff] }
 0x477   :  { %1422 = vmatpush1.msra.mxu1 %v3943_v12  ;;  %1493 = vmatpush1.msra.mxu0 %v4082_v35  ;;  %4575 = vst [vmem:[#allocation29_spill] sm:$0xff] %v4091_v55 }
 0x478   :  { %1423 = vmatprep.subr.mxu1 %v3947_v17  ;;  %1494 = vmatprep.subr.mxu0 %v4086_v42  ;;  %v4576_v17 = vld [vmem:[#allocation44_spill] sm:$0xff]  ;;  %v4577_v42 = vld [vmem:[#allocation45_spill] sm:$0xff] }
 0x479   :  { %1424 = vmatpush1.msra.mxu1 %v3951_v21  ;;  %1457 = vmatprep.mubr.f32.mxu1 %v4546_v48 }
 0x47a   :  { %1495 = vmatpush1.msra.mxu0 %v4091_v55  ;;  %1528 = vmatprep.mubr.f32.mxu0 %v4546_v48 }
 0x47b   :  { %1563 = vmatprep.subr.mxu1 %v3823_v16  ;;  %1634 = vmatprep.subr.mxu0 %v3958_v26 }
 0x51a   :  { %v1289_v35 = vpop.f32.mrf.mxu1  ;;  %v1360_v21 = vpop.f32.mrf.mxu0 }
 0x51b   :  { %v1365_v12 = vadd.f32 %v1289_v35, %v4576_v17  ;;  %v1367_v48 = vadd.f32 %v1360_v21, %v4579_v33  ;;  %v4581_v21 = vld [vmem:[#allocation10_spill] sm:$0xff]  ;;  %v4585_v33 = vld [vmem:[#allocation23_spill] sm:$0xff] }
 0x51c   :  { %v1291_v10 = vpop.f32.mrf.mxu1  ;;  %v1362_v37 = vpop.f32.mrf.mxu0 }
 0x51d   :  { %v2752_v8 = vmul.f32 -1.442695, %v1365_v12  ;;  %v1366_v2 = vadd.f32 %v1291_v10, %v4577_v42  ;;  %v1368_v55 = vadd.f32 %v1362_v37, %v4578_v61  ;;  %v4586_v37 = vld [vmem:[#allocation15_spill] sm:$0xff] }
 0x51f   :  { %3038 = vpow2.f32 %v2752_v8  ;;  %v2753_v25 = vmul.f32 -1.442695, %v1366_v2  ;;  %v2754_v31 = vmul.f32 -1.442695, %v1368_v55 }
 0x521   :  { %3040 = vpow2.f32 %v2753_v25 }
 0x522   :  { %3042 = vtanh.f32 %v1367_v48 }
 0x523   :  { %3044 = vpow2.f32 %v2754_v31  ;;  %v4580_v31 = vld [vmem:[#allocation38_spill] sm:$0xff] }
 0x52c   :  { %v3039_v16 = vpop.eup %3038 }
 0x52d   :  { %v1372_v24 = vadd.f32 1.0, %v3039_v16 }
 0x52e   :  { %v3041_v26 = vpop.eup %3040 }
 0x52f   :  { %3046 = vrcp.f32 %v1372_v24  ;;  %v1378_v17 = vadd.f32 1.0, %v3041_v26  ;;  %v3043_v12 = vpop.eup %3042  ;;  %v4582_v26 = vld [vmem:[#allocation39_spill] sm:$0xff]  ;;  %v4584_v24 = vld [vmem:[#allocation26_spill] sm:$0xff] }
 0x530   :  { %v3045_v42 = vpop.eup %3044 }
 0x531   :  { %3048 = vrcp.f32 %v1378_v17  ;;  %v1385_v25 = vadd.f32 1.0, %v3045_v42  ;;  %v4587_v17 = vld [vmem:[#allocation12_spill] sm:$0xff] }
 0x532   :  { %v4589_v42 = vld [vmem:[#allocation24_spill] sm:$0xff] }
 0x533   :  { %3050 = vrcp.f32 %v1385_v25  ;;  %v4593_v25 = vld [vmem:[#allocation25_spill] sm:$0xff] }
 0x53c   :  { %v3047_v8 = vpop.eup %3046 }
 0x53d   :  { %v1389_v10 = vmul.f32 %v3047_v8, %v3043_v12  ;;  %v4588_v12 = vld [vmem:[#allocation27_spill] sm:$0xff]  ;;  %v4590_v8 = vld [vmem:[#allocation16_spill] sm:$0xff] }
 0x53e   :  { %v3049_v2 = vpop.eup %3048 }
 0x53f   :  { %v1388_v35 = vmul.f32 %v3049_v2, %v3966_v0  ;;  %v4583_v0 = vld [vmem:[#allocation11_spill] sm:$0xff]  ;;  %v4592_v2 = vld [vmem:[#allocation28_spill] sm:$0xff] }
 0x540   :  { %v3051_v16 = vpop.eup %3050 }
 0x541   :  { %v4102_v61 = vadd.f32 %v1389_v10, %v1388_v35  ;;  %v4591_v10 = vld [vmem:[#allocation13_spill] sm:$0xff] }
 0x542   :  { %v4594_v35 = vld [vmem:[#allocation17_spill] sm:$0xff] }
 0x543   :  { %3052 = vtanh.f32 %v4102_v61 }
 0x550   :  { %v3053_v48 = vpop.eup %3052 }
 0x551   :  { %v1392_v55 = vmul.f32 %v3053_v48, %v3051_v16  ;;  %v4595_v16 = vld [vmem:[#allocation14_spill] sm:$0xff]  ;;  %v4596_v48 = vmov 0.0  }
 0x553   :  { %1458 = vmatmul.mubr.f32.vlgmr.msra.gmra.mxu1 %v1392_v55  ;;  %1529 = vmatmul.mubr.f32.vlgmr.msra.gmra.mxu0 %v1392_v55  ;;  %v4597_v55 = vld [vmem:[#allocation29_spill] sm:$0xff] }
 0x554   :  { %1564 = vmatpush1.msra.mxu1 %v3755_v60  ;;  %1635 = vmatpush1.msra.mxu0 %v3970_v39 }
 0x555   :  { %1565 = vmatprep.subr.mxu1 %v3759_v11  ;;  %1636 = vmatprep.subr.mxu0 %v3974_v14 }
 0x556   :  { %1566 = vmatpush1.msra.mxu1 %v3839_v3  ;;  %1637 = vmatpush1.msra.mxu0 %v3978_v46 }
 0x557   :  { %1567 = vmatprep.subr.mxu1 %v3843_v57  ;;  %1638 = vmatprep.subr.mxu0 %v3982_v44 }
 0x558   :  { %1568 = vmatpush1.msra.mxu1 %v3847_v20  ;;  %1639 = vmatpush1.msra.mxu0 %v3986_v6 }
 0x559   :  { %1569 = vmatprep.subr.mxu1 %v3851_v27  ;;  %1640 = vmatprep.subr.mxu0 %v3990_v40 }
 0x55a   :  { %1570 = vmatpush1.msra.mxu1 %v3855_v29  ;;  %1641 = vmatpush1.msra.mxu0 %v3994_v30 }
 0x55b   :  { %1571 = vmatprep.subr.mxu1 %v3859_v32  ;;  %1642 = vmatprep.subr.mxu0 %v3998_v5 }
 0x55c   :  { %1572 = vmatpush1.msra.mxu1 %v3863_v34  ;;  %1643 = vmatpush1.msra.mxu0 %v4002_v62 }
 0x55d   :  { %1573 = vmatprep.subr.mxu1 %v3867_v36  ;;  %1644 = vmatprep.subr.mxu0 %v4006_v51 }
 0x55e   :  { %1574 = vmatpush1.msra.mxu1 %v3871_v4  ;;  %1645 = vmatpush1.msra.mxu0 %v4010_v18 }
 0x55f   :  { %1575 = vmatprep.subr.mxu1 %v3875_v38  ;;  %1646 = vmatprep.subr.mxu0 %v4014_v1 }
 0x560   :  { %1576 = vmatpush1.msra.mxu1 %v3879_v41  ;;  %1647 = vmatpush1.msra.mxu0 %v4018_v9 }
 0x561   :  { %1577 = vmatprep.subr.mxu1 %v3883_v43  ;;  %1648 = vmatprep.subr.mxu0 %v4022_v7 }
 0x562   :  { %1578 = vmatpush1.msra.mxu1 %v3887_v45  ;;  %1649 = vmatpush1.msra.mxu0 %v4026_v58 }
 0x563   :  { %1579 = vmatprep.subr.mxu1 %v3891_v13  ;;  %1650 = vmatprep.subr.mxu0 %v4030_v28 }
 0x564   :  { %1580 = vmatpush1.msra.mxu1 %v3895_v47  ;;  %1651 = vmatpush1.msra.mxu0 %v4034_v49 }
 0x565   :  { %1581 = vmatprep.subr.mxu1 %v3899_v50  ;;  %1652 = vmatprep.subr.mxu0 %v4038_v53 }
 0x566   :  { %1582 = vmatpush1.msra.mxu1 %v3903_v52  ;;  %1653 = vmatpush1.msra.mxu0 %v4042_v63 }
 0x567   :  { %1583 = vmatprep.subr.mxu1 %v3907_v22  ;;  %1654 = vmatprep.subr.mxu0 %v4046_v23 }
 0x568   :  { %1584 = vmatpush1.msra.mxu1 %v3911_v54  ;;  %1655 = vmatpush1.msra.mxu0 %v4050_v15 }
 0x569   :  { %1585 = vmatprep.subr.mxu1 %v3915_v56  ;;  %1656 = vmatprep.subr.mxu0 %v4054_v19 }
 0x56a   :  { %1586 = vmatpush1.msra.mxu1 %v3919_v59  ;;  %1657 = vmatpush1.msra.mxu0 %v4580_v31 }
 0x56b   :  { %1587 = vmatprep.subr.mxu1 %v4581_v21  ;;  %1658 = vmatprep.subr.mxu0 %v4582_v26  ;;  %v4603_v26 = vld [vmem:[#allocation58_spill] sm:$0xff] }
 0x56c   :  { %1588 = vmatpush1.msra.mxu1 %v4583_v0  ;;  %1659 = vmatpush1.msra.mxu0 %v4584_v24  ;;  %v4602_v0 = vld [vmem:[#allocation59_spill] sm:$0xff] }
 0x56d   :  { %1589 = vmatprep.subr.mxu1 %v4585_v33  ;;  %1660 = vmatprep.subr.mxu0 %v4586_v37 }
 0x56e   :  { %1590 = vmatpush1.msra.mxu1 %v4587_v17  ;;  %1661 = vmatpush1.msra.mxu0 %v4588_v12  ;;  %v4598_v12 = vld [vmem:[#allocation9_spill] sm:$0xff] }
 0x56f   :  { %1591 = vmatprep.subr.mxu1 %v4589_v42  ;;  %1662 = vmatprep.subr.mxu0 %v4590_v8  ;;  %v4599_v42 = vld [vmem:[#allocation8_spill] sm:$0xff] }
 0x570   :  { %1592 = vmatpush1.msra.mxu1 %v4591_v10  ;;  %1663 = vmatpush1.msra.mxu0 %v4592_v2  ;;  %v4600_v10 = vld [vmem:[#allocation46_spill] sm:$0xff] }
 0x571   :  { %1593 = vmatprep.subr.mxu1 %v4593_v25  ;;  %1664 = vmatprep.subr.mxu0 %v4594_v35  ;;  %v4601_v25 = vld [vmem:[#allocation47_spill] sm:$0xff] }
 0x572   :  { %1594 = vmatpush1.msra.mxu1 %v4595_v16  ;;  %1627 = vmatprep.mubr.f32.mxu1 %v4596_v48 }
 0x573   :  { %1665 = vmatpush1.msra.mxu0 %v4597_v55  ;;  %1698 = vmatprep.mubr.f32.mxu0 %v4596_v48 }
 0x574   :  { %1733 = vmatprep.subr.mxu1 %v4598_v12  ;;  %1804 = vmatprep.subr.mxu0 %v4599_v42 }
 0x613   :  { %v1459_v8 = vpop.f32.mrf.mxu1  ;;  %v1530_v35 = vpop.f32.mrf.mxu0 }
 0x614   :  { %v1535_v17 = vadd.f32 %v1459_v8, %v4600_v10  ;;  %v1537_v48 = vadd.f32 %v1530_v35, %v4603_v26 }
 0x615   :  { %v1461_v2 = vpop.f32.mrf.mxu1  ;;  %v1532_v24 = vpop.f32.mrf.mxu0 }
 0x616   :  { %v2755_v37 = vmul.f32 -1.442695, %v1535_v17  ;;  %v1536_v33 = vadd.f32 %v1461_v2, %v4601_v25  ;;  %v1538_v55 = vadd.f32 %v1532_v24, %v4602_v0 }
 0x618   :  { %3054 = vpow2.f32 %v2755_v37  ;;  %v2756_v16 = vmul.f32 -1.442695, %v1536_v33  ;;  %v2757_v21 = vmul.f32 -1.442695, %v1538_v55  ;;  %v1917_v55 = vld [vmem:[#allocation2 + $0x6d0] sm:$0xff] }
 0x61a   :  { %3056 = vpow2.f32 %v2756_v16 }
 0x61b   :  { %3058 = vtanh.f32 %v1537_v48  ;;  %v1918_v48 = vld [vmem:[#allocation2 + $0x748] sm:$0xff] }
 0x61c   :  { %3060 = vpow2.f32 %v2757_v21 }
 0x625   :  { %v3055_v12 = vpop.eup %3054 }
 0x626   :  { %v1542_v31 = vadd.f32 1.0, %v3055_v12  ;;  %v1916_v12 = vld [vmem:[#allocation2 + $0x658] sm:$0xff] }
 0x627   :  { %v3057_v42 = vpop.eup %3056 }
 0x628   :  { %3062 = vrcp.f32 %v1542_v31  ;;  %v1548_v8 = vadd.f32 1.0, %v3057_v42  ;;  %v3059_v17 = vpop.eup %3058  ;;  %v1915_v42 = vld [vmem:[#allocation2 + $0x5e0] sm:$0xff] }
 0x629   :  { %v3061_v10 = vpop.eup %3060 }
 0x62a   :  { %3064 = vrcp.f32 %v1548_v8  ;;  %v1555_v25 = vadd.f32 1.0, %v3061_v10  ;;  %v1914_v8 = vld [vmem:[#allocation2 + $0x568] sm:$0xff]  ;;  %v1912_v10 = vld [vmem:[#allocation2 + $0x478] sm:$0xff] }
 0x62c   :  { %3066 = vrcp.f32 %v1555_v25  ;;  %v1908_v25 = vld [vmem:[#allocation2 + $0x298] sm:$0xff] }
 0x635   :  { %v3063_v37 = vpop.eup %3062 }
 0x636   :  { %v1559_v2 = vmul.f32 %v3063_v37, %v3059_v17  ;;  %v1913_v17 = vld [vmem:[#allocation2 + $0x4f0] sm:$0xff]  ;;  %v1911_v37 = vld [vmem:[#allocation2 + $0x400] sm:$0xff] }
 0x637   :  { %v3065_v33 = vpop.eup %3064 }
 0x638   :  { %v1558_v16 = vmul.f32 %v3065_v33, %v4102_v61  ;;  %v1909_v33 = vld [vmem:[#allocation2 + $0x310] sm:$0xff] }
 0x639   :  { %v3067_v26 = vpop.eup %3066 }
 0x63a   :  { %v4176_v0 = vadd.f32 %v1559_v2, %v1558_v16  ;;  %v1910_v2 = vld [vmem:[#allocation2 + $0x388] sm:$0xff]  ;;  %v1907_v16 = vld [vmem:[#allocation2 + $0x220] sm:$0xff] }
 0x63c   :  { %3068 = vtanh.f32 %v4176_v0 }
 0x649   :  { %v3069_v24 = vpop.eup %3068 }
 0x64a   :  { %v1562_v35 = vmul.f32 %v3069_v24, %v3067_v26  ;;  %v1905_v26 = vld [vmem:[#allocation2 + $0x130] sm:$0xff]  ;;  %v1904_v24 = vld [vmem:[#allocation2 + $0xb8] sm:$0xff] }
 0x64c   :  { %1628 = vmatmul.mubr.f32.vlgmr.msra.gmra.mxu1 %v1562_v35  ;;  %1699 = vmatmul.mubr.f32.vlgmr.msra.gmra.mxu0 %v1562_v35  ;;  %v1903_v35 = vld [vmem:[#allocation2 + $0x40] sm:$0xff] }
 0x64d   :  { %1734 = vmatpush1.msra.mxu1 %v3755_v60  ;;  %1805 = vmatpush1.msra.mxu0 %v3970_v39  ;;  %v4604_v60 = vld [vmem:[#allocation38_spill] sm:$0xff]  ;;  %v4623_v39 = vld [vmem:[#allocation49_spill] sm:$0xff] }
 0x64e   :  { %1735 = vmatprep.subr.mxu1 %v3759_v11  ;;  %1806 = vmatprep.subr.mxu0 %v3974_v14  ;;  %v4605_v11 = vld [vmem:[#allocation10_spill] sm:$0xff] }
 0x64f   :  { %1736 = vmatpush1.msra.mxu1 %v3839_v3  ;;  %1807 = vmatpush1.msra.mxu0 %v3978_v46  ;;  %v4606_v3 = vld [vmem:[#allocation39_spill] sm:$0xff] }
 0x650   :  { %1737 = vmatprep.subr.mxu1 %v3843_v57  ;;  %1808 = vmatprep.subr.mxu0 %v3982_v44  ;;  %v4607_v57 = vld [vmem:[#allocation11_spill] sm:$0xff] }
 0x651   :  { %1738 = vmatpush1.msra.mxu1 %v3847_v20  ;;  %1809 = vmatpush1.msra.mxu0 %v3986_v6  ;;  %v4608_v20 = vld [vmem:[#allocation26_spill] sm:$0xff] }
 0x652   :  { %1739 = vmatprep.subr.mxu1 %v3851_v27  ;;  %1810 = vmatprep.subr.mxu0 %v3990_v40  ;;  %v4609_v27 = vld [vmem:[#allocation23_spill] sm:$0xff]  ;;  %v4624_v40 = vld [vmem:[#allocation61_spill] sm:$0xff] }
 0x653   :  { %1740 = vmatpush1.msra.mxu1 %v3855_v29  ;;  %1811 = vmatpush1.msra.mxu0 %v3994_v30  ;;  %v4610_v29 = vld [vmem:[#allocation15_spill] sm:$0xff] }
 0x654   :  { %1741 = vmatprep.subr.mxu1 %v3859_v32  ;;  %1812 = vmatprep.subr.mxu0 %v3998_v5  ;;  %v4611_v32 = vld [vmem:[#allocation12_spill] sm:$0xff] }
 0x655   :  { %1742 = vmatpush1.msra.mxu1 %v3863_v34  ;;  %1813 = vmatpush1.msra.mxu0 %v4002_v62  ;;  %v4612_v34 = vld [vmem:[#allocation27_spill] sm:$0xff]  ;;  %v4625_v5 = vld [vmem:[#allocation60_spill] sm:$0xff] }
 0x656   :  { %1743 = vmatprep.subr.mxu1 %v3867_v36  ;;  %1814 = vmatprep.subr.mxu0 %v4006_v51  ;;  %v4613_v36 = vld [vmem:[#allocation24_spill] sm:$0xff] }
 0x657   :  { %1744 = vmatpush1.msra.mxu1 %v3871_v4  ;;  %1815 = vmatpush1.msra.mxu0 %v4010_v18  ;;  %v4614_v4 = vld [vmem:[#allocation16_spill] sm:$0xff] }
 0x658   :  { %1745 = vmatprep.subr.mxu1 %v3875_v38  ;;  %1816 = vmatprep.subr.mxu0 %v4014_v1  ;;  %v4615_v38 = vld [vmem:[#allocation13_spill] sm:$0xff] }
 0x659   :  { %1746 = vmatpush1.msra.mxu1 %v3879_v41  ;;  %1817 = vmatpush1.msra.mxu0 %v4018_v9  ;;  %v4616_v41 = vld [vmem:[#allocation28_spill] sm:$0xff] }
 0x65a   :  { %1747 = vmatprep.subr.mxu1 %v3883_v43  ;;  %1818 = vmatprep.subr.mxu0 %v4022_v7  ;;  %v4617_v43 = vld [vmem:[#allocation25_spill] sm:$0xff] }
 0x65b   :  { %1748 = vmatpush1.msra.mxu1 %v3887_v45  ;;  %1819 = vmatpush1.msra.mxu0 %v4026_v58  ;;  %v4618_v45 = vld [vmem:[#allocation17_spill] sm:$0xff] }
 0x65c   :  { %1749 = vmatprep.subr.mxu1 %v3891_v13  ;;  %1820 = vmatprep.subr.mxu0 %v4030_v28  ;;  %v4619_v13 = vld [vmem:[#allocation14_spill] sm:$0xff] }
 0x65d   :  { %1750 = vmatpush1.msra.mxu1 %v3895_v47  ;;  %1821 = vmatpush1.msra.mxu0 %v4034_v49  ;;  %v4620_v47 = vmov 0.0  }
 0x65e   :  { %1751 = vmatprep.subr.mxu1 %v3899_v50  ;;  %1822 = vmatprep.subr.mxu0 %v4038_v53  ;;  %v4621_v50 = vld [vmem:[#allocation29_spill] sm:$0xff] }
 0x65f   :  { %1752 = vmatpush1.msra.mxu1 %v3903_v52  ;;  %1823 = vmatpush1.msra.mxu0 %v4042_v63 }
 0x660   :  { %1753 = vmatprep.subr.mxu1 %v3907_v22  ;;  %1824 = vmatprep.subr.mxu0 %v4046_v23  ;;  %v4622_v22 = vld [vmem:[#allocation48_spill] sm:$0xff] }
 0x661   :  { %1754 = vmatpush1.msra.mxu1 %v3911_v54  ;;  %1825 = vmatpush1.msra.mxu0 %v4050_v15 }
 0x662   :  { %1755 = vmatprep.subr.mxu1 %v3915_v56  ;;  %1826 = vmatprep.subr.mxu0 %v4054_v19 }
 0x663   :  { %1756 = vmatpush1.msra.mxu1 %v3919_v59  ;;  %1827 = vmatpush1.msra.mxu0 %v4604_v60 }
 0x664   :  { %1757 = vmatprep.subr.mxu1 %v4605_v11  ;;  %1828 = vmatprep.subr.mxu0 %v4606_v3  ;;  %v4626_v11 = vld [vmem:[#allocation50_spill] sm:$0xff] }
 0x665   :  { %1758 = vmatpush1.msra.mxu1 %v4607_v57  ;;  %1829 = vmatpush1.msra.mxu0 %v4608_v20 }
 0x666   :  { %1759 = vmatprep.subr.mxu1 %v4609_v27  ;;  %1830 = vmatprep.subr.mxu0 %v4610_v29  ;;  %v4627_v27 = vld [vmem:[#allocation51_spill] sm:$0xff] }
 0x667   :  { %1760 = vmatpush1.msra.mxu1 %v4611_v32  ;;  %1831 = vmatpush1.msra.mxu0 %v4612_v34 }
 0x668   :  { %1761 = vmatprep.subr.mxu1 %v4613_v36  ;;  %1832 = vmatprep.subr.mxu0 %v4614_v4  ;;  %v4628_v4 = vld [vmem:[#allocation63_spill] sm:$0xff] }
 0x669   :  { %1762 = vmatpush1.msra.mxu1 %v4615_v38  ;;  %1833 = vmatpush1.msra.mxu0 %v4616_v41  ;;  %v4629_v41 = vld [vmem:[#allocation62_spill] sm:$0xff] }
 0x66a   :  { %1763 = vmatprep.subr.mxu1 %v4617_v43  ;;  %1834 = vmatprep.subr.mxu0 %v4618_v45 }
 0x66b   :  { %1764 = vmatpush1.msra.mxu1 %v4619_v13  ;;  %1797 = vmatprep.mubr.f32.mxu1 %v4620_v47 }
 0x66c   :  { %1835 = vmatpush1.msra.mxu0 %v4621_v50  ;;  %1868 = vmatprep.mubr.f32.mxu0 %v4620_v47 }
 0x66d   :  { %2928 = vmatprep.subr.mxu1 %v4620_v47 }
 0x70c   :  { %v1629_v52 = vpop.f32.mrf.mxu1  ;;  %v1700_v46 = vpop.f32.mrf.mxu0 }
 0x70d   :  { %v1705_v54 = vadd.f32 %v1629_v52, %v4622_v22  ;;  %v1707_v62 = vadd.f32 %v1700_v46, %v4625_v5 }
 0x70e   :  { %v1631_v56 = vpop.f32.mrf.mxu1  ;;  %v1702_v6 = vpop.f32.mrf.mxu0 }
 0x70f   :  { %v2758_v59 = vmul.f32 -1.442695, %v1705_v54  ;;  %v1706_v14 = vadd.f32 %v1631_v56, %v4623_v39  ;;  %v1708_v30 = vadd.f32 %v1702_v6, %v4624_v40 }
 0x711   :  { %3070 = vpow2.f32 %v2758_v59  ;;  %v2759_v44 = vmul.f32 -1.442695, %v1706_v14  ;;  %v2760_v51 = vmul.f32 -1.442695, %v1708_v30 }
 0x713   :  { %3072 = vpow2.f32 %v2759_v44 }
 0x714   :  { %3074 = vtanh.f32 %v1707_v62  ;;  %v2739_v62 = vld [vmem:[%s4345_s4] ss:$0 sm:$0xff] }
 0x715   :  { %3076 = vpow2.f32 %v2760_v51  ;;  %v2764_v51 = vld [vmem:[%s4345_s4 + $0x5] ss:$0 sm:$0xff] }
 0x71e   :  { %v3071_v18 = vpop.eup %3070 }
 0x71f   :  { %v1712_v1 = vadd.f32 1.0, %v3071_v18 }
 0x720   :  { %v3073_v9 = vpop.eup %3072 }
 0x721   :  { %3078 = vrcp.f32 %v1712_v1  ;;  %v1718_v7 = vadd.f32 1.0, %v3073_v9  ;;  %v3075_v58 = vpop.eup %3074  ;;  %v4630_v1 = vld [vmem:[#allocation36_spill] sm:$0xff] }
 0x722   :  { %v3077_v28 = vpop.eup %3076  ;;  %v156_v9 = vadd.f32 %v4630_v1, %v2739_v62  ;;  %v2039_v62 = vld [vmem:[#allocation2 + $0x1c0] sm:$0xff]  ;;  %v2033_v1 = vld [vmem:[#allocation2 + $0x138] sm:$0xff] }
 0x723   :  { %3080 = vrcp.f32 %v1718_v7  ;;  %v1725_v23 = vadd.f32 1.0, %v3077_v28 }
 0x725   :  { %3082 = vrcp.f32 %v1725_v23  ;;  %v2087_v23 = vld [vmem:[#allocation2 + $0x760] sm:$0xff] }
 0x72e   :  { %v3079_v49 = vpop.eup %3078 }
 0x72f   :  { %v1729_v53 = vmul.f32 %v3079_v49, %v3075_v58  ;;  %v2086_v49 = vld [vmem:[#allocation2 + $0x758] sm:$0xff] }
 0x730   :  { %v3081_v63 = vpop.eup %3080  ;;  %2111 = vmatprep.subr.mxu0 %v2086_v49  ;;  %v2031_v49 = vld [vmem:[#allocation2 + $0xd0] sm:$0xff] }
 0x731   :  { %v1728_v15 = vmul.f32 %v3081_v63, %v4176_v0  ;;  %v1906_v0 = vld [vmem:[#allocation2 + $0x1a8] sm:$0xff]  ;;  %v2085_v63 = vld [vmem:[#allocation2 + $0x750] sm:$0xff] }
 0x732   :  { %v3083_v61 = vpop.eup %3082 }
 0x733   :  { %v4249_v19 = vadd.f32 %v1729_v53, %v1728_v15  ;;  %v2088_v53 = vld [vmem:[#allocation2 + $0x768] sm:$0xff]  ;;  %v2082_v15 = vld [vmem:[#allocation2 + $0x6e0] sm:$0xff] }
 0x735   :  { %3084 = vtanh.f32 %v4249_v19 }
 0x742   :  { %v3085_v31 = vpop.eup %3084 }
 0x743   :  { %v1732_v21 = vmul.f32 %v3085_v31, %v3083_v61  ;;  %v2081_v61 = vld [vmem:[#allocation2 + $0x6d8] sm:$0xff]  ;;  %v2083_v31 = vld [vmem:[#allocation2 + $0x6e8] sm:$0xff] }
 0x745   :  { %1798 = vmatmul.mubr.f32.vlgmr.msra.gmra.mxu1 %v1732_v21  ;;  %1869 = vmatmul.mubr.f32.vlgmr.msra.gmra.mxu0 %v1732_v21  ;;  %v2078_v21 = vld [vmem:[#allocation2 + $0x668] sm:$0xff] }
 0x746   :  { %2175 = vmatprep.mubr.f32.mxu0 %v4620_v47  ;;  %2929 = vmatpush3.msra.mxu1 %v1918_v48  ;;  %v2080_v48 = vld [vmem:[#allocation2 + $0x678] sm:$0xff] }
 0x747   :  { %2930 = vmatprep.subr.mxu1 %v4620_v47  ;;  %2960 = vmatprep.mubr.msk.f32.mxu1 %vm3221_vm0, %v4620_v47 }
 0x748   :  { %2931 = vmatpush3.msra.mxu1 %v1917_v55  ;;  %2112 = vmatpush1.msra.mxu0 %v2085_v63  ;;  %v2077_v55 = vld [vmem:[#allocation2 + $0x660] sm:$0xff] }
 0x749   :  { %2932 = vmatprep.subr.mxu1 %v4620_v47  ;;  %2113 = vmatprep.subr.mxu0 %v2082_v15  ;;  %v2028_v63 = vld [vmem:[#allocation2 + $0x60] sm:$0xff]  ;;  %v2027_v15 = vld [vmem:[#allocation2 + $0x58] sm:$0xff] }
 0x74a   :  { %2933 = vmatpush3.msra.mxu1 %v1916_v12  ;;  %v2079_v12 = vld [vmem:[#allocation2 + $0x670] sm:$0xff]  ;;  %2114 = vmatpush1.msra.mxu0 %v2081_v61  ;;  %v2320_v61 = vld [vmem:[#allocation4 + $0x2f8] sm:$0xff] }
 0x74b   :  { %2934 = vmatprep.subr.mxu1 %v4620_v47  ;;  %2115 = vmatprep.subr.mxu0 %v2078_v21 }
 0x74c   :  { %2935 = vmatpush3.msra.mxu1 %v1915_v42  ;;  %v2074_v42 = vld [vmem:[#allocation2 + $0x5f0] sm:$0xff]  ;;  %2116 = vmatpush1.msra.mxu0 %v2077_v55 }
 0x74d   :  { %2936 = vmatprep.subr.mxu1 %v4620_v47  ;;  %2117 = vmatprep.subr.mxu0 %v2074_v42 }
 0x74e   :  { %2937 = vmatpush3.msra.mxu1 %v1914_v8  ;;  %v2076_v8 = vld [vmem:[#allocation2 + $0x600] sm:$0xff] }
 0x74f   :  { %2938 = vmatprep.subr.mxu1 %v4620_v47 }
 0x750   :  { %2939 = vmatpush3.msra.mxu1 %v1913_v17  ;;  %v2073_v17 = vld [vmem:[#allocation2 + $0x5e8] sm:$0xff] }
 0x751   :  { %2940 = vmatprep.subr.mxu1 %v4620_v47  ;;  %2118 = vmatpush1.msra.mxu0 %v2073_v17 }
 0x752   :  { %2941 = vmatpush3.msra.mxu1 %v1912_v10  ;;  %v2075_v10 = vld [vmem:[#allocation2 + $0x5f8] sm:$0xff] }
 0x753   :  { %2942 = vmatprep.subr.mxu1 %v4620_v47 }
 0x754   :  { %2943 = vmatpush3.msra.mxu1 %v1911_v37 }
 0x755   :  { %2944 = vmatprep.subr.mxu1 %v4620_v47 }
 0x756   :  { %2945 = vmatpush3.msra.mxu1 %v1910_v2 }
 0x757   :  { %2946 = vmatprep.subr.mxu1 %v4620_v47 }
 0x758   :  { %2947 = vmatpush3.msra.mxu1 %v1909_v33 }
 0x759   :  { %2948 = vmatprep.subr.mxu1 %v4620_v47 }
 0x75a   :  { %2949 = vmatpush3.msra.mxu1 %v1908_v25 }
 0x75b   :  { %2950 = vmatprep.subr.mxu1 %v4620_v47 }
 0x75c   :  { %2951 = vmatpush3.msra.mxu1 %v1907_v16  ;;  %v2070_v16 = vld [vmem:[#allocation2 + $0x578] sm:$0xff] }
 0x75d   :  { %2952 = vmatprep.subr.mxu1 %v4620_v47  ;;  %2119 = vmatprep.subr.mxu0 %v2070_v16  ;;  %v2319_v16 = vld [vmem:[#allocation4 + $0x2f0] sm:$0xff] }
 0x75e   :  { %2953 = vmatpush3.msra.mxu1 %v1906_v0  ;;  %v2072_v0 = vld [vmem:[#allocation2 + $0x588] sm:$0xff] }
 0x75f   :  { %2954 = vmatprep.subr.mxu1 %v4620_v47 }
 0x760   :  { %2955 = vmatpush3.msra.mxu1 %v1905_v26  ;;  %v2069_v26 = vld [vmem:[#allocation2 + $0x570] sm:$0xff] }
 0x761   :  { %2956 = vmatprep.subr.mxu1 %v4620_v47  ;;  %2120 = vmatpush1.msra.mxu0 %v2069_v26  ;;  %v2286_v26 = vld [vmem:[#allocation4 + $0x1e8] sm:$0xff] }
 0x762   :  { %2957 = vmatpush3.msra.mxu1 %v1904_v24  ;;  %v2071_v24 = vld [vmem:[#allocation2 + $0x580] sm:$0xff] }
 0x763   :  { %2958 = vmatprep.subr.mxu1 %v4620_v47 }
 0x764   :  { %2959 = vmatpush3.msra.mxu1 %v1903_v35  ;;  %v2066_v35 = vld [vmem:[#allocation2 + $0x500] sm:$0xff] }
 0x765   :  { %2182 = vmatprep.subr.mxu1 %v2088_v53  ;;  %2121 = vmatprep.subr.mxu0 %v2066_v35  ;;  %v2026_v53 = vld [vmem:[#allocation2 + $0x50] sm:$0xff]  ;;  %v2270_v35 = vld [vmem:[#allocation4 + $0x168] sm:$0xff] }
 0x805   :  { %v1799_v60 = vpop.f32.mrf.mxu1  ;;  %v1870_v32 = vpop.f32.mrf.mxu0 }
 0x806   :  { %v1875_v3 = vadd.f32 %v1799_v60, %v4626_v11  ;;  %v1877_v43 = vadd.f32 %v1870_v32, %v4629_v41  ;;  %v2068_v60 = vld [vmem:[#allocation2 + $0x510] sm:$0xff]  ;;  %v2065_v11 = vld [vmem:[#allocation2 + $0x4f8] sm:$0xff]  ;;  %v2056_v41 = vld [vmem:[#allocation2 + $0x3a8] sm:$0xff] }
 0x807   :  { %v1801_v57 = vpop.f32.mrf.mxu1  ;;  %v1872_v36 = vpop.f32.mrf.mxu0  ;;  %2122 = vmatpush1.msra.mxu0 %v2065_v11  ;;  %v2058_v32 = vld [vmem:[#allocation2 + $0x410] sm:$0xff]  ;;  %v2285_v11 = vld [vmem:[#allocation4 + $0x1e0] sm:$0xff] }
 0x808   :  { %v2761_v20 = vmul.f32 -1.442695, %v1875_v3  ;;  %v1876_v29 = vadd.f32 %v1801_v57, %v4627_v27  ;;  %v1878_v38 = vadd.f32 %v1872_v36, %v4628_v4  ;;  %v2067_v3 = vld [vmem:[#allocation2 + $0x508] sm:$0xff]  ;;  %v2061_v27 = vld [vmem:[#allocation2 + $0x480] sm:$0xff]  ;;  %v2059_v4 = vld [vmem:[#allocation2 + $0x418] sm:$0xff] }
 0x809   :  { %v2062_v57 = vld [vmem:[#allocation2 + $0x488] sm:$0xff] }
 0x80a   :  { %3086 = vpow2.f32 %v2761_v20  ;;  %v2762_v34 = vmul.f32 -1.442695, %v1876_v29  ;;  %v2763_v45 = vmul.f32 -1.442695, %v1878_v38  ;;  %v2064_v20 = vld [vmem:[#allocation2 + $0x498] sm:$0xff]  ;;  %2123 = vmatprep.subr.mxu0 %v2062_v57  ;;  %v2063_v29 = vld [vmem:[#allocation2 + $0x490] sm:$0xff] }
 0x80b   :  { %2124 = vmatpush1.msra.mxu0 %v2061_v27  ;;  %v2057_v36 = vld [vmem:[#allocation2 + $0x408] sm:$0xff]  ;;  %v2054_v38 = vld [vmem:[#allocation2 + $0x398] sm:$0xff]  ;;  %v2269_v57 = vld [vmem:[#allocation4 + $0x160] sm:$0xff] }
 0x80c   :  { %3088 = vpow2.f32 %v2762_v34  ;;  %v2060_v34 = vld [vmem:[#allocation2 + $0x420] sm:$0xff]  ;;  %2125 = vmatprep.subr.mxu0 %v2058_v32  ;;  %v2284_v27 = vld [vmem:[#allocation4 + $0x1d8] sm:$0xff] }
 0x80d   :  { %3090 = vtanh.f32 %v1877_v43  ;;  %v2053_v43 = vld [vmem:[#allocation2 + $0x390] sm:$0xff]  ;;  %2126 = vmatpush1.msra.mxu0 %v2057_v36  ;;  %v2268_v32 = vld [vmem:[#allocation4 + $0x158] sm:$0xff] }
 0x80e   :  { %3092 = vpow2.f32 %v2763_v45  ;;  %v2055_v45 = vld [vmem:[#allocation2 + $0x3a0] sm:$0xff]  ;;  %2127 = vmatprep.subr.mxu0 %v2054_v38  ;;  %v2283_v36 = vld [vmem:[#allocation4 + $0x1d0] sm:$0xff] }
 0x80f   :  { %2128 = vmatpush1.msra.mxu0 %v2053_v43  ;;  %v2267_v38 = vld [vmem:[#allocation4 + $0x150] sm:$0xff]  ;;  %v2282_v43 = vld [vmem:[#allocation4 + $0x1c8] sm:$0xff] }
 0x817   :  { %v3087_v13 = vpop.eup %3086 }
 0x818   :  { %v1882_v50 = vadd.f32 1.0, %v3087_v13  ;;  %v2050_v13 = vld [vmem:[#allocation2 + $0x320] sm:$0xff] }
 0x819   :  { %v3089_v52 = vpop.eup %3088  ;;  %2129 = vmatprep.subr.mxu0 %v2050_v13  ;;  %v2266_v13 = vld [vmem:[#allocation4 + $0x148] sm:$0xff] }
 0x81a   :  { %3094 = vrcp.f32 %v1882_v50  ;;  %v1888_v22 = vadd.f32 1.0, %v3089_v52  ;;  %v3091_v54 = vpop.eup %3090  ;;  %v2052_v50 = vld [vmem:[#allocation2 + $0x330] sm:$0xff]  ;;  %v2049_v52 = vld [vmem:[#allocation2 + $0x318] sm:$0xff] }
 0x81b   :  { %v3093_v56 = vpop.eup %3092  ;;  %2130 = vmatpush1.msra.mxu0 %v2049_v52  ;;  %v2281_v52 = vld [vmem:[#allocation4 + $0x1c0] sm:$0xff] }
 0x81c   :  { %3096 = vrcp.f32 %v1888_v22  ;;  %v1895_v46 = vadd.f32 1.0, %v3093_v56  ;;  %v2051_v22 = vld [vmem:[#allocation2 + $0x328] sm:$0xff]  ;;  %v2048_v56 = vld [vmem:[#allocation2 + $0x2b8] sm:$0xff] }
 0x81e   :  { %3098 = vrcp.f32 %v1895_v46  ;;  %v2044_v46 = vld [vmem:[#allocation2 + $0x240] sm:$0xff] }
 0x827   :  { %v3095_v59 = vpop.eup %3094 }
 0x828   :  { %v1899_v39 = vmul.f32 %v3095_v59, %v3091_v54  ;;  %v2046_v54 = vld [vmem:[#allocation2 + $0x2a8] sm:$0xff]  ;;  %v2045_v59 = vld [vmem:[#allocation2 + $0x2a0] sm:$0xff] }
 0x829   :  { %v3097_v14 = vpop.eup %3096  ;;  %2131 = vmatprep.subr.mxu0 %v2046_v54  ;;  %v2265_v54 = vld [vmem:[#allocation4 + $0x140] sm:$0xff] }
 0x82a   :  { %v1898_v44 = vmul.f32 %v3097_v14, %v4249_v19  ;;  %v2084_v19 = vld [vmem:[#allocation2 + $0x6f0] sm:$0xff]  ;;  %2132 = vmatpush1.msra.mxu0 %v2045_v59  ;;  %v2280_v59 = vld [vmem:[#allocation4 + $0x1b8] sm:$0xff] }
 0x82b   :  { %v3099_v40 = vpop.eup %3098  ;;  %v2042_v14 = vld [vmem:[#allocation2 + $0x230] sm:$0xff] }
 0x82c   :  { %v1900_v6 = vadd.f32 %v1899_v39, %v1898_v44  ;;  %v2047_v39 = vld [vmem:[#allocation2 + $0x2b0] sm:$0xff]  ;;  %v2041_v44 = vld [vmem:[#allocation2 + $0x228] sm:$0xff]  ;;  %2133 = vmatprep.subr.mxu0 %v2042_v14  ;;  %v2264_v14 = vld [vmem:[#allocation4 + $0x138] sm:$0xff] }
 0x82d   :  { %2134 = vmatpush1.msra.mxu0 %v2041_v44  ;;  %v2279_v44 = vld [vmem:[#allocation4 + $0x1b0] sm:$0xff] }
 0x82e   :  { %3100 = vtanh.f32 %v1900_v6  ;;  %v2043_v6 = vld [vmem:[#allocation2 + $0x238] sm:$0xff] }
 0x83b   :  { %v3101_v30 = vpop.eup %3100 }
 0x83c   :  { %v1902_v5 = vmul.f32 %v3101_v30, %v3099_v40  ;;  %v2038_v40 = vld [vmem:[#allocation2 + $0x1b8] sm:$0xff]  ;;  %v2040_v30 = vld [vmem:[#allocation2 + $0x1c8] sm:$0xff] }
 0x83d   :  { %2135 = vmatprep.subr.mxu0 %v2038_v40  ;;  %v2263_v40 = vld [vmem:[#allocation4 + $0x130] sm:$0xff] }
 0x83e   :  { %2961 = vmatmul.mubr.f32.vlgmr.msra.gmra.mxu1 %v1902_v5  ;;  %v2037_v5 = vld [vmem:[#allocation2 + $0x1b0] sm:$0xff] }
 0x83f   :  { %2246 = vmatprep.mubr.f32.mxu1 %v4620_v47  ;;  %2183 = vmatpush1.msra.mxu1 %v2087_v23  ;;  %v2025_v23 = vld [vmem:[#allocation2 + $0x48] sm:$0xff] }
 0x840   :  { %2184 = vmatprep.subr.mxu1 %v2084_v19  ;;  %2136 = vmatpush1.msra.mxu0 %v2037_v5  ;;  %v2288_v19 = vld [vmem:[#allocation4 + $0x1f8] sm:$0xff]  ;;  %v2278_v5 = vld [vmem:[#allocation4 + $0x1a8] sm:$0xff] }
 0x841   :  { %2185 = vmatpush1.msra.mxu1 %v2083_v31 }
 0x842   :  { %2186 = vmatprep.subr.mxu1 %v2080_v48 }
 0x843   :  { %2187 = vmatpush1.msra.mxu1 %v2079_v12  ;;  %v4289_v12 = vld [vmem:[%s4345_s4 + $0x6] ss:$0 sm:$0xff] }
 0x844   :  { %2188 = vmatprep.subr.mxu1 %v2076_v8  ;;  %v4295_v8 = vld [vmem:[%s4345_s4 + $0x7] ss:$0 sm:$0xff] }
 0x845   :  { %2189 = vmatpush1.msra.mxu1 %v2075_v10 }
 0x846   :  { %2190 = vmatprep.subr.mxu1 %v2072_v0  ;;  %v2271_v0 = vld [vmem:[#allocation4 + $0x170] sm:$0xff] }
 0x847   :  { %2191 = vmatpush1.msra.mxu1 %v2071_v24  ;;  %v2318_v24 = vld [vmem:[#allocation4 + $0x2e8] sm:$0xff] }
 0x848   :  { %2192 = vmatprep.subr.mxu1 %v2068_v60  ;;  %v2302_v60 = vld [vmem:[#allocation4 + $0x268] sm:$0xff] }
 0x849   :  { %2193 = vmatpush1.msra.mxu1 %v2067_v3  ;;  %v2317_v3 = vld [vmem:[#allocation4 + $0x2e0] sm:$0xff] }
 0x84a   :  { %2194 = vmatprep.subr.mxu1 %v2064_v20  ;;  %v2301_v20 = vld [vmem:[#allocation4 + $0x260] sm:$0xff] }
 0x84b   :  { %2195 = vmatpush1.msra.mxu1 %v2063_v29  ;;  %v2316_v29 = vld [vmem:[#allocation4 + $0x2d8] sm:$0xff] }
 0x84c   :  { %2196 = vmatprep.subr.mxu1 %v2060_v34  ;;  %v2300_v34 = vld [vmem:[#allocation4 + $0x258] sm:$0xff] }
 0x84d   :  { %2197 = vmatpush1.msra.mxu1 %v2059_v4  ;;  %v2315_v4 = vld [vmem:[#allocation4 + $0x2d0] sm:$0xff] }
 0x84e   :  { %2198 = vmatprep.subr.mxu1 %v2056_v41  ;;  %v2299_v41 = vld [vmem:[#allocation4 + $0x250] sm:$0xff] }
 0x84f   :  { %2199 = vmatpush1.msra.mxu1 %v2055_v45  ;;  %v2314_v45 = vld [vmem:[#allocation4 + $0x2c8] sm:$0xff] }
 0x850   :  { %2200 = vmatprep.subr.mxu1 %v2052_v50  ;;  %v2298_v50 = vld [vmem:[#allocation4 + $0x248] sm:$0xff] }
 0x851   :  { %2201 = vmatpush1.msra.mxu1 %v2051_v22  ;;  %v2313_v22 = vld [vmem:[#allocation4 + $0x2c0] sm:$0xff] }
 0x852   :  { %2202 = vmatprep.subr.mxu1 %v2048_v56  ;;  %v2297_v56 = vld [vmem:[#allocation4 + $0x240] sm:$0xff] }
 0x853   :  { %2203 = vmatpush1.msra.mxu1 %v2047_v39  ;;  %v2312_v39 = vld [vmem:[#allocation4 + $0x2b8] sm:$0xff] }
 0x854   :  { %2204 = vmatprep.subr.mxu1 %v2044_v46  ;;  %v2296_v46 = vld [vmem:[#allocation4 + $0x238] sm:$0xff] }
 0x855   :  { %2205 = vmatpush1.msra.mxu1 %v2043_v6  ;;  %v2311_v6 = vld [vmem:[#allocation4 + $0x2b0] sm:$0xff] }
 0x856   :  { %2206 = vmatprep.subr.mxu1 %v2040_v30  ;;  %v2295_v30 = vld [vmem:[#allocation4 + $0x230] sm:$0xff] }
 0x857   :  { %2207 = vmatpush1.msra.mxu1 %v2039_v62  ;;  %v2310_v62 = vld [vmem:[#allocation4 + $0x2a8] sm:$0xff] }
 0x8fe   :  { %v1992_v18 = vpop.f32.mrf.mxu1 }
 0x8ff   :  { %v1993_v7 = vadd.f32 %v2764_v51, %v1992_v18  ;;  %v2034_v51 = vld [vmem:[#allocation2 + $0x140] sm:$0xff]  ;;  %v2036_v18 = vld [vmem:[#allocation2 + $0x150] sm:$0xff] }
 0x900   :  { %v2962_v58 = vpop.f32.mrf.mxu1  ;;  %2137 = vmatprep.subr.mxu0 %v2034_v51  ;;  %2208 = vmatprep.subr.mxu1 %v2036_v18  ;;  %v2262_v51 = vld [vmem:[#allocation4 + $0x128] sm:$0xff] }
 0x901   :  { %v1998_v28 = vadd.f32 %v1993_v7, %v156_v9  ;;  %v2035_v9 = vld [vmem:[#allocation2 + $0x148] sm:$0xff]  ;;  %v2032_v58 = vld [vmem:[#allocation2 + $0xd8] sm:$0xff]  ;;  %2138 = vmatpush1.msra.mxu0 %v2033_v1  ;;  %v2277_v1 = vld [vmem:[#allocation4 + $0x1a0] sm:$0xff] }
 0x902   :  { %v2030_v7 = vld [vmem:[#allocation2 + $0xc8] sm:$0xff]  ;;  %2209 = vmatpush1.msra.mxu1 %v2035_v9  ;;  %v2309_v9 = vld [vmem:[#allocation4 + $0x2a0] sm:$0xff] }
 0x903   :  { %1999 = vadd.xlane.f32.xlu0 %v1998_v28  ;;  %2139 = vmatprep.subr.mxu0 %v2030_v7  ;;  %v2294_v18 = vld [vmem:[#allocation4 + $0x228] sm:$0xff]  ;;  %v2261_v7 = vld [vmem:[#allocation4 + $0x120] sm:$0xff] }
 0x904   :  { %2210 = vmatprep.subr.mxu1 %v2032_v58  ;;  %v2293_v58 = vld [vmem:[#allocation4 + $0x220] sm:$0xff] }
 0x905   :  { %2211 = vmatpush1.msra.mxu1 %v2031_v49  ;;  %v2308_v49 = vld [vmem:[#allocation4 + $0x298] sm:$0xff] }
 0x906   :  { %2212 = vmatprep.subr.mxu1 %v2028_v63  ;;  %v2292_v63 = vld [vmem:[#allocation4 + $0x218] sm:$0xff] }
 0x907   :  { %2213 = vmatpush1.msra.mxu1 %v2027_v15  ;;  %v2307_v15 = vld [vmem:[#allocation4 + $0x290] sm:$0xff] }
 0x908   :  { %2858 = vmatprep.subr.mxu1 %v2320_v61  ;;  %v2291_v61 = vld [vmem:[#allocation4 + $0x210] sm:$0xff] }
 0x98c   :  { %v2000_v37 = vpop.xlane.xlu0 %1999 }
 0x98d   :  { %v2002_v2 = vmul.f32 0.0078125, %v2000_v37  ;;  %v2272_v37 = vld [vmem:[#allocation4 + $0x178] sm:$0xff] }
 0x98f   :  { %v4282_v33 = vsub.f32 %v1998_v28, %v2002_v2  ;;  %v2029_v28 = vld [vmem:[#allocation2 + $0xc0] sm:$0xff]  ;;  %v2304_v2 = vld [vmem:[#allocation4 + $0x278] sm:$0xff] }
 0x990   :  { %2140 = vmatpush1.msra.mxu0 %v2029_v28  ;;  %v2276_v28 = vld [vmem:[#allocation4 + $0x198] sm:$0xff] }
 0x991   :  { %v2004_v25 = vmul.f32 %v4282_v33, %v4282_v33  ;;  %2141 = vmatprep.subr.mxu0 %v2026_v53  ;;  %v2260_v53 = vld [vmem:[#allocation4 + $0x118] sm:$0xff] }
 0x992   :  { %2142 = vmatpush1.msra.mxu0 %v2025_v23  ;;  %v2275_v23 = vld [vmem:[#allocation4 + $0x190] sm:$0xff] }
 0x993   :  { %2005 = vadd.xlane.f32.xlu0 %v2004_v25  ;;  %2823 = vmatprep.subr.mxu0 %v2288_v19  ;;  %v2287_v25 = vld [vmem:[#allocation4 + $0x1f0] sm:$0xff] }
 0x994   :  { %v2259_v19 = vld [vmem:[#allocation4 + $0x110] sm:$0xff] }
 0xa1c   :  { %v2006_v31 = vpop.xlane.xlu0 %2005 }
 0xa1d   :  { %v2007_v21 = vmul.f32 0.0078125, %v2006_v31  ;;  %v2274_v31 = vld [vmem:[#allocation4 + $0x188] sm:$0xff] }
 0xa1f   :  { %v2008_v48 = vadd.f32 1e-05, %v2007_v21  ;;  %v2306_v21 = vld [vmem:[#allocation4 + $0x288] sm:$0xff] }
 0xa21   :  { %3102 = vrsqrt.f32 %v2008_v48  ;;  %v2258_v48 = vld [vmem:[#allocation4 + $0x108] sm:$0xff] }
 0xa2e   :  { %v3103_v55 = vpop.eup %3102 }
 0xa2f   :  { %v2010_v42 = vmul.f32 %v3103_v55, %v4282_v33  ;;  %v2303_v33 = vld [vmem:[#allocation4 + $0x270] sm:$0xff]  ;;  %v2290_v55 = vld [vmem:[#allocation4 + $0x208] sm:$0xff] }
 0xa31   :  { %v2017_v17 = vmul.f32 %v4289_v12, %v2010_v42  ;;  %v2273_v42 = vld [vmem:[#allocation4 + $0x180] sm:$0xff] }
 0xa33   :  { %v4299_v10 = vadd.f32 %v4295_v8, %v2017_v17  ;;  %v2305_v17 = vld [vmem:[#allocation4 + $0x280] sm:$0xff] }
 0xa35   :  { %2176 = vmatmul.mubr.f32.vlgmr.msra.gmra.mxu0 %v4299_v10  ;;  %2247 = vmatmul.mubr.f32.vlgmr.msra.gmra.mxu1 %v4299_v10 }
 0xa36   :  { %2824 = vmatpush3.msra.mxu0 %v2272_v37  ;;  %2859 = vmatpush3.msra.mxu1 %v2304_v2  ;;  %v2257_v37 = vld [vmem:[#allocation4 + $0x100] sm:$0xff] }
 0xa37   :  { %2825 = vmatprep.subr.mxu0 %v2287_v25  ;;  %2860 = vmatprep.subr.mxu1 %v2319_v16  ;;  %v2289_v2 = vld [vmem:[#allocation4 + $0x200] sm:$0xff]  ;;  %v2089_v25 = vld [vmem:[%s4345_s4 + $0x8] sm:$0xf]  ;;  %v4631_v16 = vld [vmem:[#allocation35_spill] sm:$0xff] }
 0xa38   :  { %2826 = vmatpush3.msra.mxu0 %v2271_v0  ;;  %2861 = vmatpush3.msra.mxu1 %v2303_v33  ;;  %v2094_v0 = vrot.slane %v2089_v25, %v4631_v16  ;;  %v4632_v33 = vld [vmem:[#allocation34_spill] sm:$0xff] }
 0xa39   :  { %2827 = vmatprep.subr.mxu0 %v2286_v26  ;;  %2862 = vmatprep.subr.mxu1 %v2318_v24  ;;  %v4633_v26 = vsub.s32 2, %v4632_v33 }
 0xa3a   :  { %2828 = vmatpush3.msra.mxu0 %v2270_v35  ;;  %2863 = vmatpush3.msra.mxu1 %v2302_v60  ;;  %v4634_v35 = vld [vmem:[#allocation37_spill] sm:$0xff] }
 0xa3b   :  { %2829 = vmatprep.subr.mxu0 %v2285_v11  ;;  %2864 = vmatprep.subr.mxu1 %v2317_v3  ;;  %v2102_v24 = vrot.slane %v2089_v25, %v4633_v26  ;;  %v2098_v60 = vrot.slane %v2089_v25, %v4634_v35  ;;  %v4635_v11 = vsub.s32 3, %v4632_v33  ;;  %v2485_v33 = vld [vmem:[#allocation2 + $0xe8] sm:$0xff]  ;;  %v2484_v26 = vld [vmem:[#allocation2 + $0xe0] sm:$0xff] }
 0xa3c   :  { %2830 = vmatpush3.msra.mxu0 %v2269_v57  ;;  %2865 = vmatpush3.msra.mxu1 %v2301_v20 }
 0xa3d   :  { %2831 = vmatprep.subr.mxu0 %v2284_v27  ;;  %2866 = vmatprep.subr.mxu1 %v2316_v29  ;;  %v2106_v3 = vrot.slane %v2089_v25, %v4635_v11  ;;  %v2487_v25 = vld [vmem:[#allocation2 + $0x160] sm:$0xff]  ;;  %v2630_v11 = vld [vmem:[#allocation4 + $0x3f8] sm:$0xff] }
 0xa3e   :  { %2832 = vmatpush3.msra.mxu0 %v2268_v32  ;;  %2867 = vmatpush3.msra.mxu1 %v2300_v34 }
 0xa3f   :  { %2833 = vmatprep.subr.mxu0 %v2283_v36  ;;  %2868 = vmatprep.subr.mxu1 %v2315_v4 }
 0xa40   :  { %2834 = vmatpush3.msra.mxu0 %v2267_v38  ;;  %2869 = vmatpush3.msra.mxu1 %v2299_v41 }
 0xa41   :  { %2835 = vmatprep.subr.mxu0 %v2282_v43  ;;  %2870 = vmatprep.subr.mxu1 %v2314_v45 }
 0xa42   :  { %2836 = vmatpush3.msra.mxu0 %v2266_v13  ;;  %2871 = vmatpush3.msra.mxu1 %v2298_v50 }
 0xa43   :  { %2837 = vmatprep.subr.mxu0 %v2281_v52  ;;  %2872 = vmatprep.subr.mxu1 %v2313_v22  ;;  %v2767_v52 = vld [vmem:[%s4345_s4 + $0xc] ss:$0 sm:$0xff] }
 0xa44   :  { %2838 = vmatpush3.msra.mxu0 %v2265_v54  ;;  %2873 = vmatpush3.msra.mxu1 %v2297_v56 }
 0xa45   :  { %2839 = vmatprep.subr.mxu0 %v2280_v59  ;;  %2874 = vmatprep.subr.mxu1 %v2312_v39 }
 0xa46   :  { %2840 = vmatpush3.msra.mxu0 %v2264_v14  ;;  %2875 = vmatpush3.msra.mxu1 %v2296_v46 }
 0xa47   :  { %2841 = vmatprep.subr.mxu0 %v2279_v44  ;;  %2876 = vmatprep.subr.mxu1 %v2311_v6  ;;  %v2513_v44 = vld [vmem:[#allocation2 + $0x778] sm:$0xff]  ;;  %v2512_v6 = vld [vmem:[#allocation2 + $0x770] sm:$0xff] }
 0xa48   :  { %2842 = vmatpush3.msra.mxu0 %v2263_v40  ;;  %2877 = vmatpush3.msra.mxu1 %v2295_v30  ;;  %v2511_v40 = vld [vmem:[#allocation2 + $0x700] sm:$0xff]  ;;  %v2509_v30 = vld [vmem:[#allocation2 + $0x688] sm:$0xff] }
 0xa49   :  { %2843 = vmatprep.subr.mxu0 %v2278_v5  ;;  %2878 = vmatprep.subr.mxu1 %v2310_v62  ;;  %v2508_v5 = vld [vmem:[#allocation2 + $0x680] sm:$0xff]  ;;  %v2507_v62 = vld [vmem:[#allocation2 + $0x610] sm:$0xff] }
 0xa4a   :  { %2844 = vmatpush3.msra.mxu0 %v2262_v51  ;;  %2879 = vmatpush3.msra.mxu1 %v2294_v18  ;;  %v2506_v51 = vld [vmem:[#allocation2 + $0x608] sm:$0xff] }
 0xa4b   :  { %2845 = vmatprep.subr.mxu0 %v2277_v1  ;;  %2880 = vmatprep.subr.mxu1 %v2309_v9 }
 0xa4c   :  { %2846 = vmatpush3.msra.mxu0 %v2261_v7  ;;  %2881 = vmatpush3.msra.mxu1 %v2293_v58  ;;  %v2505_v7 = vld [vmem:[#allocation2 + $0x598] sm:$0xff]  ;;  %v2504_v58 = vld [vmem:[#allocation2 + $0x590] sm:$0xff] }
 0xa4d   :  { %2847 = vmatprep.subr.mxu0 %v2276_v28  ;;  %2882 = vmatprep.subr.mxu1 %v2308_v49  ;;  %v2503_v28 = vld [vmem:[#allocation2 + $0x520] sm:$0xff]  ;;  %v2502_v49 = vld [vmem:[#allocation2 + $0x518] sm:$0xff] }
 0xa4e   :  { %2848 = vmatpush3.msra.mxu0 %v2260_v53  ;;  %2883 = vmatpush3.msra.mxu1 %v2292_v63  ;;  %v2501_v53 = vld [vmem:[#allocation2 + $0x4a8] sm:$0xff]  ;;  %v2500_v63 = vld [vmem:[#allocation2 + $0x4a0] sm:$0xff] }
 0xa4f   :  { %2849 = vmatprep.subr.mxu0 %v2275_v23  ;;  %2884 = vmatprep.subr.mxu1 %v2307_v15  ;;  %v2499_v23 = vld [vmem:[#allocation2 + $0x430] sm:$0xff]  ;;  %v2498_v15 = vld [vmem:[#allocation2 + $0x428] sm:$0xff] }
 0xa50   :  { %2850 = vmatpush3.msra.mxu0 %v2259_v19  ;;  %2885 = vmatpush3.msra.mxu1 %v2291_v61  ;;  %v2497_v19 = vld [vmem:[#allocation2 + $0x3b8] sm:$0xff]  ;;  %v2496_v61 = vld [vmem:[#allocation2 + $0x3b0] sm:$0xff] }
 0xa51   :  { %2851 = vmatprep.subr.mxu0 %v2274_v31  ;;  %2886 = vmatprep.subr.mxu1 %v2306_v21  ;;  %v2495_v31 = vld [vmem:[#allocation2 + $0x340] sm:$0xff]  ;;  %v2494_v21 = vld [vmem:[#allocation2 + $0x338] sm:$0xff] }
 0xa52   :  { %2852 = vmatpush3.msra.mxu0 %v2258_v48  ;;  %2887 = vmatpush3.msra.mxu1 %v2290_v55  ;;  %v2493_v48 = vld [vmem:[#allocation2 + $0x2c8] sm:$0xff]  ;;  %v2492_v55 = vld [vmem:[#allocation2 + $0x2c0] sm:$0xff] }
 0xa53   :  { %2853 = vmatprep.subr.mxu0 %v2273_v42  ;;  %2888 = vmatprep.subr.mxu1 %v2305_v17  ;;  %v2491_v42 = vld [vmem:[#allocation2 + $0x250] sm:$0xff]  ;;  %v2490_v17 = vld [vmem:[#allocation2 + $0x248] sm:$0xff] }
 0xa54   :  { %2854 = vmatpush3.msra.mxu0 %v2257_v37  ;;  %2889 = vmatpush3.msra.mxu1 %v2289_v2  ;;  %v2489_v37 = vld [vmem:[#allocation2 + $0x1d8] sm:$0xff]  ;;  %v2488_v2 = vld [vmem:[#allocation2 + $0x1d0] sm:$0xff] }
 0xa55   :  { %2526 = vmatprep.subr.mxu0 %v2513_v44  ;;  %2893 = vmatprep.subr.mxu1 %v2630_v11 }
 0xaf5   :  { %v2177_v57 = vpop.f32.mrf.mxu0  ;;  %v2248_v20 = vpop.f32.mrf.mxu1 }
 0xaf6   :  { %v2178_v27 = vadd.f32 %v2177_v57, %v2094_v0  ;;  %v2249_v29 = vadd.f32 %v2248_v20, %v2102_v24  ;;  %v2486_v0 = vld [vmem:[#allocation2 + $0x158] sm:$0xff]  ;;  %v2483_v24 = vld [vmem:[#allocation2 + $0x70] sm:$0xff] }
 0xaf7   :  { %v2179_v32 = vpop.f32.mrf.mxu0  ;;  %v2250_v34 = vpop.f32.mrf.mxu1  ;;  %v2629_v57 = vld [vmem:[#allocation4 + $0x3f0] sm:$0xff] }
 0xaf8   :  { %v2180_v36 = vadd.f32 %v2179_v32, %v2098_v60  ;;  %v2251_v4 = vadd.f32 %v2250_v34, %v2106_v3  ;;  %v2253_v43 = vmax.f32 %v2178_v27, 0.0  ;;  %v2255_v45 = vmax.f32 %v2249_v29, 0.0  ;;  %v2482_v60 = vld [vmem:[#allocation2 + $0x68] sm:$0xff]  ;;  %v2614_v3 = vld [vmem:[#allocation4 + $0x378] sm:$0xff]  ;;  %v2613_v20 = vld [vmem:[#allocation4 + $0x370] sm:$0xff] }
 0xaf9   :  { %v2628_v27 = vld [vmem:[#allocation4 + $0x3e8] sm:$0xff]  ;;  %v2627_v32 = vld [vmem:[#allocation4 + $0x3e0] sm:$0xff] }
 0xafa   :  { %v2254_v38 = vmax.f32 %v2180_v36, 0.0  ;;  %v2256_v41 = vmax.f32 %v2251_v4, 0.0  ;;  %v2612_v29 = vld [vmem:[#allocation4 + $0x368] sm:$0xff]  ;;  %v2611_v34 = vld [vmem:[#allocation4 + $0x360] sm:$0xff]  ;;  %v2626_v36 = vld [vmem:[#allocation4 + $0x3d8] sm:$0xff] }
 0xafb   :  { %v2610_v4 = vld [vmem:[#allocation4 + $0x358] sm:$0xff] }
 0xafc   :  { %2392 = vmatprep.mubr.f32.mxu0 %v2254_v38  ;;  %2462 = vmatprep.mubr.f32.mxu1 %v2256_v41  ;;  %v2625_v38 = vld [vmem:[#allocation4 + $0x3d0] sm:$0xff] }
 0xafd   :  { %2393 = vmatmul.mubr.f32.vlgmr.msra.gmra.mxu0 %v2253_v43  ;;  %2463 = vmatmul.mubr.f32.vlgmr.msra.gmra.mxu1 %v2255_v45  ;;  %v2609_v41 = vld [vmem:[#allocation4 + $0x350] sm:$0xff]  ;;  %v2624_v43 = vld [vmem:[#allocation4 + $0x3c8] sm:$0xff] }
 0xafe   :  { %2590 = vmatprep.mubr.f32.mxu0 %v4620_v47  ;;  %v2510_v47 = vld [vmem:[#allocation2 + $0x6f8] sm:$0xff]  ;;  %2527 = vmatpush1.msra.mxu0 %v2512_v6  ;;  %v2608_v45 = vld [vmem:[#allocation4 + $0x348] sm:$0xff] }
 0xaff   :  { %2528 = vmatprep.subr.mxu0 %v2511_v40  ;;  %2894 = vmatpush3.msra.mxu1 %v2614_v3 }
 0xb00   :  { %2529 = vmatpush1.msra.mxu0 %v2510_v47  ;;  %2895 = vmatprep.subr.mxu1 %v2629_v57 }
 0xb01   :  { %2530 = vmatprep.subr.mxu0 %v2509_v30  ;;  %2896 = vmatpush3.msra.mxu1 %v2613_v20 }
 0xb02   :  { %2531 = vmatpush1.msra.mxu0 %v2508_v5  ;;  %2897 = vmatprep.subr.mxu1 %v2628_v27 }
 0xb03   :  { %2532 = vmatprep.subr.mxu0 %v2507_v62  ;;  %2898 = vmatpush3.msra.mxu1 %v2612_v29 }
 0xb04   :  { %2533 = vmatpush1.msra.mxu0 %v2506_v51  ;;  %2899 = vmatprep.subr.mxu1 %v2627_v32  ;;  %v2618_v51 = vld [vmem:[#allocation4 + $0x398] sm:$0xff] }
 0xb05   :  { %2534 = vmatprep.subr.mxu0 %v2505_v7  ;;  %2900 = vmatpush3.msra.mxu1 %v2611_v34  ;;  %v2616_v7 = vld [vmem:[#allocation4 + $0x388] sm:$0xff] }
 0xb06   :  { %2535 = vmatpush1.msra.mxu0 %v2504_v58  ;;  %2901 = vmatprep.subr.mxu1 %v2626_v36  ;;  %v2600_v58 = vld [vmem:[#allocation4 + $0x308] sm:$0xff] }
 0xb07   :  { %2536 = vmatprep.subr.mxu0 %v2503_v28  ;;  %2902 = vmatpush3.msra.mxu1 %v2610_v4  ;;  %v2615_v28 = vld [vmem:[#allocation4 + $0x380] sm:$0xff] }
 0xb08   :  { %2537 = vmatpush1.msra.mxu0 %v2502_v49  ;;  %2903 = vmatprep.subr.mxu1 %v2625_v38  ;;  %v2599_v49 = vld [vmem:[#allocation4 + $0x300] sm:$0xff] }
 0xb09   :  { %2538 = vmatprep.subr.mxu0 %v2501_v53  ;;  %2904 = vmatpush3.msra.mxu1 %v2609_v41 }
 0xb0a   :  { %2539 = vmatpush1.msra.mxu0 %v2500_v63  ;;  %2905 = vmatprep.subr.mxu1 %v2624_v43 }
 0xb0b   :  { %2540 = vmatprep.subr.mxu0 %v2499_v23  ;;  %2906 = vmatpush3.msra.mxu1 %v2608_v45 }
 0xb0c   :  { %2541 = vmatpush1.msra.mxu0 %v2498_v15 }
 0xb0d   :  { %2542 = vmatprep.subr.mxu0 %v2497_v19 }
 0xb0e   :  { %2543 = vmatpush1.msra.mxu0 %v2496_v61 }
 0xb0f   :  { %2544 = vmatprep.subr.mxu0 %v2495_v31 }
 0xb10   :  { %2545 = vmatpush1.msra.mxu0 %v2494_v21  ;;  %v2768_v21 = vld [vmem:[%s4345_s4 + $0xf] ss:$0 sm:$0xff] }
 0xb11   :  { %2546 = vmatprep.subr.mxu0 %v2493_v48 }
 0xb12   :  { %2547 = vmatpush1.msra.mxu0 %v2492_v55 }
 0xb13   :  { %2548 = vmatprep.subr.mxu0 %v2491_v42 }
 0xb14   :  { %2549 = vmatpush1.msra.mxu0 %v2490_v17 }
 0xb15   :  { %2550 = vmatprep.subr.mxu0 %v2489_v37  ;;  %v3222_v37 = vmov 0  }
 0xb16   :  { %2551 = vmatpush1.msra.mxu0 %v2488_v2  ;;  %2972 = vset.pattern.permute.xlu1 %v3222_v37  ;;  %v2770_v2 = vld [vmem:[%s4345_s4 + $0x11] ss:$0 sm:$0xff] }
 0xb17   :  { %2552 = vmatprep.subr.mxu0 %v2487_v25  ;;  %2973 = vset.pattern.permute.xlu0 %v3222_v37 }
 0xb18   :  { %2553 = vmatpush1.msra.mxu0 %v2486_v0 }
 0xb19   :  { %2554 = vmatprep.subr.mxu0 %v2485_v33 }
 0xb1a   :  { %2555 = vmatpush1.msra.mxu0 %v2484_v26 }
 0xb1b   :  { %2556 = vmatprep.subr.mxu0 %v2483_v24 }
 0xb1c   :  { %2557 = vmatpush1.msra.mxu0 %v2482_v60 }
 0xbbd   :  { %v2855_v13 = vpop.f32.mrf.mxu0  ;;  %v2890_v50 = vpop.f32.mrf.mxu1 }
 0xbbf   :  { %v2856_v22 = vpop.f32.mrf.mxu0  ;;  %v2891_v54 = vpop.f32.mrf.mxu1 }
 0xbc0   :  { %v2857_v56 = vadd.f32 %v2856_v22, %v2855_v13  ;;  %v2892_v39 = vadd.f32 %v2891_v54, %v2890_v50  ;;  %v2623_v13 = vld [vmem:[#allocation4 + $0x3c0] sm:$0xff]  ;;  %v2606_v22 = vld [vmem:[#allocation4 + $0x338] sm:$0xff]  ;;  %v2621_v54 = vld [vmem:[#allocation4 + $0x3b0] sm:$0xff] }
 0xbc1   :  { %v2607_v50 = vld [vmem:[#allocation4 + $0x340] sm:$0xff]  ;;  %2907 = vmatprep.subr.mxu1 %v2623_v13 }
 0xbc2   :  { %v2395_v59 = vadd.f32 %v2857_v56, %v2767_v52  ;;  %v2622_v52 = vld [vmem:[#allocation4 + $0x3b8] sm:$0xff]  ;;  %2908 = vmatpush3.msra.mxu1 %v2607_v50  ;;  %v2605_v56 = vld [vmem:[#allocation4 + $0x330] sm:$0xff] }
 0xbc3   :  { %2909 = vmatprep.subr.mxu1 %v2622_v52 }
 0xbc4   :  { %v2465_v14 = vadd.f32 %v2892_v39, %v2395_v59  ;;  %2910 = vmatpush3.msra.mxu1 %v2606_v22  ;;  %v2620_v59 = vld [vmem:[#allocation4 + $0x3a8] sm:$0xff] }
 0xbc5   :  { %2911 = vmatprep.subr.mxu1 %v2621_v54  ;;  %v2604_v39 = vld [vmem:[#allocation4 + $0x328] sm:$0xff] }
 0xbc6   :  { %v2468_v46 = vadd.f32 %v2465_v14, %v4299_v10  ;;  %2912 = vmatpush3.msra.mxu1 %v2605_v56  ;;  %v2619_v14 = vld [vmem:[#allocation4 + $0x3a0] sm:$0xff] }
 0xbc7   :  { %2913 = vmatprep.subr.mxu1 %v2620_v59 }
 0xbc8   :  { %2469 = vadd.xlane.f32.xlu1 %v2468_v46  ;;  %2914 = vmatpush3.msra.mxu1 %v2604_v39 }
 0xbc9   :  { %2915 = vmatprep.subr.mxu1 %v2619_v14 }
 0xc51   :  { %v2470_v18 = vpop.xlane.xlu1 %2469 }
 0xc52   :  { %v2471_v1 = vmul.f32 0.0078125, %v2470_v18  ;;  %v2602_v18 = vld [vmem:[#allocation4 + $0x318] sm:$0xff] }
 0xc54   :  { %v4317_v10 = vsub.f32 %v2468_v46, %v2471_v1  ;;  %v2603_v46 = vld [vmem:[#allocation4 + $0x320] sm:$0xff]  ;;  %v2617_v1 = vld [vmem:[#allocation4 + $0x390] sm:$0xff] }
 0xc55   :  { %2916 = vmatpush3.msra.mxu1 %v2603_v46 }
 0xc56   :  { %v2473_v9 = vmul.f32 %v4317_v10, %v4317_v10  ;;  %2917 = vmatprep.subr.mxu1 %v2618_v51 }
 0xc57   :  { %2918 = vmatpush3.msra.mxu1 %v2602_v18 }
 0xc58   :  { %2474 = vadd.xlane.f32.xlu1 %v2473_v9  ;;  %2919 = vmatprep.subr.mxu1 %v2617_v1  ;;  %v2601_v9 = vld [vmem:[#allocation4 + $0x310] sm:$0xff] }
 0xc59   :  { %2920 = vmatpush3.msra.mxu1 %v2601_v9 }
 0xc5a   :  { %2921 = vmatprep.subr.mxu1 %v2616_v7 }
 0xc5b   :  { %2922 = vmatpush3.msra.mxu1 %v2600_v58 }
 0xc5c   :  { %2923 = vmatprep.subr.mxu1 %v2615_v28 }
 0xc5d   :  { %2924 = vmatpush3.msra.mxu1 %v2599_v49 }
 0xce1   :  { %v2475_v44 = vpop.xlane.xlu1 %2474 }
 0xce2   :  { %v2476_v6 = vmul.f32 0.0078125, %v2475_v44 }
 0xce4   :  { %v2477_v40 = vadd.f32 1e-05, %v2476_v6 }
 0xce6   :  { %3104 = vrsqrt.f32 %v2477_v40 }
 0xcf3   :  { %v3105_v47 = vpop.eup %3104 }
 0xcf4   :  { %v2479_v30 = vmul.f32 %v3105_v47, %v4317_v10 }
 0xcf6   :  { %v2480_v5 = vmul.f32 %v4289_v12, %v2479_v30  ;;  %v2514_v12 = vld [vmem:[%s4345_s4 + $0xd] sm:$0x3] }
 0xcf7   :  { %v2523_v10 = vrot.slane %v2514_v12, %v4634_v35 }
 0xcf8   :  { %v2481_v62 = vadd.f32 %v4295_v8, %v2480_v5  ;;  %v2519_v8 = vrot.slane %v2514_v12, %v4631_v16  ;;  %v2769_v16 = vld [vmem:[%s4345_s4 + $0x10] ss:$0 sm:$0xff] }
 0xcfa   :  { %2591 = vmatmul.mubr.f32.vlgmr.msra.gmra.mxu0 %v2481_v62 }
 0xdba   :  { %v2592_v53 = vpop.f32.mrf.mxu0 }
 0xdbb   :  { %v2593_v63 = vadd.f32 %v2592_v53, %v2519_v8 }
 0xdbc   :  { %v2594_v23 = vpop.f32.mrf.mxu0 }
 0xdbd   :  { %v2595_v15 = vadd.f32 %v2594_v23, %v2523_v10  ;;  %v2597_v61 = vmax.f32 %v2593_v63, 0.0 }
 0xdbf   :  { %v2598_v19 = vmax.f32 %v2595_v15, 0.0 }
 0xdc1   :  { %2702 = vmatprep.mubr.f32.mxu1 %v2598_v19 }
 0xdc2   :  { %2703 = vmatmul.mubr.f32.vlgmr.msra.gmra.mxu1 %v2597_v61 }
 0xe82   :  { %v2925_v31 = vpop.f32.mrf.mxu1 }
 0xe84   :  { %v2926_v48 = vpop.f32.mrf.mxu1 }
 0xe85   :  { %v2927_v55 = vadd.f32 %v2926_v48, %v2925_v31 }
 0xe87   :  { %v2705_v42 = vadd.f32 %v2927_v55, %v2768_v21 }
 0xe89   :  { %v2708_v35 = vmax.f32 %v2705_v42, 0.0 }
 0xe8b   :  { %v2717_v17 = vmul.f32 %v2769_v16, %v2708_v35 }
 0xe8d   :  { %2718 = vadd.xlane.f32.xlu0 %v2717_v17 }
 0xf16   :  { %v2719_v25 = vpop.xlane.xlu0 %2718 }
 0xf17   :  { %v2726_v0 = vadd.f32 %v2770_v2, %v2719_v25 }
 0xf19   :  { %2729 = vperm.xlu1 %2972, %v2726_v0  }
 0xf94   :  { %v2730_v33 = vpop.permute.xlu1 %2729 }
 0xf95   :  { %2732 = vst [vmem:[%s4346_s5] sm:$0xff] %v2730_v33 }
 0xf96   :  { %2737 = vsyncpa [#allocation3], 1 }
 0xf97   :  { %2738 = vsyncpa [#allocation5], 1 }

</bundles_post_ra>
